<compile_context>
chip_gen: v5e
topology: v5e:2x2
jax: 0.10.0
libtpu: 0.0.40
codegen_flags: <defaults>
</compile_context>

<pallas_src>
import functools

import jax
import jax.numpy as jnp
from jax.experimental import pallas as pl
from jax.experimental.pallas import tpu as pltpu

EPS = 1e-5
LANE = 128


def _round_up(x, m):
    return (x + m - 1) // m * m


def _pick_tile_oh(oh, ow, opad, *, max_rows=512, max_bytes=2 * 1024 * 1024):
    """Largest divisor of OH whose [toh*OW, OPAD] f32 tile stays within budget."""
    best = 1
    for toh in range(1, oh + 1):
        if oh % toh:
            continue
        rows = toh * ow
        if rows <= max_rows and rows * opad * 4 <= max_bytes:
            best = toh
    return best


def _conv_stats_kernel(x_ref, w_ref, y_ref, st_ref, *,
                       kh, kw, stride, dilation, toh, ow, cin, opad):
    """Phase 1: conv of one (image, output-row-tile) block + per-tile channel stats.

    x_ref : (1, Hp, Wp, C)      padded NHWC image (resident across the row-tile axis)
    w_ref : (KH*KW, C, OPAD)    one (C, OPAD) weight matrix per kernel tap
    y_ref : (1, toh, OW, OPAD)  f32 conv output tile (lane-dense)
    st_ref: (1, 1, 2, OPAD)     per-tile [sum, sum_of_squares] per channel
    """
    t = pl.program_id(1)
    rows = toh * ow
    row0 = t * (toh * stride)                       # input-row base of this output tile
    acc = jnp.zeros((rows, opad), jnp.float32)
    for i in range(kh):
        for j in range(kw):
            r0 = row0 + i * dilation
            c0 = j * dilation
            if stride == 1:
                patch = x_ref[0, pl.ds(r0, toh), c0:c0 + ow, :]
            else:
                # TODO(synk): strided in-kernel slices are implemented but only the
                # stride == 1 path is exercised by the test below.
                patch = x_ref[0, pl.ds(r0, toh, stride), pl.ds(c0, ow, stride), :]
            acc = acc + jnp.dot(patch.reshape(rows, cin), w_ref[i * kw + j],
                                preferred_element_type=jnp.float32)
    y_ref[0, :, :, :] = acc.reshape(toh, ow, opad).astype(y_ref.dtype)
    st_ref[0, 0, 0:1, :] = jnp.sum(acc, axis=0, keepdims=True)
    st_ref[0, 0, 1:2, :] = jnp.sum(acc * acc, axis=0, keepdims=True)


def _bn_apply_kernel(y_ref, sc_ref, sh_ref, o_ref, *, o_real, opad):
    """Phase 2: out = y*scale + shift (2 VALU ops/element), dropping channel padding."""
    y = y_ref[0, :, :, :]                           # (toh, OW, OPAD) f32
    sc = sc_ref[...].reshape(1, 1, opad)
    sh = sh_ref[...].reshape(1, 1, opad)
    z = y * sc + sh
    o_ref[0, :, :, :] = z[:, :, :o_real].astype(o_ref.dtype)


def basicblock_forward(x, weight, gamma, beta, *, stride=1, padding=0, dilation=1,
                       use_bf16=True):
    """x: (N, C, H, W) f32; weight: (O, C, KH, KW); gamma/beta: (O,). Returns (N, O, OH, OW)."""
    n, cin, h, w = x.shape
    o, _, kh, kw = weight.shape
    oh = (h + 2 * padding - dilation * (kh - 1) - 1) // stride + 1
    ow = (w + 2 * padding - dilation * (kw - 1) - 1) // stride + 1
    opad = _round_up(o, LANE)                        # lane-dense channel axis
    compute_dtype = jnp.bfloat16 if use_bf16 else jnp.float32
    itemsize = jnp.dtype(compute_dtype).itemsize

    # Padded NHWC input, DMA'd once per image by phase 1.
    # TODO(synk): keep the surrounding network NHWC end-to-end (and/or emit NCHW blocks
    # directly from phase 2) to eliminate these wrapper-side layout transposes.
    x_pad = jnp.pad(x.transpose(0, 2, 3, 1),
                    ((0, 0), (padding, padding), (padding, padding), (0, 0)))
    x_pad = x_pad.astype(compute_dtype)
    hp, wp = h + 2 * padding, w + 2 * padding

    # Weights as one (C, OPAD) matrix per kernel tap; K ordering (i, j) matches the kernel.
    w_taps = weight.transpose(2, 3, 1, 0).reshape(kh * kw, cin, o)
    w_taps = jnp.pad(w_taps, ((0, 0), (0, 0), (0, opad - o))).astype(compute_dtype)

    toh = _pick_tile_oh(oh, ow, opad)
    tiles = oh // toh
    rows_total = n * oh * ow

    # VMEM budget (layout-padded, incl. double buffers) with headroom; cap below v7x's 64 MiB.
    x_blk = hp * _round_up(wp, 8) * LANE * itemsize
    w_blk = kh * kw * _round_up(cin, 8) * opad * itemsize
    y_blk = _round_up(toh * ow, 8) * opad * 4
    vmem_need = 2 * x_blk + 2 * w_blk + 3 * y_blk + 4 * 2 * opad * 4
    vmem_limit = int(min(max(2 * vmem_need, 32 * 1024 * 1024), 48 * 1024 * 1024))

    # ---- Phase 1: conv + per-tile partial BN statistics -------------------------------
    conv_kernel = functools.partial(
        _conv_stats_kernel, kh=kh, kw=kw, stride=stride, dilation=dilation,
        toh=toh, ow=ow, cin=cin, opad=opad)
    flops1 = 2 * rows_total * cin * kh * kw * opad
    bytes1 = (x_pad.size * itemsize + w_taps.size * itemsize
              + rows_total * opad * 4 + n * tiles * 2 * opad * 4)

    y, stats = pl.pallas_call(
        conv_kernel,
        grid=(n, tiles),
        in_specs=[
            pl.BlockSpec((1, hp, wp, cin), lambda b, t: (b, 0, 0, 0)),
            pl.BlockSpec((kh * kw, cin, opad), lambda b, t: (0, 0, 0)),
        ],
        out_specs=(
            pl.BlockSpec((1, toh, ow, opad), lambda b, t: (b, t, 0, 0)),
            pl.BlockSpec((1, 1, 2, opad), lambda b, t: (b, t, 0, 0)),
        ),
        out_shape=(
            jax.ShapeDtypeStruct((n, oh, ow, opad), jnp.float32),
            jax.ShapeDtypeStruct((n, tiles, 2, opad), jnp.float32),
        ),
        compiler_params=pltpu.CompilerParams(
            dimension_semantics=("parallel", "parallel"),
            vmem_limit_bytes=vmem_limit),
        cost_estimate=pl.CostEstimate(flops=int(flops1), transcendentals=0,
                                      bytes_accessed=int(bytes1)),
    )(x_pad, w_taps)

    # ---- Tiny per-channel reduction + scale/shift (negligible JAX work) ----------------
    tot = stats.sum(axis=(0, 1))                     # (2, OPAD)
    count = float(rows_total)
    mean = tot[0] / count
    var = jnp.maximum(tot[1] / count - mean * mean, 0.0)    # biased var (PyTorch BN training)
    inv = jax.lax.rsqrt(var + EPS)
    gamma_p = jnp.pad(gamma.astype(jnp.float32), (0, opad - o))
    beta_p = jnp.pad(beta.astype(jnp.float32), (0, opad - o))
    scale = (gamma_p * inv).reshape(1, opad)
    shift = (beta_p - mean * gamma_p * inv).reshape(1, opad)

    # ---- Phase 2: normalize y tiles --------------------------------------------------
    bn_kernel = functools.partial(_bn_apply_kernel, o_real=o, opad=opad)
    flops2 = 2 * rows_total * opad
    bytes2 = rows_total * opad * 4 + rows_total * o * 4 + 2 * opad * 4

    out_nhwc = pl.pallas_call(
        bn_kernel,
        grid=(n, tiles),
        in_specs=[
            pl.BlockSpec((1, toh, ow, opad), lambda b, t: (b, t, 0, 0)),
            pl.BlockSpec((1, opad), lambda b, t: (0, 0)),
            pl.BlockSpec((1, opad), lambda b, t: (0, 0)),
        ],
        out_specs=pl.BlockSpec((1, toh, ow, o), lambda b, t: (b, t, 0, 0)),
        out_shape=jax.ShapeDtypeStruct((n, oh, ow, o), x.dtype),
        compiler_params=pltpu.CompilerParams(
            dimension_semantics=("parallel", "parallel"),
            vmem_limit_bytes=vmem_limit),
        cost_estimate=pl.CostEstimate(flops=int(flops2), transcendentals=0,
                                      bytes_accessed=int(bytes2)),
    )(y, scale, shift)

    # TODO(synk): write NCHW blocks directly from phase 2 to drop this final transpose.
    return out_nhwc.transpose(0, 3, 1, 2)


def _reference(x, weight, gamma, beta, *, stride, padding, dilation):
    y = jax.lax.conv_general_dilated(
        x, weight,
        window_strides=(stride, stride),
        padding=((padding, padding), (padding, padding)),
        rhs_dilation=(dilation, dilation),
        dimension_numbers=("NCHW", "OIHW", "NCHW"),
        precision=jax.lax.Precision.HIGHEST,
    )
    mean = y.mean(axis=(0, 2, 3), keepdims=True)
    var = ((y - mean) ** 2).mean(axis=(0, 2, 3), keepdims=True)
    return ((y - mean) / jnp.sqrt(var + EPS) * gamma.reshape(1, -1, 1, 1)
            + beta.reshape(1, -1, 1, 1))


if __name__ == "__main__":
    # basicblock(in_planes=4, out_planes=8, kernel_size=3, stride=1, padding=1, dilation=1)
    N, C, H, W = 2, 4, 32, 32
    O, KH, KW = 8, 3, 3
    stride, padding, dilation = 1, 1, 1

    key = jax.random.PRNGKey(0)
    kx, kw_, kg, kb = jax.random.split(key, 4)
    x = jax.random.normal(kx, (N, C, H, W), dtype=jnp.float32)
    weight = jax.random.normal(kw_, (O, C, KH, KW), dtype=jnp.float32) * 0.1
    gamma = 1.0 + 0.1 * jax.random.normal(kg, (O,), dtype=jnp.float32)
    beta = 0.1 * jax.random.normal(kb, (O,), dtype=jnp.float32)

    ref = _reference(x, weight, gamma, beta,
                     stride=stride, padding=padding, dilation=dilation)

    # f32 MXU path: tight check against the XLA reference.
    out_f32 = jax.block_until_ready(
        basicblock_forward(x, weight, gamma, beta, stride=stride, padding=padding,
                           dilation=dilation, use_bf16=False))
    assert out_f32.shape == (N, O, H, W)
    assert jnp.allclose(out_f32, ref, atol=2e-4, rtol=2e-4), \
        float(jnp.max(jnp.abs(out_f32 - ref)))

    # bf16 MXU path (performance default): tolerance loosened by bf16 operand rounding.
    out_bf16 = jax.block_until_ready(
        basicblock_forward(x, weight, gamma, beta, stride=stride, padding=padding,
                           dilation=dilation, use_bf16=True))
    assert out_bf16.shape == (N, O, H, W)
    assert jnp.allclose(out_bf16, ref, atol=5e-2, rtol=5e-2), \
        float(jnp.max(jnp.abs(out_bf16 - ref)))

    print("KERNEL_OK")
</pallas_src>

<mosaic_0001>
module attributes {stable_mosaic.version = 11 : i64} {
  func.func @_conv_stats_kernel(%arg0: i32, %arg1: i32, %arg2: memref<1x34x34x4xf32, #tpu.memory_space<vmem>>, %arg3: memref<9x4x128xf32, #tpu.memory_space<vmem>>, %arg4: memref<1x16x32x128xf32, #tpu.memory_space<vmem>>, %arg5: memref<1x1x2x128xf32, #tpu.memory_space<vmem>>) attributes {dimension_semantics = [#tpu.dimension_semantics<parallel>, #tpu.dimension_semantics<parallel>], iteration_bounds = array<i64: 2, 2>, scalar_prefetch = 0 : i64, scratch_operands = 0 : i64, tpu.core_type = #tpu.core_type<tc>, window_params = [{transform_indices = @transform_0, window_bounds = array<i64: 1, 34, 34, 4>}, {pipeline_mode = #tpu.pipeline_mode<synchronous>, transform_indices = @transform_1, window_bounds = array<i64: 9, 4, 128>}, {transform_indices = @transform_2, window_bounds = array<i64: 1, 16, 32, 128>}, {transform_indices = @transform_3, window_bounds = array<i64: 1, 1, 2, 128>}]} {
    %c16_i32 = arith.constant 16 : i32
    %0 = arith.muli %arg1, %c16_i32 : i32
    %cst = arith.constant 0.000000e+00 : f32
    %1 = vector.broadcast %cst : f32 to vector<512x128xf32>
    %c0_i32 = arith.constant 0 : i32
    %2 = arith.addi %0, %c0_i32 : i32
    %c0 = arith.constant 0 : index
    %3 = arith.index_cast %2 : i32 to index
    %c0_0 = arith.constant 0 : index
    %c0_1 = arith.constant 0 : index
    %4 = vector.load %arg2[%c0, %3, %c0_0, %c0_1] : memref<1x34x34x4xf32, #tpu.memory_space<vmem>>, vector<1x16x32x4xf32>
    %5 = vector.shape_cast %4 : vector<1x16x32x4xf32> to vector<16x32x4xf32>
    %6 = vector.shape_cast %5 : vector<16x32x4xf32> to vector<512x4xf32>
    %c0_2 = arith.constant 0 : index
    %c0_3 = arith.constant 0 : index
    %c0_4 = arith.constant 0 : index
    %7 = vector.load %arg3[%c0_2, %c0_3, %c0_4] : memref<9x4x128xf32, #tpu.memory_space<vmem>>, vector<1x4x128xf32>
    %8 = vector.shape_cast %7 : vector<1x4x128xf32> to vector<4x128xf32>
    %cst_5 = arith.constant dense<0.000000e+00> : vector<512x128xf32>
    %9 = tpu.matmul %6, %8, %cst_5 {dimension_numbers = #tpu.dot_dimension_numbers<[1], [0], [0], [1], [0, 0, 1, 1], [], []>} : vector<512x4xf32>, vector<4x128xf32>, vector<512x128xf32> -> vector<512x128xf32>
    %10 = arith.addf %1, %9 : vector<512x128xf32>
    %c0_i32_6 = arith.constant 0 : i32
    %11 = arith.addi %0, %c0_i32_6 : i32
    %c0_7 = arith.constant 0 : index
    %12 = arith.index_cast %11 : i32 to index
    %c1 = arith.constant 1 : index
    %c0_8 = arith.constant 0 : index
    %13 = vector.load %arg2[%c0_7, %12, %c1, %c0_8] : memref<1x34x34x4xf32, #tpu.memory_space<vmem>>, vector<1x16x32x4xf32>
    %14 = vector.shape_cast %13 : vector<1x16x32x4xf32> to vector<16x32x4xf32>
    %15 = vector.shape_cast %14 : vector<16x32x4xf32> to vector<512x4xf32>
    %c1_9 = arith.constant 1 : index
    %c0_10 = arith.constant 0 : index
    %c0_11 = arith.constant 0 : index
    %16 = vector.load %arg3[%c1_9, %c0_10, %c0_11] : memref<9x4x128xf32, #tpu.memory_space<vmem>>, vector<1x4x128xf32>
    %17 = vector.shape_cast %16 : vector<1x4x128xf32> to vector<4x128xf32>
    %cst_12 = arith.constant dense<0.000000e+00> : vector<512x128xf32>
    %18 = tpu.matmul %15, %17, %cst_12 {dimension_numbers = #tpu.dot_dimension_numbers<[1], [0], [0], [1], [0, 0, 1, 1], [], []>} : vector<512x4xf32>, vector<4x128xf32>, vector<512x128xf32> -> vector<512x128xf32>
    %19 = arith.addf %10, %18 : vector<512x128xf32>
    %c0_i32_13 = arith.constant 0 : i32
    %20 = arith.addi %0, %c0_i32_13 : i32
    %c0_14 = arith.constant 0 : index
    %21 = arith.index_cast %20 : i32 to index
    %c2 = arith.constant 2 : index
    %c0_15 = arith.constant 0 : index
    %22 = vector.load %arg2[%c0_14, %21, %c2, %c0_15] : memref<1x34x34x4xf32, #tpu.memory_space<vmem>>, vector<1x16x32x4xf32>
    %23 = vector.shape_cast %22 : vector<1x16x32x4xf32> to vector<16x32x4xf32>
    %24 = vector.shape_cast %23 : vector<16x32x4xf32> to vector<512x4xf32>
    %c2_16 = arith.constant 2 : index
    %c0_17 = arith.constant 0 : index
    %c0_18 = arith.constant 0 : index
    %25 = vector.load %arg3[%c2_16, %c0_17, %c0_18] : memref<9x4x128xf32, #tpu.memory_space<vmem>>, vector<1x4x128xf32>
    %26 = vector.shape_cast %25 : vector<1x4x128xf32> to vector<4x128xf32>
    %cst_19 = arith.constant dense<0.000000e+00> : vector<512x128xf32>
    %27 = tpu.matmul %24, %26, %cst_19 {dimension_numbers = #tpu.dot_dimension_numbers<[1], [0], [0], [1], [0, 0, 1, 1], [], []>} : vector<512x4xf32>, vector<4x128xf32>, vector<512x128xf32> -> vector<512x128xf32>
    %28 = arith.addf %19, %27 : vector<512x128xf32>
    %c1_i32 = arith.constant 1 : i32
    %29 = arith.addi %0, %c1_i32 : i32
    %c0_20 = arith.constant 0 : index
    %30 = arith.index_cast %29 : i32 to index
    %c0_21 = arith.constant 0 : index
    %c0_22 = arith.constant 0 : index
    %31 = vector.load %arg2[%c0_20, %30, %c0_21, %c0_22] : memref<1x34x34x4xf32, #tpu.memory_space<vmem>>, vector<1x16x32x4xf32>
    %32 = vector.shape_cast %31 : vector<1x16x32x4xf32> to vector<16x32x4xf32>
    %33 = vector.shape_cast %32 : vector<16x32x4xf32> to vector<512x4xf32>
    %c3 = arith.constant 3 : index
    %c0_23 = arith.constant 0 : index
    %c0_24 = arith.constant 0 : index
    %34 = vector.load %arg3[%c3, %c0_23, %c0_24] : memref<9x4x128xf32, #tpu.memory_space<vmem>>, vector<1x4x128xf32>
    %35 = vector.shape_cast %34 : vector<1x4x128xf32> to vector<4x128xf32>
    %cst_25 = arith.constant dense<0.000000e+00> : vector<512x128xf32>
    %36 = tpu.matmul %33, %35, %cst_25 {dimension_numbers = #tpu.dot_dimension_numbers<[1], [0], [0], [1], [0, 0, 1, 1], [], []>} : vector<512x4xf32>, vector<4x128xf32>, vector<512x128xf32> -> vector<512x128xf32>
    %37 = arith.addf %28, %36 : vector<512x128xf32>
    %c1_i32_26 = arith.constant 1 : i32
    %38 = arith.addi %0, %c1_i32_26 : i32
    %c0_27 = arith.constant 0 : index
    %39 = arith.index_cast %38 : i32 to index
    %c1_28 = arith.constant 1 : index
    %c0_29 = arith.constant 0 : index
    %40 = vector.load %arg2[%c0_27, %39, %c1_28, %c0_29] : memref<1x34x34x4xf32, #tpu.memory_space<vmem>>, vector<1x16x32x4xf32>
    %41 = vector.shape_cast %40 : vector<1x16x32x4xf32> to vector<16x32x4xf32>
    %42 = vector.shape_cast %41 : vector<16x32x4xf32> to vector<512x4xf32>
    %c4 = arith.constant 4 : index
    %c0_30 = arith.constant 0 : index
    %c0_31 = arith.constant 0 : index
    %43 = vector.load %arg3[%c4, %c0_30, %c0_31] : memref<9x4x128xf32, #tpu.memory_space<vmem>>, vector<1x4x128xf32>
    %44 = vector.shape_cast %43 : vector<1x4x128xf32> to vector<4x128xf32>
    %cst_32 = arith.constant dense<0.000000e+00> : vector<512x128xf32>
    %45 = tpu.matmul %42, %44, %cst_32 {dimension_numbers = #tpu.dot_dimension_numbers<[1], [0], [0], [1], [0, 0, 1, 1], [], []>} : vector<512x4xf32>, vector<4x128xf32>, vector<512x128xf32> -> vector<512x128xf32>
    %46 = arith.addf %37, %45 : vector<512x128xf32>
    %c1_i32_33 = arith.constant 1 : i32
    %47 = arith.addi %0, %c1_i32_33 : i32
    %c0_34 = arith.constant 0 : index
    %48 = arith.index_cast %47 : i32 to index
    %c2_35 = arith.constant 2 : index
    %c0_36 = arith.constant 0 : index
    %49 = vector.load %arg2[%c0_34, %48, %c2_35, %c0_36] : memref<1x34x34x4xf32, #tpu.memory_space<vmem>>, vector<1x16x32x4xf32>
    %50 = vector.shape_cast %49 : vector<1x16x32x4xf32> to vector<16x32x4xf32>
    %51 = vector.shape_cast %50 : vector<16x32x4xf32> to vector<512x4xf32>
    %c5 = arith.constant 5 : index
    %c0_37 = arith.constant 0 : index
    %c0_38 = arith.constant 0 : index
    %52 = vector.load %arg3[%c5, %c0_37, %c0_38] : memref<9x4x128xf32, #tpu.memory_space<vmem>>, vector<1x4x128xf32>
    %53 = vector.shape_cast %52 : vector<1x4x128xf32> to vector<4x128xf32>
    %cst_39 = arith.constant dense<0.000000e+00> : vector<512x128xf32>
    %54 = tpu.matmul %51, %53, %cst_39 {dimension_numbers = #tpu.dot_dimension_numbers<[1], [0], [0], [1], [0, 0, 1, 1], [], []>} : vector<512x4xf32>, vector<4x128xf32>, vector<512x128xf32> -> vector<512x128xf32>
    %55 = arith.addf %46, %54 : vector<512x128xf32>
    %c2_i32 = arith.constant 2 : i32
    %56 = arith.addi %0, %c2_i32 : i32
    %c0_40 = arith.constant 0 : index
    %57 = arith.index_cast %56 : i32 to index
    %c0_41 = arith.constant 0 : index
    %c0_42 = arith.constant 0 : index
    %58 = vector.load %arg2[%c0_40, %57, %c0_41, %c0_42] : memref<1x34x34x4xf32, #tpu.memory_space<vmem>>, vector<1x16x32x4xf32>
    %59 = vector.shape_cast %58 : vector<1x16x32x4xf32> to vector<16x32x4xf32>
    %60 = vector.shape_cast %59 : vector<16x32x4xf32> to vector<512x4xf32>
    %c6 = arith.constant 6 : index
    %c0_43 = arith.constant 0 : index
    %c0_44 = arith.constant 0 : index
    %61 = vector.load %arg3[%c6, %c0_43, %c0_44] : memref<9x4x128xf32, #tpu.memory_space<vmem>>, vector<1x4x128xf32>
    %62 = vector.shape_cast %61 : vector<1x4x128xf32> to vector<4x128xf32>
    %cst_45 = arith.constant dense<0.000000e+00> : vector<512x128xf32>
    %63 = tpu.matmul %60, %62, %cst_45 {dimension_numbers = #tpu.dot_dimension_numbers<[1], [0], [0], [1], [0, 0, 1, 1], [], []>} : vector<512x4xf32>, vector<4x128xf32>, vector<512x128xf32> -> vector<512x128xf32>
    %64 = arith.addf %55, %63 : vector<512x128xf32>
    %c2_i32_46 = arith.constant 2 : i32
    %65 = arith.addi %0, %c2_i32_46 : i32
    %c0_47 = arith.constant 0 : index
    %66 = arith.index_cast %65 : i32 to index
    %c1_48 = arith.constant 1 : index
    %c0_49 = arith.constant 0 : index
    %67 = vector.load %arg2[%c0_47, %66, %c1_48, %c0_49] : memref<1x34x34x4xf32, #tpu.memory_space<vmem>>, vector<1x16x32x4xf32>
    %68 = vector.shape_cast %67 : vector<1x16x32x4xf32> to vector<16x32x4xf32>
    %69 = vector.shape_cast %68 : vector<16x32x4xf32> to vector<512x4xf32>
    %c7 = arith.constant 7 : index
    %c0_50 = arith.constant 0 : index
    %c0_51 = arith.constant 0 : index
    %70 = vector.load %arg3[%c7, %c0_50, %c0_51] : memref<9x4x128xf32, #tpu.memory_space<vmem>>, vector<1x4x128xf32>
    %71 = vector.shape_cast %70 : vector<1x4x128xf32> to vector<4x128xf32>
    %cst_52 = arith.constant dense<0.000000e+00> : vector<512x128xf32>
    %72 = tpu.matmul %69, %71, %cst_52 {dimension_numbers = #tpu.dot_dimension_numbers<[1], [0], [0], [1], [0, 0, 1, 1], [], []>} : vector<512x4xf32>, vector<4x128xf32>, vector<512x128xf32> -> vector<512x128xf32>
    %73 = arith.addf %64, %72 : vector<512x128xf32>
    %c2_i32_53 = arith.constant 2 : i32
    %74 = arith.addi %0, %c2_i32_53 : i32
    %c0_54 = arith.constant 0 : index
    %75 = arith.index_cast %74 : i32 to index
    %c2_55 = arith.constant 2 : index
    %c0_56 = arith.constant 0 : index
    %76 = vector.load %arg2[%c0_54, %75, %c2_55, %c0_56] : memref<1x34x34x4xf32, #tpu.memory_space<vmem>>, vector<1x16x32x4xf32>
    %77 = vector.shape_cast %76 : vector<1x16x32x4xf32> to vector<16x32x4xf32>
    %78 = vector.shape_cast %77 : vector<16x32x4xf32> to vector<512x4xf32>
    %c8 = arith.constant 8 : index
    %c0_57 = arith.constant 0 : index
    %c0_58 = arith.constant 0 : index
    %79 = vector.load %arg3[%c8, %c0_57, %c0_58] : memref<9x4x128xf32, #tpu.memory_space<vmem>>, vector<1x4x128xf32>
    %80 = vector.shape_cast %79 : vector<1x4x128xf32> to vector<4x128xf32>
    %cst_59 = arith.constant dense<0.000000e+00> : vector<512x128xf32>
    %81 = tpu.matmul %78, %80, %cst_59 {dimension_numbers = #tpu.dot_dimension_numbers<[1], [0], [0], [1], [0, 0, 1, 1], [], []>} : vector<512x4xf32>, vector<4x128xf32>, vector<512x128xf32> -> vector<512x128xf32>
    %82 = arith.addf %73, %81 : vector<512x128xf32>
    %83 = vector.shape_cast %82 : vector<512x128xf32> to vector<16x32x128xf32>
    %c0_60 = arith.constant 0 : index
    %c0_61 = arith.constant 0 : index
    %c0_62 = arith.constant 0 : index
    %c0_63 = arith.constant 0 : index
    %84 = vector.load %arg4[%c0_60, %c0_61, %c0_62, %c0_63] : memref<1x16x32x128xf32, #tpu.memory_space<vmem>>, vector<1x16x32x128xf32>
    %85 = vector.shape_cast %84 : vector<1x16x32x128xf32> to vector<16x32x128xf32>
    %86 = vector.shape_cast %83 : vector<16x32x128xf32> to vector<1x16x32x128xf32>
    tpu.vector_store %arg4[%c0_60, %c0_61, %c0_62, %c0_63], %86 {strides = array<i32>} : memref<1x16x32x128xf32, #tpu.memory_space<vmem>>, vector<1x16x32x128xf32>,
    %cst_64 = arith.constant dense<0.000000e+00> : vector<128xf32>
    %87 = vector.multi_reduction <add>, %82, %cst_64 [0] : vector<512x128xf32> to vector<128xf32>
    %88 = vector.shape_cast %87 : vector<128xf32> to vector<1x128xf32>
    %c0_65 = arith.constant 0 : index
    %c0_66 = arith.constant 0 : index
    %c0_67 = arith.constant 0 : index
    %c0_68 = arith.constant 0 : index
    %89 = vector.load %arg5[%c0_65, %c0_66, %c0_67, %c0_68] : memref<1x1x2x128xf32, #tpu.memory_space<vmem>>, vector<1x1x1x128xf32>
    %90 = vector.shape_cast %89 : vector<1x1x1x128xf32> to vector<1x128xf32>
    %91 = vector.shape_cast %88 : vector<1x128xf32> to vector<1x1x1x128xf32>
    tpu.vector_store %arg5[%c0_65, %c0_66, %c0_67, %c0_68], %91 {strides = array<i32>} : memref<1x1x2x128xf32, #tpu.memory_space<vmem>>, vector<1x1x1x128xf32>,
    %92 = arith.mulf %82, %82 : vector<512x128xf32>
    %cst_69 = arith.constant dense<0.000000e+00> : vector<128xf32>
    %93 = vector.multi_reduction <add>, %92, %cst_69 [0] : vector<512x128xf32> to vector<128xf32>
    %94 = vector.shape_cast %93 : vector<128xf32> to vector<1x128xf32>
    %c0_70 = arith.constant 0 : index
    %c0_71 = arith.constant 0 : index
    %c1_72 = arith.constant 1 : index
    %c0_73 = arith.constant 0 : index
    %95 = vector.load %arg5[%c0_70, %c0_71, %c1_72, %c0_73] : memref<1x1x2x128xf32, #tpu.memory_space<vmem>>, vector<1x1x1x128xf32>
    %96 = vector.shape_cast %95 : vector<1x1x1x128xf32> to vector<1x128xf32>
    %97 = vector.shape_cast %94 : vector<1x128xf32> to vector<1x1x1x128xf32>
    tpu.vector_store %arg5[%c0_70, %c0_71, %c1_72, %c0_73], %97 {strides = array<i32>} : memref<1x1x2x128xf32, #tpu.memory_space<vmem>>, vector<1x1x1x128xf32>,
    return
  }
  func.func @transform_0(%arg0: i32, %arg1: i32) -> (i32, i32, i32, i32) {
    %c0_i32 = arith.constant 0 : i32
    %c0_i32_0 = arith.constant 0 : i32
    %c0_i32_1 = arith.constant 0 : i32
    %c0_i32_2 = arith.constant 0 : i32
    return %arg0, %c0_i32, %c0_i32_0, %c0_i32_1 : i32, i32, i32, i32
  }
  func.func @transform_1(%arg0: i32, %arg1: i32) -> (i32, i32, i32) {
    %c0_i32 = arith.constant 0 : i32
    %c0_i32_0 = arith.constant 0 : i32
    %c0_i32_1 = arith.constant 0 : i32
    %c0_i32_2 = arith.constant 0 : i32
    return %c0_i32, %c0_i32_0, %c0_i32_1 : i32, i32, i32
  }
  func.func @transform_2(%arg0: i32, %arg1: i32) -> (i32, i32, i32, i32) {
    %c0_i32 = arith.constant 0 : i32
    %c0_i32_0 = arith.constant 0 : i32
    %c0_i32_1 = arith.constant 0 : i32
    return %arg0, %arg1, %c0_i32, %c0_i32_0 : i32, i32, i32, i32
  }
  func.func @transform_3(%arg0: i32, %arg1: i32) -> (i32, i32, i32, i32) {
    %c0_i32 = arith.constant 0 : i32
    %c0_i32_0 = arith.constant 0 : i32
    %c0_i32_1 = arith.constant 0 : i32
    return %arg0, %arg1, %c0_i32, %c0_i32_0 : i32, i32, i32, i32
  }
}

</mosaic_0001>

<bundles_post_ra>
// kernel: tpu_custom_call.1
= control target key start
LH: loop header
LB: loop body
LE: loop exit
PB: predicated region body
PF: predicated region fallthrough
CT: control target
= control target key end

     0   :  { %9 = vsyncpa [#allocation3], 0  ;;  %s8630_s0 = inlined_call_operand.vmem [shape: f32[2,34,34,4], index: 0, kind: input, shape index: {}]   ;;  %s8631_s1 = inlined_call_operand.vmem [shape: f32[9,4,128], index: 1, kind: input, shape index: {}]   ;;  %s8632_s2 = inlined_call_operand.hbm [shape: f32[2,32,32,128], index: 2, kind: output, shape index: {0}]   ;;  %s8633_s3 = inlined_call_operand.hbm [shape: f32[2,2,2,128], index: 3, kind: output, shape index: {1}]  }
   0x1   :  { %11 = vsyncpa [#allocation3 + $0x1], 0 }
   0x2   :  { %12 = vsyncpa [#allocation5], 0 }
   0x3   :  { %14 = vsyncpa [#allocation5 + $0x1], 0  ;;  %s6548_s12 = smov 0   ;;  %s6550_s13 = smov 0  }
   0x4   :  { %s6552_s14 = smov 0   ;;  %s6554_s15 = smov 0  }
   0x5   :  { %s6556_s16 = smov 0   ;;  %s6558_s17 = smov 0  }
   0x6   :  { %s6560_s18 = smov 0   ;;  %s6562_s19 = smov 0  }
   0x7 LB: > { %s5314_s20 = sadd.s32 4294967295, %s6524_s19   ;;  %s5315_s21 = sadd.s32 4294967294, %s6524_s19   ;;  %s6524_s19 = sphi %s6562_s19, %s20_s19   ;;  %s6520_s18 = sphi %s6560_s18, %s8742_s18   ;;  %s6516_s17 = sphi %s6558_s17, %s8741_s17   ;;  %s6512_s16 = sphi %s6556_s16, %s8740_s16   ;;  %s6508_s15 = sphi %s6554_s15, %s8739_s15   ;;  %s6504_s14 = sphi %s6552_s14, %s8738_s14   ;;  %s6500_s13 = sphi %s6550_s13, %s8737_s13   ;;  %s6496_s12 = sphi %s6548_s12, %s8736_s12  }
   0x8   : > { %s29_s22 = sadd.s32 1, %s6516_s17  ;;  %s32_s23 = sadd.s32 1, %s6520_s18 }
   0x9   : > { %p30_p0 = scmp.ge.s32.totalorder %s29_s22, 2  ;;  %p98_p1 = scmp.ne.s32.totalorder %s6504_s14, %s6500_s13 }
   0xa   : > { %p99_p2 = scmp.eq.s32.totalorder %s5314_s20, 3  ;;  %p104_p5 = scmp.ne.s32.totalorder %s6500_s13, %s6496_s12 }
   0xb   : > { %s8744_s22 = smov (%p30_p0, %s29_s22), 0  ;;  %s8746_s23 = smov (!%p30_p0, %s32_s23), %s6520_s18 }
   0xc   : > { %s84_s24 = ssub.s32 %s6516_s17, %s8744_s22  ;;  %p6599_p3 = por %p99_p2, %p98_p1 }
   0xd   : > { %p34_p4 = scmp.ge.s32.totalorder %s8746_s23, 2  ;;  %p105_p6 = scmp.eq.s32.totalorder %s5315_s21, 3 }
   0xe   : > { %p5318_p7 = scmp.ge.s32.totalorder %s6524_s19, 1  ;;  %p162_p9 = scmp.lt.s32.totalorder %s6524_s19, 5 }
   0xf   : > { %s8748_s23 = smov (%p34_p4, %s8746_s23), 0  ;;  %p6608_p8 = por %p105_p6, %p104_p5 }
  0x10   : > { %s83_s27 = ssub.s32 %s6520_s18, %s8748_s23  ;;  %s88_s28 = sadd.s32 1, %s6504_s14 }
  0x11   : > { %s85_s29 = sor.u32 %s84_s24, %s83_s27  ;;  %p163_p10 = pnand %p5318_p7, %p162_p9 }
  0x12   : > { %p86_p11 = scmp.eq.s32.totalorder %s85_s29, 0 }
  0x13   : > { %166 = sbr.rel (%p163_p10) target bundleno = 1336 (0x538), region = 28 }
  0x14   : > { %s6617_s30 = scalar_select %p86_p11, %s6504_s14, %s88_s28  }
  0x18   : > { %v5324_v0 = vld [vmem:[%s8631_s1 + $0x4] sm:$0xf]  ;;  %vm524_vm0 = vcmask 1043456   ;;  %p191_p12 = scmp.lt.s32.totalorder %s6512_s16, 1  ;;  %v5455_v1 = vld [vmem:[%s8631_s1 + $0x8] sm:$0xf] }
  0x19   : > { %6316 = vmatpush.msk.msra.mxu1 %vm524_vm0, %v5324_v0  ;;  %6317 = vmatpush.msk.msra.mxu2 %vm524_vm0, %v5324_v0  ;;  %v5587_v2 = vld [vmem:[%s8631_s1 + $0xc] sm:$0xf]  ;;  %v264_v3 = vld [vmem:[%s8631_s1] sm:$0xf]  ;;  %v5717_v4 = vld [vmem:[%s8631_s1 + $0x10] sm:$0xf] }
  0x1a   : > { %s192_s20 = scalar_select %p191_p12, %s6512_s16, 1  ;;  %6318 = vmatpush.msk.msra.mxu3 %vm524_vm0, %v5324_v0  ;;  %5325 = vmatpush.msk.msra.mxu0 %vm524_vm0, %v5324_v0  ;;  %vm331_vm1 = vcmask 31744   ;;  %v5979_v57 = vld [vmem:[%s8631_s1 + $0x18] sm:$0xf]  ;;  %v6109_v58 = vld [vmem:[%s8631_s1 + $0x1c] sm:$0xf] }
  0x1b   : > { %5456 = vmatpush.msk.msrb.mxu2 %vm524_vm0, %v5455_v1  ;;  %s5323_s27 = smul.u32 640, %s6508_s15  ;;  %5390 = vmatpush.msk.msrb.mxu1 %vm524_vm0, %v264_v3  ;;  %v5847_v59 = vld [vmem:[%s8631_s1 + $0x14] sm:$0xf]  ;;  %v6239_v0 = vld [vmem:[%s8631_s1 + $0x20] sm:$0xf]  ;;  %s6315_s4 = sshll.u32 %s6508_s15, 6 }
  0x1c   : > { %5588 = vmatpush.msk.msrb.mxu3 %vm524_vm0, %v5587_v2  ;;  %s6319_s28 = smul.u32 1360, %s192_s20  ;;  %5718 = vmatpush.msk.msrb.mxu0 %vm524_vm0, %v5717_v4  ;;  %s6311_s21 = sshll.u32 %s6512_s16, 1 }
  0x1e   : > { %s195_s5 = scalar_lea.vmem %s8630_s0, %s6319_s28 }
  0x1f   : > { %s6648_s6 = scalar_lea.vmem %s195_s5, %s5323_s27  ;;  %s7928_s27 = sand.u32 1, %s6500_s13  }
  0x20   : > { %v6651_v5 = vld [vmem:[%s6648_s6 + $0xa1] sm:$0xff]  ;;  %v6662_v9 = vld [vmem:[%s6648_s6 + $0xa9] sm:$0xff]  ;;  %v6673_v13 = vld [vmem:[%s6648_s6 + $0xb1] sm:$0xff]  ;;  %s5319_s28 = sshll.u32 %s7928_s27, 9  ;;  %s6309_s5 = sshll.u32 %s6512_s16, 7 }
  0x21   : > { %v297_v6 = vld [vmem:[%s6648_s6 + $0x141] sm:$0xff]  ;;  %5342 = vmatmul.msk.f32.vlgmr.msra.gmra.mxu1 %vm331_vm1, %v6651_v5  ;;  %v298_v10 = vld [vmem:[%s6648_s6 + $0x149] sm:$0xff]  ;;  %v299_v14 = vld [vmem:[%s6648_s6 + $0x151] sm:$0xff]  ;;  %s7946_s29 = scalar_lea.vmem [#allocation2], %s5319_s28  ;;  %s5154_s24 = scalar_lea.sflag [#allocation3], %s7928_s27 }
  0x22   : > { %v313_v7 = vld [vmem:[%s6648_s6 + $0x1e1] sm:$0xff]  ;;  %5358 = vmatmul.msk.f32.vlgmr.msra.gmra.mxu2 %vm331_vm1, %v297_v6  ;;  %v314_v11 = vld [vmem:[%s6648_s6 + $0x1e9] sm:$0xff]  ;;  %v315_v15 = vld [vmem:[%s6648_s6 + $0x1f1] sm:$0xff]  ;;  %5848 = vmatpush.msk.msra.mxu1 %vm524_vm0, %v5847_v59  ;;  %s5174_s11 = sshll.u32 %s7946_s29, 4  ;;  %s5175_s11 = int_to_ptr.vmem [resolvable:$true] %s5174_s11 }
  0x23   : > { %v265_v8 = vld [vmem:[%s6648_s6 + $0x1] sm:$0xff]  ;;  %5374 = vmatmul.msk.f32.vlgmr.msra.gmra.mxu3 %vm331_vm1, %v313_v7  ;;  %v266_v12 = vld [vmem:[%s6648_s6 + $0x9] sm:$0xff]  ;;  %v267_v16 = vld [vmem:[%s6648_s6 + $0x11] sm:$0xff]  ;;  %5980 = vmatpush.msk.msra.mxu2 %vm524_vm0, %v5979_v57 }
  0x24   : > { %5326 = vmatmul.msk.f32.vlgmr.msra.gmra.mxu0 %vm331_vm1, %v265_v8  ;;  %v6684_v17 = vld [vmem:[%s6648_s6 + $0xb9] sm:$0xff]  ;;  %v6695_v21 = vld [vmem:[%s6648_s6 + $0xc9] sm:$0xff]  ;;  %v6709_v25 = vld [vmem:[%s6648_s6 + $0xd1] sm:$0xff]  ;;  %6110 = vmatpush.msk.msra.mxu3 %vm524_vm0, %v6109_v58 }
  0x25   : > { %v300_v18 = vld [vmem:[%s6648_s6 + $0x159] sm:$0xff]  ;;  %v301_v22 = vld [vmem:[%s6648_s6 + $0x169] sm:$0xff]  ;;  %v302_v26 = vld [vmem:[%s6648_s6 + $0x171] sm:$0xff]  ;;  %6240 = vmatpush.msk.msra.mxu0 %vm524_vm0, %v6239_v0 }
  0x26   : > { %v316_v19 = vld [vmem:[%s6648_s6 + $0x1f9] sm:$0xff]  ;;  %v317_v23 = vld [vmem:[%s6648_s6 + $0x209] sm:$0xff]  ;;  %v318_v27 = vld [vmem:[%s6648_s6 + $0x211] sm:$0xff] }
  0x27   : > { %v268_v20 = vld [vmem:[%s6648_s6 + $0x19] sm:$0xff]  ;;  %v6700_v24 = vld [vmem:[%s6648_s6 + $0x29] sm:$0xff]  ;;  %v6714_v28 = vld [vmem:[%s6648_s6 + $0x31] sm:$0xff] }
  0x28   : > { %v6723_v29 = vld [vmem:[%s6648_s6 + $0xd9] sm:$0xff]  ;;  %v6737_v33 = vld [vmem:[%s6648_s6 + $0xe1] sm:$0xff]  ;;  %v6751_v37 = vld [vmem:[%s6648_s6 + $0xf1] sm:$0xff] }
  0x29   : > { %5343 = vmatmul.msk.f32.gmra.mxu1 %vm331_vm1, %v6662_v9  ;;  %v303_v30 = vld [vmem:[%s6648_s6 + $0x179] sm:$0xff]  ;;  %v304_v34 = vld [vmem:[%s6648_s6 + $0x181] sm:$0xff]  ;;  %v305_v38 = vld [vmem:[%s6648_s6 + $0x191] sm:$0xff] }
  0x2a   : > { %5359 = vmatmul.msk.f32.gmra.mxu2 %vm331_vm1, %v298_v10  ;;  %v319_v31 = vld [vmem:[%s6648_s6 + $0x219] sm:$0xff]  ;;  %v320_v35 = vld [vmem:[%s6648_s6 + $0x221] sm:$0xff]  ;;  %v321_v39 = vld [vmem:[%s6648_s6 + $0x231] sm:$0xff] }
  0x2b   : > { %5375 = vmatmul.msk.f32.gmra.mxu3 %vm331_vm1, %v314_v11  ;;  %v6728_v32 = vld [vmem:[%s6648_s6 + $0x39] sm:$0xff]  ;;  %v6742_v36 = vld [vmem:[%s6648_s6 + $0x41] sm:$0xff]  ;;  %v6756_v40 = vld [vmem:[%s6648_s6 + $0x51] sm:$0xff] }
  0x2c   : > { %5327 = vmatmul.msk.f32.gmra.mxu0 %vm331_vm1, %v266_v12  ;;  %v6765_v41 = vld [vmem:[%s6648_s6 + $0xf9] sm:$0xff]  ;;  %v6779_v45 = vld [vmem:[%s6648_s6 + $0x101] sm:$0xff]  ;;  %v6793_v49 = vld [vmem:[%s6648_s6 + $0x109] sm:$0xff] }
  0x2d   : > { %v306_v42 = vld [vmem:[%s6648_s6 + $0x199] sm:$0xff]  ;;  %v307_v46 = vld [vmem:[%s6648_s6 + $0x1a1] sm:$0xff]  ;;  %v308_v50 = vld [vmem:[%s6648_s6 + $0x1a9] sm:$0xff] }
  0x2e   : > { %v322_v43 = vld [vmem:[%s6648_s6 + $0x239] sm:$0xff]  ;;  %v323_v47 = vld [vmem:[%s6648_s6 + $0x241] sm:$0xff]  ;;  %v324_v51 = vld [vmem:[%s6648_s6 + $0x249] sm:$0xff] }
  0x2f   : > { %v6770_v44 = vld [vmem:[%s6648_s6 + $0x59] sm:$0xff]  ;;  %v6784_v48 = vld [vmem:[%s6648_s6 + $0x61] sm:$0xff]  ;;  %v6798_v52 = vld [vmem:[%s6648_s6 + $0x69] sm:$0xff] }
  0x30   : > { %v6807_v53 = vld [vmem:[%s6648_s6 + $0x119] sm:$0xff]  ;;  %v6833_v60 = vld [vmem:[%s6648_s6 + $0x121] sm:$0xff]  ;;  %v6851_v1 = vld [vmem:[%s6648_s6 + $0x129] sm:$0xff] }
  0x31   : > { %5344 = vmatmul.msk.f32.gmra.mxu1 %vm331_vm1, %v6673_v13  ;;  %v309_v54 = vld [vmem:[%s6648_s6 + $0x1b9] sm:$0xff]  ;;  %v310_v61 = vld [vmem:[%s6648_s6 + $0x1c1] sm:$0xff]  ;;  %v311_v2 = vld [vmem:[%s6648_s6 + $0x1c9] sm:$0xff] }
  0x32   : > { %5360 = vmatmul.msk.f32.gmra.mxu2 %vm331_vm1, %v299_v14  ;;  %v325_v55 = vld [vmem:[%s6648_s6 + $0x259] sm:$0xff]  ;;  %v326_v62 = vld [vmem:[%s6648_s6 + $0x261] sm:$0xff]  ;;  %v327_v3 = vld [vmem:[%s6648_s6 + $0x269] sm:$0xff] }
  0x33   : > { %5376 = vmatmul.msk.f32.gmra.mxu3 %vm331_vm1, %v315_v15  ;;  %v6812_v56 = vld [vmem:[%s6648_s6 + $0x79] sm:$0xff]  ;;  %v6838_v63 = vld [vmem:[%s6648_s6 + $0x81] sm:$0xff]  ;;  %v6856_v4 = vld [vmem:[%s6648_s6 + $0x89] sm:$0xff] }
  0x34   : > { %5328 = vmatmul.msk.f32.gmra.mxu0 %vm331_vm1, %v267_v16  ;;  %v6865_v6 = vld [vmem:[%s6648_s6 + $0x131] sm:$0xff]  ;;  %v200_v12 = vld [vmem:[%s6648_s6] sm:$0xff]  ;;  %v5523_v15 = vld [vmem:[%s6648_s6 + $0x28] sm:$0xff] }
  0x35   : > { %v312_v7 = vld [vmem:[%s6648_s6 + $0x1d1] sm:$0xff]  ;;  %v1141_v14 = vld [vmem:[%s6648_s6 + $0x2] sm:$0xff] }
  0x36   : > { %v328_v8 = vld [vmem:[%s6648_s6 + $0x271] sm:$0xff] }
  0x37   : > { %v6870_v10 = vld [vmem:[%s6648_s6 + $0x91] sm:$0xff] }
  0x38   : > { %v1145_v57 = vld [vmem:[%s6648_s6 + $0x2a] sm:$0xff]  ;;  %v1146_v0 = vld [vmem:[%s6648_s6 + $0x32] sm:$0xff] }
  0x39   : > { %5345 = vmatmul.msk.f32.gmra.mxu1 %vm331_vm1, %v6684_v17  ;;  %v5527_v58 = vld [vmem:[%s6648_s6 + $0x50] sm:$0xff] }
  0x3a   : > { %5361 = vmatmul.msk.f32.gmra.mxu2 %vm331_vm1, %v300_v18 }
  0x3b   : > { %5377 = vmatmul.msk.f32.gmra.mxu3 %vm331_vm1, %v316_v19 }
  0x3c   : > { %5329 = vmatmul.msk.f32.gmra.mxu0 %vm331_vm1, %v268_v20 }
  0x41   : > { %5346 = vmatmul.msk.f32.gmra.mxu1 %vm331_vm1, %v6695_v21 }
  0x42   : > { %5362 = vmatmul.msk.f32.gmra.mxu2 %vm331_vm1, %v301_v22  ;;  %v201_v22 = vld [vmem:[%s6648_s6 + $0x8] sm:$0xff] }
  0x43   : > { %5378 = vmatmul.msk.f32.gmra.mxu3 %vm331_vm1, %v317_v23  ;;  %v1142_v23 = vld [vmem:[%s6648_s6 + $0xa] sm:$0xff] }
  0x44   : > { %5330 = vmatmul.msk.f32.gmra.mxu0 %vm331_vm1, %v6700_v24 }
  0x49   : > { %5347 = vmatmul.msk.f32.gmra.mxu1 %vm331_vm1, %v6709_v25 }
  0x4a   : > { %5363 = vmatmul.msk.f32.gmra.mxu2 %vm331_vm1, %v302_v26  ;;  %v5524_v26 = vld [vmem:[%s6648_s6 + $0x30] sm:$0xff] }
  0x4b   : > { %5379 = vmatmul.msk.f32.gmra.mxu3 %vm331_vm1, %v318_v27 }
  0x4c   : > { %5331 = vmatmul.msk.f32.gmra.mxu0 %vm331_vm1, %v6714_v28 }
  0x51   : > { %5348 = vmatmul.msk.f32.gmra.mxu1 %vm331_vm1, %v6723_v29 }
  0x52   : > { %5364 = vmatmul.msk.f32.gmra.mxu2 %vm331_vm1, %v303_v30 }
  0x53   : > { %5380 = vmatmul.msk.f32.gmra.mxu3 %vm331_vm1, %v319_v31 }
  0x54   : > { %5332 = vmatmul.msk.f32.gmra.mxu0 %vm331_vm1, %v6728_v32 }
  0x59   : > { %5349 = vmatmul.msk.f32.gmra.mxu1 %vm331_vm1, %v6737_v33 }
  0x5a   : > { %5365 = vmatmul.msk.f32.gmra.mxu2 %vm331_vm1, %v304_v34  ;;  %v202_v34 = vld [vmem:[%s6648_s6 + $0x10] sm:$0xff] }
  0x5b   : > { %5381 = vmatmul.msk.f32.gmra.mxu3 %vm331_vm1, %v320_v35  ;;  %v1143_v35 = vld [vmem:[%s6648_s6 + $0x12] sm:$0xff] }
  0x5c   : > { %5333 = vmatmul.msk.f32.gmra.mxu0 %vm331_vm1, %v6742_v36 }
  0x61   : > { %5350 = vmatmul.msk.f32.gmra.mxu1 %vm331_vm1, %v6751_v37 }
  0x62   : > { %5366 = vmatmul.msk.f32.gmra.mxu2 %vm331_vm1, %v305_v38  ;;  %v5525_v38 = vld [vmem:[%s6648_s6 + $0x38] sm:$0xff] }
  0x63   : > { %5382 = vmatmul.msk.f32.gmra.mxu3 %vm331_vm1, %v321_v39 }
  0x64   : > { %5334 = vmatmul.msk.f32.gmra.mxu0 %vm331_vm1, %v6756_v40 }
  0x69   : > { %5351 = vmatmul.msk.f32.gmra.mxu1 %vm331_vm1, %v6765_v41 }
  0x6a   : > { %5367 = vmatmul.msk.f32.gmra.mxu2 %vm331_vm1, %v306_v42 }
  0x6b   : > { %5383 = vmatmul.msk.f32.gmra.mxu3 %vm331_vm1, %v322_v43 }
  0x6c   : > { %5335 = vmatmul.msk.f32.gmra.mxu0 %vm331_vm1, %v6770_v44 }
  0x71   : > { %5352 = vmatmul.msk.f32.gmra.mxu1 %vm331_vm1, %v6779_v45 }
  0x72   : > { %5368 = vmatmul.msk.f32.gmra.mxu2 %vm331_vm1, %v307_v46  ;;  %v203_v46 = vld [vmem:[%s6648_s6 + $0x18] sm:$0xff] }
  0x73   : > { %5384 = vmatmul.msk.f32.gmra.mxu3 %vm331_vm1, %v323_v47  ;;  %v1144_v47 = vld [vmem:[%s6648_s6 + $0x1a] sm:$0xff] }
  0x74   : > { %5336 = vmatmul.msk.f32.gmra.mxu0 %vm331_vm1, %v6784_v48 }
  0x79   : > { %5353 = vmatmul.msk.f32.gmra.mxu1 %vm331_vm1, %v6793_v49 }
  0x7a   : > { %5369 = vmatmul.msk.f32.gmra.mxu2 %vm331_vm1, %v308_v50  ;;  %v5526_v50 = vld [vmem:[%s6648_s6 + $0x40] sm:$0xff] }
  0x7b   : > { %5385 = vmatmul.msk.f32.gmra.mxu3 %vm331_vm1, %v324_v51 }
  0x7c   : > { %5337 = vmatmul.msk.f32.gmra.mxu0 %vm331_vm1, %v6798_v52 }
  0x81   : > { %5354 = vmatmul.msk.f32.gmra.mxu1 %vm331_vm1, %v6807_v53 }
  0x82   : > { %5370 = vmatmul.msk.f32.gmra.mxu2 %vm331_vm1, %v309_v54 }
  0x83   : > { %5386 = vmatmul.msk.f32.gmra.mxu3 %vm331_vm1, %v325_v55 }
  0x84   : > { %5338 = vmatmul.msk.f32.gmra.mxu0 %vm331_vm1, %v6812_v56 }
  0x89   : > { %5355 = vmatmul.msk.f32.gmra.mxu1 %vm331_vm1, %v6833_v60 }
  0x8a   : > { %5371 = vmatmul.msk.f32.gmra.mxu2 %vm331_vm1, %v310_v61 }
  0x8b   : > { %5387 = vmatmul.msk.f32.gmra.mxu3 %vm331_vm1, %v326_v62 }
  0x8c   : > { %5339 = vmatmul.msk.f32.gmra.mxu0 %vm331_vm1, %v6838_v63 }
  0x91   : > { %5356 = vmatmul.msk.f32.gmra.mxu1 %vm331_vm1, %v6851_v1 }
  0x92   : > { %5372 = vmatmul.msk.f32.gmra.mxu2 %vm331_vm1, %v311_v2  ;;  %v5528_v2 = vld [vmem:[%s6648_s6 + $0x58] sm:$0xff] }
  0x93   : > { %5388 = vmatmul.msk.f32.gmra.mxu3 %vm331_vm1, %v327_v3 }
  0x94   : > { %5340 = vmatmul.msk.f32.gmra.mxu0 %vm331_vm1, %v6856_v4 }
  0x99   : > { %5357 = vmatmul.msk.f32.gmra.mxu1 %vm331_vm1, %v6865_v6 }
  0x9a   : > { %5373 = vmatmul.msk.f32.gmra.mxu2 %vm331_vm1, %v312_v7 }
  0x9b   : > { %5389 = vmatmul.msk.f32.gmra.mxu3 %vm331_vm1, %v328_v8 }
  0x9c   : > { %5341 = vmatmul.msk.f32.gmra.mxu0 %vm331_vm1, %v6870_v10 }
  0x9e   : > { %v6878_v11 = vpop.f32.mrf.mxu1 }
  0xa1   : > { %v6883_v16 = vpop.f32.mrf.mxu0  ;;  %5391 = vmatmul.msk.f32.vlgmr.msrb.gmra.mxu1 %vm331_vm1, %v200_v12  ;;  %v1147_v12 = vld [vmem:[%s6648_s6 + $0x3a] sm:$0xff] }
  0xa2   : > { %5457 = vmatmul.msk.f32.vlgmr.msrb.gmra.mxu2 %vm331_vm1, %v1141_v14  ;;  %v5529_v14 = vld [vmem:[%s6648_s6 + $0x60] sm:$0xff] }
  0xa3   : > { %5589 = vmatmul.msk.f32.vlgmr.msrb.gmra.mxu3 %vm331_vm1, %v5523_v15 }
  0xa4   : > { %5719 = vmatmul.msk.f32.vlgmr.msrb.gmra.mxu0 %vm331_vm1, %v6700_v24 }
  0xa5   : > { %v6890_v18 = vpop.f32.mrf.mxu2 }
  0xa6   : > { %v6892_v19 = vpop.f32.mrf.mxu3  ;;  %v6894_v20 = vpop.f32.mrf.mxu1 }
  0xa7   : > { %8636 = vst [vmem:[#allocation8_spill] sm:$0xff] %v6892_v19 }
  0xa9   : > { %v6899_v27 = vpop.f32.mrf.mxu0  ;;  %5392 = vmatmul.msk.f32.gmra.mxu1 %vm331_vm1, %v201_v22 }
  0xaa   : > { %5458 = vmatmul.msk.f32.gmra.mxu2 %vm331_vm1, %v1142_v23 }
  0xab   : > { %5590 = vmatmul.msk.f32.gmra.mxu3 %vm331_vm1, %v5524_v26 }
  0xac   : > { %5720 = vmatmul.msk.f32.gmra.mxu0 %vm331_vm1, %v6714_v28 }
  0xad   : > { %v6906_v24 = vpop.f32.mrf.mxu2 }
  0xae   : > { %v6908_v30 = vpop.f32.mrf.mxu3  ;;  %v6910_v31 = vpop.f32.mrf.mxu1 }
  0xaf   : > { %8637 = vst [vmem:[#allocation9_spill] sm:$0xff] %v6908_v30  ;;  %v5535_v30 = vld [vmem:[%s6648_s6 + $0xa0] sm:$0xff] }
  0xb1   : > { %v6915_v39 = vpop.f32.mrf.mxu0  ;;  %5393 = vmatmul.msk.f32.gmra.mxu1 %vm331_vm1, %v202_v34  ;;  %v5530_v34 = vld [vmem:[%s6648_s6 + $0x68] sm:$0xff] }
  0xb2   : > { %5459 = vmatmul.msk.f32.gmra.mxu2 %vm331_vm1, %v1143_v35 }
  0xb3   : > { %5591 = vmatmul.msk.f32.gmra.mxu3 %vm331_vm1, %v5525_v38 }
  0xb4   : > { %5721 = vmatmul.msk.f32.gmra.mxu0 %vm331_vm1, %v6728_v32 }
  0xb5   : > { %v6922_v28 = vpop.f32.mrf.mxu2 }
  0xb6   : > { %v6924_v42 = vpop.f32.mrf.mxu3  ;;  %v6926_v43 = vpop.f32.mrf.mxu1 }
  0xb7   : > { %8638 = vst [vmem:[#allocation10_spill] sm:$0xff] %v6924_v42 }
  0xb9   : > { %v6931_v51 = vpop.f32.mrf.mxu0  ;;  %5394 = vmatmul.msk.f32.gmra.mxu1 %vm331_vm1, %v203_v46 }
  0xba   : > { %5460 = vmatmul.msk.f32.gmra.mxu2 %vm331_vm1, %v1144_v47  ;;  %v1149_v47 = vld [vmem:[%s6648_s6 + $0x52] sm:$0xff] }
  0xbb   : > { %5592 = vmatmul.msk.f32.gmra.mxu3 %vm331_vm1, %v5526_v50 }
  0xbc   : > { %5722 = vmatmul.msk.f32.gmra.mxu0 %vm331_vm1, %v6742_v36 }
  0xbd   : > { %v6938_v32 = vpop.f32.mrf.mxu2 }
  0xbe   : > { %8639 = vst [vmem:[#allocation11_spill] sm:$0xff] %v6938_v32  ;;  %v6940_v54 = vpop.f32.mrf.mxu3  ;;  %v6942_v55 = vpop.f32.mrf.mxu1 }
  0xbf   : > { %8640 = vst [vmem:[#allocation12_spill] sm:$0xff] %v6940_v54  ;;  %v5534_v54 = vld [vmem:[%s6648_s6 + $0x90] sm:$0xff] }
  0xc1   : > { %v6946_v59 = vpop.f32.mrf.mxu0  ;;  %5395 = vmatmul.msk.f32.gmra.mxu1 %vm331_vm1, %v5523_v15 }
  0xc2   : > { %5461 = vmatmul.msk.f32.gmra.mxu2 %vm331_vm1, %v1145_v57  ;;  %v5531_v57 = vld [vmem:[%s6648_s6 + $0x78] sm:$0xff] }
  0xc3   : > { %5593 = vmatmul.msk.f32.gmra.mxu3 %vm331_vm1, %v5527_v58 }
  0xc4   : > { %5723 = vmatmul.msk.f32.gmra.mxu0 %vm331_vm1, %v6756_v40 }
  0xc5   : > { %v6953_v36 = vpop.f32.mrf.mxu2 }
  0xc6   : > { %8641 = vst [vmem:[#allocation13_spill] sm:$0xff] %v6953_v36  ;;  %v6955_v61 = vpop.f32.mrf.mxu3  ;;  %v6957_v62 = vpop.f32.mrf.mxu1  ;;  %v5540_v36 = vld [vmem:[%s6648_s6 + $0xd0] sm:$0xff] }
  0xc7   : > { %8642 = vst [vmem:[#allocation14_spill] sm:$0xff] %v6955_v61 }
  0xc9   : > { %v6961_v3 = vpop.f32.mrf.mxu0  ;;  %5396 = vmatmul.msk.f32.gmra.mxu1 %vm331_vm1, %v5524_v26  ;;  %v1148_v26 = vld [vmem:[%s6648_s6 + $0x42] sm:$0xff] }
  0xca   : > { %5462 = vmatmul.msk.f32.gmra.mxu2 %vm331_vm1, %v1146_v0 }
  0xcb   : > { %5594 = vmatmul.msk.f32.gmra.mxu3 %vm331_vm1, %v5528_v2 }
  0xcc   : > { %5724 = vmatmul.msk.f32.gmra.mxu0 %vm331_vm1, %v6770_v44 }
  0xcd   : > { %v6968_v40 = vpop.f32.mrf.mxu2 }
  0xce   : > { %8643 = vst [vmem:[#allocation15_spill] sm:$0xff] %v6968_v40  ;;  %v6970_v7 = vpop.f32.mrf.mxu3  ;;  %v6972_v8 = vpop.f32.mrf.mxu1 }
  0xcf   : > { %8644 = vst [vmem:[#allocation16_spill] sm:$0xff] %v6970_v7  ;;  %v5533_v7 = vld [vmem:[%s6648_s6 + $0x88] sm:$0xff] }
  0xd1   : > { %v6976_v15 = vpop.f32.mrf.mxu0  ;;  %5397 = vmatmul.msk.f32.gmra.mxu1 %vm331_vm1, %v5525_v38 }
  0xd2   : > { %5463 = vmatmul.msk.f32.gmra.mxu2 %vm331_vm1, %v1147_v12 }
  0xd3   : > { %5595 = vmatmul.msk.f32.gmra.mxu3 %vm331_vm1, %v5529_v14 }
  0xd4   : > { %5725 = vmatmul.msk.f32.gmra.mxu0 %vm331_vm1, %v6784_v48 }
  0xd5   : > { %v6983_v44 = vpop.f32.mrf.mxu2 }
  0xd6   : > { %8645 = vst [vmem:[#allocation17_spill] sm:$0xff] %v6983_v44  ;;  %v6985_v22 = vpop.f32.mrf.mxu3  ;;  %v6987_v23 = vpop.f32.mrf.mxu1  ;;  %v1158_v44 = vld [vmem:[%s6648_s6 + $0xaa] sm:$0xff] }
  0xd7   : > { %8646 = vst [vmem:[#allocation18_spill] sm:$0xff] %v6985_v22 }
  0xd9   : > { %v6991_v35 = vpop.f32.mrf.mxu0  ;;  %5398 = vmatmul.msk.f32.gmra.mxu1 %vm331_vm1, %v5526_v50 }
  0xda   : > { %5464 = vmatmul.msk.f32.gmra.mxu2 %vm331_vm1, %v1148_v26  ;;  %v1150_v26 = vld [vmem:[%s6648_s6 + $0x5a] sm:$0xff] }
  0xdb   : > { %5596 = vmatmul.msk.f32.gmra.mxu3 %vm331_vm1, %v5530_v34 }
  0xdc   : > { %5726 = vmatmul.msk.f32.gmra.mxu0 %vm331_vm1, %v6798_v52 }
  0xdd   : > { %v6998_v48 = vpop.f32.mrf.mxu2 }
  0xde   : > { %8647 = vst [vmem:[#allocation19_spill] sm:$0xff] %v6998_v48  ;;  %v7000_v38 = vpop.f32.mrf.mxu3  ;;  %v7002_v46 = vpop.f32.mrf.mxu1 }
  0xdf   : > { %8648 = vst [vmem:[#allocation20_spill] sm:$0xff] %v7000_v38  ;;  %v5532_v38 = vld [vmem:[%s6648_s6 + $0x80] sm:$0xff] }
  0xe1   : > { %v7006_v0 = vpop.f32.mrf.mxu0  ;;  %5399 = vmatmul.msk.f32.gmra.mxu1 %vm331_vm1, %v5527_v58 }
  0xe2   : > { %5465 = vmatmul.msk.f32.gmra.mxu2 %vm331_vm1, %v1149_v47 }
  0xe3   : > { %5597 = vmatmul.msk.f32.gmra.mxu3 %vm331_vm1, %v5531_v57 }
  0xe4   : > { %5727 = vmatmul.msk.f32.gmra.mxu0 %vm331_vm1, %v6812_v56 }
  0xe5   : > { %v7013_v52 = vpop.f32.mrf.mxu2 }
  0xe6   : > { %8649 = vst [vmem:[#allocation21_spill] sm:$0xff] %v7013_v52  ;;  %v7015_v50 = vpop.f32.mrf.mxu3  ;;  %v7017_v12 = vpop.f32.mrf.mxu1 }
  0xe7   : > { %8650 = vst [vmem:[#allocation22_spill] sm:$0xff] %v7015_v50  ;;  %v1151_v50 = vld [vmem:[%s6648_s6 + $0x62] sm:$0xff] }
  0xe9   : > { %v7021_v22 = vpop.f32.mrf.mxu0  ;;  %5400 = vmatmul.msk.f32.gmra.mxu1 %vm331_vm1, %v5528_v2 }
  0xea   : > { %5466 = vmatmul.msk.f32.gmra.mxu2 %vm331_vm1, %v1150_v26 }
  0xeb   : > { %5598 = vmatmul.msk.f32.gmra.mxu3 %vm331_vm1, %v5532_v38 }
  0xec   : > { %5728 = vmatmul.msk.f32.gmra.mxu0 %vm331_vm1, %v6838_v63 }
  0xed   : > { %v7028_v56 = vpop.f32.mrf.mxu2 }
  0xee   : > { %8651 = vst [vmem:[#allocation23_spill] sm:$0xff] %v7028_v56  ;;  %v7030_v58 = vpop.f32.mrf.mxu3  ;;  %v7032_v47 = vpop.f32.mrf.mxu1 }
  0xef   : > { %8652 = vst [vmem:[#allocation24_spill] sm:$0xff] %v7030_v58  ;;  %v1152_v58 = vld [vmem:[%s6648_s6 + $0x6a] sm:$0xff] }
  0xf1   : > { %v7036_v61 = vpop.f32.mrf.mxu0  ;;  %5401 = vmatmul.msk.f32.gmra.mxu1 %vm331_vm1, %v5529_v14 }
  0xf2   : > { %5467 = vmatmul.msk.f32.gmra.mxu2 %vm331_vm1, %v1151_v50 }
  0xf3   : > { %5599 = vmatmul.msk.f32.gmra.mxu3 %vm331_vm1, %v5533_v7 }
  0xf4   : > { %5729 = vmatmul.msk.f32.gmra.mxu0 %vm331_vm1, %v6856_v4 }
  0xf5   : > { %v7043_v63 = vpop.f32.mrf.mxu2 }
  0xf6   : > { %8653 = vst [vmem:[#allocation25_spill] sm:$0xff] %v7043_v63  ;;  %v7045_v2 = vpop.f32.mrf.mxu3  ;;  %v7047_v26 = vpop.f32.mrf.mxu1 }
  0xf7   : > { %8654 = vst [vmem:[#allocation26_spill] sm:$0xff] %v7045_v2  ;;  %v1153_v2 = vld [vmem:[%s6648_s6 + $0x7a] sm:$0xff] }
  0xf9   : > { %v7051_v42 = vpop.f32.mrf.mxu0  ;;  %5402 = vmatmul.msk.f32.gmra.mxu1 %vm331_vm1, %v5530_v34 }
  0xfa   : > { %5468 = vmatmul.msk.f32.gmra.mxu2 %vm331_vm1, %v1152_v58 }
  0xfb   : > { %5600 = vmatmul.msk.f32.gmra.mxu3 %vm331_vm1, %v5534_v54 }
  0xfc   : > { %5730 = vmatmul.msk.f32.gmra.mxu0 %vm331_vm1, %v6870_v10 }
  0xfd   : > { %v7058_v4 = vpop.f32.mrf.mxu2 }
  0xfe   : > { %8655 = vst [vmem:[#allocation27_spill] sm:$0xff] %v7058_v4  ;;  %v7060_v14 = vpop.f32.mrf.mxu3  ;;  %v7062_v50 = vpop.f32.mrf.mxu1  ;;  %v5536_v4 = vld [vmem:[%s6648_s6 + $0xa8] sm:$0xff] }
  0xff   : > { %8656 = vst [vmem:[#allocation28_spill] sm:$0xff] %v7060_v14  ;;  %v1154_v14 = vld [vmem:[%s6648_s6 + $0x82] sm:$0xff] }
 0x101   : > { %v7066_v19 = vpop.f32.mrf.mxu0  ;;  %5403 = vmatmul.msk.f32.gmra.mxu1 %vm331_vm1, %v5531_v57 }
 0x102   : > { %5469 = vmatmul.msk.f32.gmra.mxu2 %vm331_vm1, %v1153_v2 }
 0x103   : > { %5601 = vmatmul.msk.f32.gmra.mxu3 %vm331_vm1, %v5535_v30 }
 0x104   : > { %5731 = vmatmul.msk.f32.gmra.mxu0 %vm331_vm1, %v6651_v5 }
 0x105   : > { %v7073_v10 = vpop.f32.mrf.mxu2 }
 0x106   : > { %8657 = vst [vmem:[#allocation29_spill] sm:$0xff] %v7073_v10  ;;  %v7075_v34 = vpop.f32.mrf.mxu3  ;;  %v7077_v58 = vpop.f32.mrf.mxu1  ;;  %v5537_v10 = vld [vmem:[%s6648_s6 + $0xb0] sm:$0xff] }
 0x107   : > { %8658 = vst [vmem:[#allocation30_spill] sm:$0xff] %v7075_v34  ;;  %v1155_v34 = vld [vmem:[%s6648_s6 + $0x8a] sm:$0xff] }
 0x109   : > { %v7081_v63 = vpop.f32.mrf.mxu0  ;;  %5404 = vmatmul.msk.f32.gmra.mxu1 %vm331_vm1, %v5532_v38 }
 0x10a   : > { %5470 = vmatmul.msk.f32.gmra.mxu2 %vm331_vm1, %v1154_v14 }
 0x10b   : > { %5602 = vmatmul.msk.f32.gmra.mxu3 %vm331_vm1, %v5536_v4 }
 0x10c   : > { %5732 = vmatmul.msk.f32.gmra.mxu0 %vm331_vm1, %v6662_v9 }
 0x10d   : > { %v7088_v5 = vpop.f32.mrf.mxu2 }
 0x10e   : > { %8659 = vst [vmem:[#allocation31_spill] sm:$0xff] %v7088_v5  ;;  %v7090_v57 = vpop.f32.mrf.mxu3  ;;  %v7092_v2 = vpop.f32.mrf.mxu1  ;;  %v5538_v5 = vld [vmem:[%s6648_s6 + $0xb8] sm:$0xff] }
 0x10f   : > { %8660 = vst [vmem:[#allocation32_spill] sm:$0xff] %v7090_v57  ;;  %v1156_v57 = vld [vmem:[%s6648_s6 + $0x92] sm:$0xff] }
 0x111   : > { %v7096_v56 = vpop.f32.mrf.mxu0  ;;  %5405 = vmatmul.msk.f32.gmra.mxu1 %vm331_vm1, %v5533_v7 }
 0x112   : > { %5471 = vmatmul.msk.f32.gmra.mxu2 %vm331_vm1, %v1155_v34 }
 0x113   : > { %5603 = vmatmul.msk.f32.gmra.mxu3 %vm331_vm1, %v5537_v10 }
 0x114   : > { %5733 = vmatmul.msk.f32.gmra.mxu0 %vm331_vm1, %v6673_v13 }
 0x115   : > { %v7103_v9 = vpop.f32.mrf.mxu2 }
 0x116   : > { %8661 = vst [vmem:[#allocation33_spill] sm:$0xff] %v7103_v9  ;;  %v7105_v38 = vpop.f32.mrf.mxu3  ;;  %v7107_v14 = vpop.f32.mrf.mxu1  ;;  %v5539_v9 = vld [vmem:[%s6648_s6 + $0xc8] sm:$0xff] }
 0x117   : > { %8662 = vst [vmem:[#allocation34_spill] sm:$0xff] %v7105_v38  ;;  %v1157_v38 = vld [vmem:[%s6648_s6 + $0xa2] sm:$0xff] }
 0x119   : > { %v7111_v52 = vpop.f32.mrf.mxu0  ;;  %5406 = vmatmul.msk.f32.gmra.mxu1 %vm331_vm1, %v5534_v54 }
 0x11a   : > { %5472 = vmatmul.msk.f32.gmra.mxu2 %vm331_vm1, %v1156_v57 }
 0x11b   : > { %5604 = vmatmul.msk.f32.gmra.mxu3 %vm331_vm1, %v5538_v5 }
 0x11c   : > { %5734 = vmatmul.msk.f32.gmra.mxu0 %vm331_vm1, %v6684_v17 }
 0x11d   : > { %v7118_v13 = vpop.f32.mrf.mxu2 }
 0x11e   : > { %8663 = vst [vmem:[#allocation35_spill] sm:$0xff] %v7118_v13  ;;  %v7120_v7 = vpop.f32.mrf.mxu3  ;;  %v949_v34 = vpop.f32.mrf.mxu1 }
 0x11f   : > { %8664 = vst [vmem:[#allocation36_spill] sm:$0xff] %v7120_v7  ;;  %v950_v17 = vadd.f32 %v949_v34, %v6883_v16 }
 0x121   : > { %v2490_v48 = vpop.f32.mrf.mxu0  ;;  %5407 = vmatmul.msk.f32.gmra.mxu1 %vm331_vm1, %v5535_v30 }
 0x122   : > { %5473 = vmatmul.msk.f32.gmra.mxu2 %vm331_vm1, %v1157_v38 }
 0x123   : > { %5605 = vmatmul.msk.f32.gmra.mxu3 %vm331_vm1, %v5539_v9 }
 0x124   : > { %5735 = vmatmul.msk.f32.gmra.mxu0 %vm331_vm1, %v6695_v21 }
 0x125   : > { %v1419_v54 = vpop.f32.mrf.mxu2 }
 0x126   : > { %v1611_v57 = vadd.f32 %v1419_v54, %v950_v17  ;;  %v1956_v13 = vpop.f32.mrf.mxu3  ;;  %v952_v7 = vpop.f32.mrf.mxu1  ;;  %v1159_v17 = vld [vmem:[%s6648_s6 + $0xb2] sm:$0xff] }
 0x127   : > { %v953_v21 = vadd.f32 %v952_v7, %v6899_v27 }
 0x128   : > { %v2148_v40 = vadd.f32 %v1956_v13, %v1611_v57 }
 0x129   : > { %v2493_v32 = vpop.f32.mrf.mxu0  ;;  %5408 = vmatmul.msk.f32.gmra.mxu1 %vm331_vm1, %v5536_v4 }
 0x12a   : > { %v7132_v30 = vadd.f32 %v2490_v48, %v2148_v40  ;;  %5474 = vmatmul.msk.f32.gmra.mxu2 %vm331_vm1, %v1158_v44  ;;  %v5541_v48 = vld [vmem:[%s6648_s6 + $0xd8] sm:$0xff] }
 0x12b   : > { %5606 = vmatmul.msk.f32.gmra.mxu3 %vm331_vm1, %v5540_v36 }
 0x12c   : > { %5736 = vmatmul.msk.f32.gmra.mxu0 %vm331_vm1, %v6709_v25 }
 0x12d   : > { %v1422_v16 = vpop.f32.mrf.mxu2 }
 0x12e   : > { %v1612_v38 = vadd.f32 %v1422_v16, %v953_v21  ;;  %v1959_v34 = vpop.f32.mrf.mxu3  ;;  %v955_v13 = vpop.f32.mrf.mxu1  ;;  %v1160_v21 = vld [vmem:[%s6648_s6 + $0xba] sm:$0xff] }
 0x12f   : > { %v956_v25 = vadd.f32 %v955_v13, %v6915_v39  ;;  %v5542_v16 = vld [vmem:[%s6648_s6 + $0xe0] sm:$0xff] }
 0x130   : > { %v2149_v40 = vadd.f32 %v1959_v34, %v1612_v38 }
 0x131   : > { %v2496_v54 = vpop.f32.mrf.mxu0  ;;  %5409 = vmatmul.msk.f32.gmra.mxu1 %vm331_vm1, %v5537_v10 }
 0x132   : > { %v7142_v4 = vadd.f32 %v2493_v32, %v2149_v40  ;;  %5475 = vmatmul.msk.f32.gmra.mxu2 %vm331_vm1, %v1159_v17  ;;  %v1161_v40 = vld [vmem:[%s6648_s6 + $0xca] sm:$0xff] }
 0x133   : > { %5607 = vmatmul.msk.f32.gmra.mxu3 %vm331_vm1, %v5541_v48 }
 0x134   : > { %5737 = vmatmul.msk.f32.gmra.mxu0 %vm331_vm1, %v6723_v29 }
 0x135   : > { %v1425_v27 = vpop.f32.mrf.mxu2 }
 0x136   : > { %v1613_v44 = vadd.f32 %v1425_v27, %v956_v25  ;;  %v1962_v7 = vpop.f32.mrf.mxu3  ;;  %v958_v57 = vpop.f32.mrf.mxu1  ;;  %v5543_v25 = vld [vmem:[%s6648_s6 + $0xf0] sm:$0xff] }
 0x137   : > { %v959_v29 = vadd.f32 %v958_v57, %v6931_v51 }
 0x138   : > { %v2150_v32 = vadd.f32 %v1962_v7, %v1613_v44 }
 0x139   : > { %v2499_v38 = vpop.f32.mrf.mxu0  ;;  %5410 = vmatmul.msk.f32.gmra.mxu1 %vm331_vm1, %v5538_v5 }
 0x13a   : > { %v7152_v10 = vadd.f32 %v2496_v54, %v2150_v32  ;;  %5476 = vmatmul.msk.f32.gmra.mxu2 %vm331_vm1, %v1160_v21  ;;  %v1162_v21 = vld [vmem:[%s6648_s6 + $0xd2] sm:$0xff] }
 0x13b   : > { %5608 = vmatmul.msk.f32.gmra.mxu3 %vm331_vm1, %v5542_v16 }
 0x13c   : > { %5738 = vmatmul.msk.f32.gmra.mxu0 %vm331_vm1, %v6737_v33 }
 0x13d   : > { %v1428_v39 = vpop.f32.mrf.mxu2 }
 0x13e   : > { %v1614_v34 = vadd.f32 %v1428_v39, %v959_v29  ;;  %v1965_v13 = vpop.f32.mrf.mxu3  ;;  %v961_v17 = vpop.f32.mrf.mxu1 }
 0x13f   : > { %v962_v33 = vadd.f32 %v961_v17, %v6946_v59  ;;  %v1163_v17 = vld [vmem:[%s6648_s6 + $0xda] sm:$0xff] }
 0x140   : > { %v2151_v54 = vadd.f32 %v1965_v13, %v1614_v34 }
 0x141   : > { %v2502_v27 = vpop.f32.mrf.mxu0  ;;  %5411 = vmatmul.msk.f32.gmra.mxu1 %vm331_vm1, %v5539_v9 }
 0x142   : > { %v7162_v5 = vadd.f32 %v2499_v38, %v2151_v54  ;;  %5477 = vmatmul.msk.f32.gmra.mxu2 %vm331_vm1, %v1161_v40  ;;  %v5544_v38 = vld [vmem:[%s6648_s6 + $0xf8] sm:$0xff]  ;;  %v5545_v54 = vld [vmem:[%s6648_s6 + $0x100] sm:$0xff] }
 0x143   : > { %5609 = vmatmul.msk.f32.gmra.mxu3 %vm331_vm1, %v5543_v25 }
 0x144   : > { %5739 = vmatmul.msk.f32.gmra.mxu0 %vm331_vm1, %v6751_v37 }
 0x145   : > { %v1431_v51 = vpop.f32.mrf.mxu2 }
 0x146   : > { %v1615_v44 = vadd.f32 %v1431_v51, %v962_v33  ;;  %v1968_v7 = vpop.f32.mrf.mxu3  ;;  %v964_v57 = vpop.f32.mrf.mxu1 }
 0x147   : > { %v965_v37 = vadd.f32 %v964_v57, %v6961_v3 }
 0x148   : > { %v2152_v32 = vadd.f32 %v1968_v7, %v1615_v44  ;;  %v1164_v7 = vld [vmem:[%s6648_s6 + $0xe2] sm:$0xff] }
 0x149   : > { %v2505_v29 = vpop.f32.mrf.mxu0  ;;  %5412 = vmatmul.msk.f32.gmra.mxu1 %vm331_vm1, %v5540_v36 }
 0x14a   : > { %v7172_v9 = vadd.f32 %v2502_v27, %v2152_v32  ;;  %5478 = vmatmul.msk.f32.gmra.mxu2 %vm331_vm1, %v1162_v21  ;;  %v5546_v21 = vld [vmem:[%s6648_s6 + $0x108] sm:$0xff] }
 0x14b   : > { %5610 = vmatmul.msk.f32.gmra.mxu3 %vm331_vm1, %v5544_v38 }
 0x14c   : > { %5740 = vmatmul.msk.f32.gmra.mxu0 %vm331_vm1, %v6765_v41 }
 0x14d   : > { %v1434_v59 = vpop.f32.mrf.mxu2 }
 0x14e   : > { %v1616_v39 = vadd.f32 %v1434_v59, %v965_v37  ;;  %v1971_v34 = vpop.f32.mrf.mxu3  ;;  %v967_v13 = vpop.f32.mrf.mxu1 }
 0x14f   : > { %v968_v41 = vadd.f32 %v967_v13, %v6976_v15  ;;  %v5547_v13 = vld [vmem:[%s6648_s6 + $0x118] sm:$0xff] }
 0x150   : > { %v2153_v40 = vadd.f32 %v1971_v34, %v1616_v39  ;;  %v1165_v39 = vld [vmem:[%s6648_s6 + $0xf2] sm:$0xff] }
 0x151   : > { %v2508_v27 = vpop.f32.mrf.mxu0  ;;  %5413 = vmatmul.msk.f32.gmra.mxu1 %vm331_vm1, %v5541_v48 }
 0x152   : > { %v7182_v36 = vadd.f32 %v2505_v29, %v2153_v40  ;;  %5479 = vmatmul.msk.f32.gmra.mxu2 %vm331_vm1, %v1163_v17 }
 0x153   : > { %5611 = vmatmul.msk.f32.gmra.mxu3 %vm331_vm1, %v5545_v54 }
 0x154   : > { %5741 = vmatmul.msk.f32.gmra.mxu0 %vm331_vm1, %v6779_v45 }
 0x155   : > { %v1437_v3 = vpop.f32.mrf.mxu2 }
 0x156   : > { %v1617_v33 = vadd.f32 %v1437_v3, %v968_v41  ;;  %v1974_v51 = vpop.f32.mrf.mxu3  ;;  %v970_v44 = vpop.f32.mrf.mxu1  ;;  %v1166_v3 = vld [vmem:[%s6648_s6 + $0xfa] sm:$0xff] }
 0x157   : > { %v971_v45 = vadd.f32 %v970_v44, %v6991_v35 }
 0x158   : > { %v2154_v57 = vadd.f32 %v1974_v51, %v1617_v33  ;;  %v5548_v51 = vld [vmem:[%s6648_s6 + $0x120] sm:$0xff] }
 0x159   : > { %v2511_v32 = vpop.f32.mrf.mxu0  ;;  %5414 = vmatmul.msk.f32.gmra.mxu1 %vm331_vm1, %v5542_v16 }
 0x15a   : > { %v7192_v48 = vadd.f32 %v2508_v27, %v2154_v57  ;;  %5480 = vmatmul.msk.f32.gmra.mxu2 %vm331_vm1, %v1164_v7 }
 0x15b   : > { %5612 = vmatmul.msk.f32.gmra.mxu3 %vm331_vm1, %v5546_v21 }
 0x15c   : > { %5742 = vmatmul.msk.f32.gmra.mxu0 %vm331_vm1, %v6793_v49 }
 0x15d   : > { %v1440_v15 = vpop.f32.mrf.mxu2 }
 0x15e   : > { %v1618_v29 = vadd.f32 %v1440_v15, %v971_v45  ;;  %v1977_v37 = vpop.f32.mrf.mxu3  ;;  %v973_v59 = vpop.f32.mrf.mxu1  ;;  %v1167_v45 = vld [vmem:[%s6648_s6 + $0x102] sm:$0xff] }
 0x15f   : > { %v974_v49 = vadd.f32 %v973_v59, %v7006_v0 }
 0x160   : > { %v2155_v34 = vadd.f32 %v1977_v37, %v1618_v29  ;;  %v5549_v29 = vld [vmem:[%s6648_s6 + $0x128] sm:$0xff] }
 0x161   : > { %v2514_v17 = vpop.f32.mrf.mxu0  ;;  %5415 = vmatmul.msk.f32.gmra.mxu1 %vm331_vm1, %v5543_v25 }
 0x162   : > { %v7202_v16 = vadd.f32 %v2511_v32, %v2155_v34  ;;  %5481 = vmatmul.msk.f32.gmra.mxu2 %vm331_vm1, %v1165_v39 }
 0x163   : > { %5613 = vmatmul.msk.f32.gmra.mxu3 %vm331_vm1, %v5547_v13 }
 0x164   : > { %5743 = vmatmul.msk.f32.gmra.mxu0 %vm331_vm1, %v6807_v53 }
 0x165   : > { %v1443_v35 = vpop.f32.mrf.mxu2 }
 0x166   : > { %v1619_v40 = vadd.f32 %v1443_v35, %v974_v49  ;;  %v1980_v27 = vpop.f32.mrf.mxu3  ;;  %v976_v41 = vpop.f32.mrf.mxu1  ;;  %v7232_v35 = vld [vmem:[%s6648_s6 + $0x130] sm:$0xff] }
 0x167   : > { %v977_v53 = vadd.f32 %v976_v41, %v7021_v22 }
 0x168   : > { %v2156_v33 = vadd.f32 %v1980_v27, %v1619_v40 }
 0x169   : > { %v2517_v44 = vpop.f32.mrf.mxu0  ;;  %5416 = vmatmul.msk.f32.gmra.mxu1 %vm331_vm1, %v5544_v38 }
 0x16a   : > { %v7212_v25 = vadd.f32 %v2514_v17, %v2156_v33  ;;  %5482 = vmatmul.msk.f32.gmra.mxu2 %vm331_vm1, %v1166_v3  ;;  %v1168_v17 = vld [vmem:[%s6648_s6 + $0x10a] sm:$0xff]  ;;  %v1169_v33 = vld [vmem:[%s6648_s6 + $0x11a] sm:$0xff] }
 0x16b   : > { %5614 = vmatmul.msk.f32.gmra.mxu3 %vm331_vm1, %v5548_v51 }
 0x16c   : > { %5744 = vmatmul.msk.f32.gmra.mxu0 %vm331_vm1, %v6833_v60 }
 0x16d   : > { %v1446_v0 = vpop.f32.mrf.mxu2 }
 0x16e   : > { %v1620_v7 = vadd.f32 %v1446_v0, %v977_v53  ;;  %v1983_v57 = vpop.f32.mrf.mxu3  ;;  %v979_v32 = vpop.f32.mrf.mxu1  ;;  %v7245_v53 = vld [vmem:[%s6648_s6 + $0x140] sm:$0xff] }
 0x16f   : > { %v980_v60 = vadd.f32 %v979_v32, %v7036_v61  ;;  %v5681_v0 = vld [vmem:[%s6648_s6 + $0x141] sm:$0xff] }
 0x170   : > { %v2157_v15 = vadd.f32 %v1983_v57, %v1620_v7 }
 0x171   : > { %v2520_v37 = vpop.f32.mrf.mxu0  ;;  %5417 = vmatmul.msk.f32.gmra.mxu1 %vm331_vm1, %v5545_v54 }
 0x172   : > { %v7222_v38 = vadd.f32 %v2517_v44, %v2157_v15  ;;  %5483 = vmatmul.msk.f32.gmra.mxu2 %vm331_vm1, %v1167_v45  ;;  %v1170_v15 = vld [vmem:[%s6648_s6 + $0x122] sm:$0xff] }
 0x173   : > { %5615 = vmatmul.msk.f32.gmra.mxu3 %vm331_vm1, %v5549_v29 }
 0x174   : > { %5745 = vmatmul.msk.f32.gmra.mxu0 %vm331_vm1, %v6851_v1 }
 0x175   : > { %v1449_v22 = vpop.f32.mrf.mxu2 }
 0x176   : > { %v1621_v59 = vadd.f32 %v1449_v22, %v980_v60  ;;  %v1986_v39 = vpop.f32.mrf.mxu3  ;;  %v982_v34 = vpop.f32.mrf.mxu1  ;;  %v7258_v60 = vld [vmem:[%s6648_s6 + $0x148] sm:$0xff] }
 0x177   : > { %v983_v1 = vadd.f32 %v982_v34, %v7051_v42  ;;  %v5682_v22 = vld [vmem:[%s6648_s6 + $0x149] sm:$0xff] }
 0x178   : > { %v2158_v49 = vadd.f32 %v1986_v39, %v1621_v59 }
 0x179   : > { %v2523_v54 = vpop.f32.mrf.mxu0  ;;  %5418 = vmatmul.msk.f32.gmra.mxu1 %vm331_vm1, %v5546_v21 }
 0x17a   : > { %v7234_v40 = vadd.f32 %v2520_v37, %v2158_v49  ;;  %5484 = vmatmul.msk.f32.gmra.mxu2 %vm331_vm1, %v1168_v17 }
 0x17b   : > { %5616 = vmatmul.msk.f32.gmra.mxu3 %vm331_vm1, %v7232_v35 }
 0x17c   : > { %5746 = vmatmul.msk.f32.gmra.mxu0 %vm331_vm1, %v6865_v6 }
 0x17d   : > { %v1452_v61 = vpop.f32.mrf.mxu2 }
 0x17e   : > { %v1622_v27 = vadd.f32 %v1452_v61, %v983_v1  ;;  %v1989_v41 = vpop.f32.mrf.mxu3  ;;  %v985_v3 = vpop.f32.mrf.mxu1  ;;  %v7271_v61 = vld [vmem:[%s6648_s6 + $0x150] sm:$0xff] }
 0x17f   : > { %v986_v6 = vadd.f32 %v985_v3, %v7066_v19 }
 0x180   : > { %v2159_v44 = vadd.f32 %v1989_v41, %v1622_v27  ;;  %v5683_v27 = vld [vmem:[%s6648_s6 + $0x151] sm:$0xff] }
 0x181   : > { %v2526_v21 = vpop.f32.mrf.mxu0  ;;  %5419 = vmatmul.msk.f32.gmra.mxu1 %vm331_vm1, %v5547_v13 }
 0x182   : > { %v7248_v7 = vadd.f32 %v2523_v54, %v2159_v44  ;;  %5485 = vmatmul.msk.f32.gmra.mxu2 %vm331_vm1, %v1169_v33  ;;  %v1171_v54 = vld [vmem:[%s6648_s6 + $0x12a] sm:$0xff] }
 0x183   : > { %5617 = vmatmul.msk.f32.gmra.mxu3 %vm331_vm1, %v7245_v53 }
 0x184   : > { %5747 = vmatmul.msk.f32.gmra.mxu0 %vm331_vm1, %v5681_v0  ;;  %v1172_v0 = vld [vmem:[%s6648_s6 + $0x132] sm:$0xff] }
 0x185   : > { %v1455_v42 = vpop.f32.mrf.mxu2 }
 0x186   : > { %v1623_v57 = vadd.f32 %v1455_v42, %v986_v6  ;;  %v1992_v32 = vpop.f32.mrf.mxu3  ;;  %v988_v45 = vpop.f32.mrf.mxu1  ;;  %v7284_v42 = vld [vmem:[%s6648_s6 + $0x158] sm:$0xff] }
 0x187   : > { %v989_v19 = vadd.f32 %v988_v45, %v7081_v63 }
 0x188   : > { %v2160_v37 = vadd.f32 %v1992_v32, %v1623_v57  ;;  %v5684_v57 = vld [vmem:[%s6648_s6 + $0x159] sm:$0xff] }
 0x189   : > { %v2529_v13 = vpop.f32.mrf.mxu0  ;;  %5420 = vmatmul.msk.f32.gmra.mxu1 %vm331_vm1, %v5548_v51 }
 0x18a   : > { %v7261_v59 = vadd.f32 %v2526_v21, %v2160_v37  ;;  %5486 = vmatmul.msk.f32.gmra.mxu2 %vm331_vm1, %v1170_v15 }
 0x18b   : > { %5618 = vmatmul.msk.f32.gmra.mxu3 %vm331_vm1, %v7258_v60 }
 0x18c   : > { %5748 = vmatmul.msk.f32.gmra.mxu0 %vm331_vm1, %v5682_v22  ;;  %v1173_v22 = vld [vmem:[%s6648_s6 + $0x142] sm:$0xff] }
 0x18d   : > { %v1458_v39 = vpop.f32.mrf.mxu2 }
 0x18e   : > { %v1624_v34 = vadd.f32 %v1458_v39, %v989_v19  ;;  %v1995_v17 = vpop.f32.mrf.mxu3  ;;  %v991_v49 = vpop.f32.mrf.mxu1  ;;  %v7298_v39 = vld [vmem:[%s6648_s6 + $0x168] sm:$0xff] }
 0x18f   : > { %v992_v63 = vadd.f32 %v991_v49, %v7096_v56 }
 0x190   : > { %v2161_v1 = vadd.f32 %v1995_v17, %v1624_v34  ;;  %v5685_v34 = vld [vmem:[%s6648_s6 + $0x169] sm:$0xff] }
 0x191   : > { %v2532_v51 = vpop.f32.mrf.mxu0  ;;  %5421 = vmatmul.msk.f32.gmra.mxu1 %vm331_vm1, %v5549_v29 }
 0x192   : > { %v7274_v41 = vadd.f32 %v2529_v13, %v2161_v1  ;;  %5487 = vmatmul.msk.f32.gmra.mxu2 %vm331_vm1, %v1171_v54 }
 0x193   : > { %5619 = vmatmul.msk.f32.gmra.mxu3 %vm331_vm1, %v7271_v61 }
 0x194   : > { %5749 = vmatmul.msk.f32.gmra.mxu0 %vm331_vm1, %v5683_v27  ;;  %v1174_v27 = vld [vmem:[%s6648_s6 + $0x14a] sm:$0xff] }
 0x195   : > { %v1461_v3 = vpop.f32.mrf.mxu2 }
 0x196   : > { %v1625_v33 = vadd.f32 %v1461_v3, %v992_v63  ;;  %v1998_v44 = vpop.f32.mrf.mxu3  ;;  %v994_v21 = vpop.f32.mrf.mxu1  ;;  %v7312_v3 = vld [vmem:[%s6648_s6 + $0x170] sm:$0xff] }
 0x197   : > { %v995_v56 = vadd.f32 %v994_v21, %v7111_v52 }
 0x198   : > { %v2162_v6 = vadd.f32 %v1998_v44, %v1625_v33  ;;  %v5686_v33 = vld [vmem:[%s6648_s6 + $0x171] sm:$0xff] }
 0x199   : > { %v2535_v29 = vpop.f32.mrf.mxu0  ;;  %5422 = vmatmul.msk.f32.gmra.mxu1 %vm331_vm1, %v7232_v35 }
 0x19a   : > { %v7287_v32 = vadd.f32 %v2532_v51, %v2162_v6  ;;  %5488 = vmatmul.msk.f32.gmra.mxu2 %vm331_vm1, %v1172_v0 }
 0x19b   : > { %5620 = vmatmul.msk.f32.gmra.mxu3 %vm331_vm1, %v7284_v42 }
 0x19c   : > { %5750 = vmatmul.msk.f32.gmra.mxu0 %vm331_vm1, %v5684_v57  ;;  %v1175_v57 = vld [vmem:[%s6648_s6 + $0x152] sm:$0xff] }
 0x19d   : > { %v1464_v45 = vpop.f32.mrf.mxu2 }
 0x19e   : > { %v1626_v15 = vadd.f32 %v1464_v45, %v995_v56  ;;  %v2001_v37 = vpop.f32.mrf.mxu3  ;;  %v997_v13 = vpop.f32.mrf.mxu1  ;;  %v7326_v45 = vld [vmem:[%s6648_s6 + $0x178] sm:$0xff] }
 0x19f   : > { %v998_v52 = vadd.f32 %v997_v13, %v6878_v11 }
 0x1a0   : > { %v2163_v19 = vadd.f32 %v2001_v37, %v1626_v15  ;;  %v5687_v15 = vld [vmem:[%s6648_s6 + $0x179] sm:$0xff] }
 0x1a1   : > { %v2538_v35 = vpop.f32.mrf.mxu0  ;;  %5423 = vmatmul.msk.f32.gmra.mxu1 %vm331_vm1, %v7245_v53 }
 0x1a2   : > { %v7301_v17 = vadd.f32 %v2535_v29, %v2163_v19  ;;  %5489 = vmatmul.msk.f32.gmra.mxu2 %vm331_vm1, %v1173_v22 }
 0x1a3   : > { %5621 = vmatmul.msk.f32.gmra.mxu3 %vm331_vm1, %v7298_v39 }
 0x1a4   : > { %5751 = vmatmul.msk.f32.gmra.mxu0 %vm331_vm1, %v5685_v34  ;;  %v1176_v34 = vld [vmem:[%s6648_s6 + $0x15a] sm:$0xff] }
 0x1a5   : > { %v1467_v49 = vpop.f32.mrf.mxu2 }
 0x1a6   : > { %v1627_v54 = vadd.f32 %v1467_v49, %v998_v52  ;;  %v2004_v1 = vpop.f32.mrf.mxu3  ;;  %v1000_v51 = vpop.f32.mrf.mxu1  ;;  %v7340_v49 = vld [vmem:[%s6648_s6 + $0x180] sm:$0xff] }
 0x1a7   : > { %v1001_v11 = vadd.f32 %v1000_v51, %v6894_v20 }
 0x1a8   : > { %v2164_v63 = vadd.f32 %v2004_v1, %v1627_v54  ;;  %v5688_v54 = vld [vmem:[%s6648_s6 + $0x181] sm:$0xff] }
 0x1a9   : > { %v2541_v53 = vpop.f32.mrf.mxu0  ;;  %5424 = vmatmul.msk.f32.gmra.mxu1 %vm331_vm1, %v7258_v60 }
 0x1aa   : > { %v7315_v44 = vadd.f32 %v2538_v35, %v2164_v63  ;;  %5490 = vmatmul.msk.f32.gmra.mxu2 %vm331_vm1, %v1174_v27 }
 0x1ab   : > { %5622 = vmatmul.msk.f32.gmra.mxu3 %vm331_vm1, %v7312_v3 }
 0x1ac   : > { %5752 = vmatmul.msk.f32.gmra.mxu0 %vm331_vm1, %v5686_v33  ;;  %v1177_v33 = vld [vmem:[%s6648_s6 + $0x16a] sm:$0xff] }
 0x1ad   : > { %v1470_v21 = vpop.f32.mrf.mxu2 }
 0x1ae   : > { %v1628_v0 = vadd.f32 %v1470_v21, %v1001_v11  ;;  %v2007_v6 = vpop.f32.mrf.mxu3  ;;  %v1003_v29 = vpop.f32.mrf.mxu1  ;;  %v7354_v21 = vld [vmem:[%s6648_s6 + $0x190] sm:$0xff] }
 0x1af   : > { %v1004_v20 = vadd.f32 %v1003_v29, %v6910_v31 }
 0x1b0   : > { %v2165_v56 = vadd.f32 %v2007_v6, %v1628_v0  ;;  %v5689_v0 = vld [vmem:[%s6648_s6 + $0x191] sm:$0xff] }
 0x1b1   : > { %v2544_v60 = vpop.f32.mrf.mxu0  ;;  %5425 = vmatmul.msk.f32.gmra.mxu1 %vm331_vm1, %v7271_v61 }
 0x1b2   : > { %v7329_v37 = vadd.f32 %v2541_v53, %v2165_v56  ;;  %5491 = vmatmul.msk.f32.gmra.mxu2 %vm331_vm1, %v1175_v57 }
 0x1b3   : > { %5623 = vmatmul.msk.f32.gmra.mxu3 %vm331_vm1, %v7326_v45 }
 0x1b4   : > { %5753 = vmatmul.msk.f32.gmra.mxu0 %vm331_vm1, %v5687_v15  ;;  %v1178_v15 = vld [vmem:[%s6648_s6 + $0x172] sm:$0xff] }
 0x1b5   : > { %v1473_v13 = vpop.f32.mrf.mxu2 }
 0x1b6   : > { %v1629_v22 = vadd.f32 %v1473_v13, %v1004_v20  ;;  %v2010_v19 = vpop.f32.mrf.mxu3  ;;  %v1006_v35 = vpop.f32.mrf.mxu1  ;;  %v7368_v13 = vld [vmem:[%s6648_s6 + $0x198] sm:$0xff] }
 0x1b7   : > { %v1007_v31 = vadd.f32 %v1006_v35, %v6926_v43 }
 0x1b8   : > { %v2166_v52 = vadd.f32 %v2010_v19, %v1629_v22  ;;  %v5690_v22 = vld [vmem:[%s6648_s6 + $0x199] sm:$0xff] }
 0x1b9   : > { %v2547_v61 = vpop.f32.mrf.mxu0  ;;  %5426 = vmatmul.msk.f32.gmra.mxu1 %vm331_vm1, %v7284_v42 }
 0x1ba   : > { %v7343_v1 = vadd.f32 %v2544_v60, %v2166_v52  ;;  %5492 = vmatmul.msk.f32.gmra.mxu2 %vm331_vm1, %v1176_v34 }
 0x1bb   : > { %5624 = vmatmul.msk.f32.gmra.mxu3 %vm331_vm1, %v7340_v49 }
 0x1bc   : > { %5754 = vmatmul.msk.f32.gmra.mxu0 %vm331_vm1, %v5688_v54  ;;  %v1179_v54 = vld [vmem:[%s6648_s6 + $0x17a] sm:$0xff] }
 0x1bd   : > { %v1476_v51 = vpop.f32.mrf.mxu2 }
 0x1be   : > { %v1630_v27 = vadd.f32 %v1476_v51, %v1007_v31  ;;  %v2013_v63 = vpop.f32.mrf.mxu3  ;;  %v1009_v53 = vpop.f32.mrf.mxu1  ;;  %v7382_v51 = vld [vmem:[%s6648_s6 + $0x1a0] sm:$0xff] }
 0x1bf   : > { %v1010_v43 = vadd.f32 %v1009_v53, %v6942_v55 }
 0x1c0   : > { %v2167_v11 = vadd.f32 %v2013_v63, %v1630_v27  ;;  %v5691_v27 = vld [vmem:[%s6648_s6 + $0x1a1] sm:$0xff] }
 0x1c1   : > { %v2550_v42 = vpop.f32.mrf.mxu0  ;;  %5427 = vmatmul.msk.f32.gmra.mxu1 %vm331_vm1, %v7298_v39 }
 0x1c2   : > { %v7357_v6 = vadd.f32 %v2547_v61, %v2167_v11  ;;  %5493 = vmatmul.msk.f32.gmra.mxu2 %vm331_vm1, %v1177_v33 }
 0x1c3   : > { %5625 = vmatmul.msk.f32.gmra.mxu3 %vm331_vm1, %v7354_v21 }
 0x1c4   : > { %5755 = vmatmul.msk.f32.gmra.mxu0 %vm331_vm1, %v5689_v0  ;;  %v1180_v0 = vld [vmem:[%s6648_s6 + $0x182] sm:$0xff] }
 0x1c5   : > { %v1479_v29 = vpop.f32.mrf.mxu2 }
 0x1c6   : > { %v1631_v57 = vadd.f32 %v1479_v29, %v1010_v43  ;;  %v2016_v56 = vpop.f32.mrf.mxu3  ;;  %v1012_v60 = vpop.f32.mrf.mxu1  ;;  %v7396_v29 = vld [vmem:[%s6648_s6 + $0x1a8] sm:$0xff] }
 0x1c7   : > { %v1013_v55 = vadd.f32 %v1012_v60, %v6957_v62 }
 0x1c8   : > { %v2168_v20 = vadd.f32 %v2016_v56, %v1631_v57  ;;  %v5692_v57 = vld [vmem:[%s6648_s6 + $0x1a9] sm:$0xff] }
 0x1c9   : > { %v2553_v39 = vpop.f32.mrf.mxu0  ;;  %5428 = vmatmul.msk.f32.gmra.mxu1 %vm331_vm1, %v7312_v3 }
 0x1ca   : > { %v7371_v19 = vadd.f32 %v2550_v42, %v2168_v20  ;;  %5494 = vmatmul.msk.f32.gmra.mxu2 %vm331_vm1, %v1178_v15 }
 0x1cb   : > { %5626 = vmatmul.msk.f32.gmra.mxu3 %vm331_vm1, %v7368_v13 }
 0x1cc   : > { %5756 = vmatmul.msk.f32.gmra.mxu0 %vm331_vm1, %v5690_v22  ;;  %v1181_v22 = vld [vmem:[%s6648_s6 + $0x192] sm:$0xff] }
 0x1cd   : > { %v1482_v35 = vpop.f32.mrf.mxu2 }
 0x1ce   : > { %v1632_v34 = vadd.f32 %v1482_v35, %v1013_v55  ;;  %v2019_v52 = vpop.f32.mrf.mxu3  ;;  %v1015_v61 = vpop.f32.mrf.mxu1  ;;  %v7410_v35 = vld [vmem:[%s6648_s6 + $0x1b8] sm:$0xff] }
 0x1cf   : > { %v1016_v62 = vadd.f32 %v1015_v61, %v6972_v8 }
 0x1d0   : > { %v2169_v31 = vadd.f32 %v2019_v52, %v1632_v34  ;;  %v5693_v34 = vld [vmem:[%s6648_s6 + $0x1b9] sm:$0xff] }
 0x1d1   : > { %v2556_v3 = vpop.f32.mrf.mxu0  ;;  %5429 = vmatmul.msk.f32.gmra.mxu1 %vm331_vm1, %v7326_v45 }
 0x1d2   : > { %v7385_v63 = vadd.f32 %v2553_v39, %v2169_v31  ;;  %5495 = vmatmul.msk.f32.gmra.mxu2 %vm331_vm1, %v1179_v54 }
 0x1d3   : > { %5627 = vmatmul.msk.f32.gmra.mxu3 %vm331_vm1, %v7382_v51 }
 0x1d4   : > { %5757 = vmatmul.msk.f32.gmra.mxu0 %vm331_vm1, %v5691_v27  ;;  %v1182_v27 = vld [vmem:[%s6648_s6 + $0x19a] sm:$0xff] }
 0x1d5   : > { %v1485_v53 = vpop.f32.mrf.mxu2 }
 0x1d6   : > { %v1633_v33 = vadd.f32 %v1485_v53, %v1016_v62  ;;  %v2022_v11 = vpop.f32.mrf.mxu3  ;;  %v1018_v42 = vpop.f32.mrf.mxu1  ;;  %v7424_v53 = vld [vmem:[%s6648_s6 + $0x1c0] sm:$0xff] }
 0x1d7   : > { %v1019_v8 = vadd.f32 %v1018_v42, %v6987_v23 }
 0x1d8   : > { %v2170_v43 = vadd.f32 %v2022_v11, %v1633_v33  ;;  %v5694_v33 = vld [vmem:[%s6648_s6 + $0x1c1] sm:$0xff] }
 0x1d9   : > { %v2559_v45 = vpop.f32.mrf.mxu0  ;;  %5430 = vmatmul.msk.f32.gmra.mxu1 %vm331_vm1, %v7340_v49 }
 0x1da   : > { %v7399_v56 = vadd.f32 %v2556_v3, %v2170_v43  ;;  %5496 = vmatmul.msk.f32.gmra.mxu2 %vm331_vm1, %v1180_v0 }
 0x1db   : > { %5628 = vmatmul.msk.f32.gmra.mxu3 %vm331_vm1, %v7396_v29 }
 0x1dc   : > { %5758 = vmatmul.msk.f32.gmra.mxu0 %vm331_vm1, %v5692_v57  ;;  %v1183_v57 = vld [vmem:[%s6648_s6 + $0x1a2] sm:$0xff] }
 0x1dd   : > { %v1488_v60 = vpop.f32.mrf.mxu2 }
 0x1de   : > { %v1634_v15 = vadd.f32 %v1488_v60, %v1019_v8  ;;  %v2025_v20 = vpop.f32.mrf.mxu3  ;;  %v1021_v39 = vpop.f32.mrf.mxu1  ;;  %v7438_v60 = vld [vmem:[%s6648_s6 + $0x1c8] sm:$0xff] }
 0x1df   : > { %v1022_v23 = vadd.f32 %v1021_v39, %v7002_v46 }
 0x1e0   : > { %v2171_v55 = vadd.f32 %v2025_v20, %v1634_v15  ;;  %v5695_v15 = vld [vmem:[%s6648_s6 + $0x1c9] sm:$0xff] }
 0x1e1   : > { %v2562_v49 = vpop.f32.mrf.mxu0  ;;  %5431 = vmatmul.msk.f32.gmra.mxu1 %vm331_vm1, %v7354_v21 }
 0x1e2   : > { %v7413_v52 = vadd.f32 %v2559_v45, %v2171_v55  ;;  %5497 = vmatmul.msk.f32.gmra.mxu2 %vm331_vm1, %v1181_v22 }
 0x1e3   : > { %5629 = vmatmul.msk.f32.gmra.mxu3 %vm331_vm1, %v7410_v35 }
 0x1e4   : > { %5759 = vmatmul.msk.f32.gmra.mxu0 %vm331_vm1, %v5693_v34  ;;  %v1184_v34 = vld [vmem:[%s6648_s6 + $0x1aa] sm:$0xff] }
 0x1e5   : > { %v1491_v61 = vpop.f32.mrf.mxu2 }
 0x1e6   : > { %v1635_v54 = vadd.f32 %v1491_v61, %v1022_v23  ;;  %v2028_v31 = vpop.f32.mrf.mxu3  ;;  %v1024_v3 = vpop.f32.mrf.mxu1  ;;  %v7452_v61 = vld [vmem:[%s6648_s6 + $0x1d0] sm:$0xff] }
 0x1e7   : > { %v1025_v46 = vadd.f32 %v1024_v3, %v7017_v12 }
 0x1e8   : > { %v2172_v62 = vadd.f32 %v2028_v31, %v1635_v54  ;;  %v5696_v54 = vld [vmem:[%s6648_s6 + $0x1d1] sm:$0xff] }
 0x1e9   : > { %v2565_v21 = vpop.f32.mrf.mxu0  ;;  %5432 = vmatmul.msk.f32.gmra.mxu1 %vm331_vm1, %v7368_v13 }
 0x1ea   : > { %v7427_v11 = vadd.f32 %v2562_v49, %v2172_v62  ;;  %5498 = vmatmul.msk.f32.gmra.mxu2 %vm331_vm1, %v1182_v27 }
 0x1eb   : > { %5630 = vmatmul.msk.f32.gmra.mxu3 %vm331_vm1, %v7424_v53 }
 0x1ec   : > { %5760 = vmatmul.msk.f32.gmra.mxu0 %vm331_vm1, %v5694_v33  ;;  %v1185_v33 = vld [vmem:[%s6648_s6 + $0x1ba] sm:$0xff] }
 0x1ed   : > { %v1494_v42 = vpop.f32.mrf.mxu2 }
 0x1ee   : > { %v1636_v0 = vadd.f32 %v1494_v42, %v1025_v46  ;;  %v2031_v43 = vpop.f32.mrf.mxu3  ;;  %v1027_v45 = vpop.f32.mrf.mxu1  ;;  %v7466_v42 = vld [vmem:[%s6648_s6 + $0x1e0] sm:$0xff] }
 0x1ef   : > { %v1028_v12 = vadd.f32 %v1027_v45, %v7032_v47 }
 0x1f0   : > { %v2173_v8 = vadd.f32 %v2031_v43, %v1636_v0  ;;  %v5697_v0 = vld [vmem:[%s6648_s6 + $0x1e1] sm:$0xff] }
 0x1f1   : > { %v2568_v13 = vpop.f32.mrf.mxu0  ;;  %5433 = vmatmul.msk.f32.gmra.mxu1 %vm331_vm1, %v7382_v51 }
 0x1f2   : > { %v7441_v20 = vadd.f32 %v2565_v21, %v2173_v8  ;;  %5499 = vmatmul.msk.f32.gmra.mxu2 %vm331_vm1, %v1183_v57 }
 0x1f3   : > { %5631 = vmatmul.msk.f32.gmra.mxu3 %vm331_vm1, %v7438_v60 }
 0x1f4   : > { %5761 = vmatmul.msk.f32.gmra.mxu0 %vm331_vm1, %v5695_v15  ;;  %v1186_v15 = vld [vmem:[%s6648_s6 + $0x1c2] sm:$0xff] }
 0x1f5   : > { %v1497_v39 = vpop.f32.mrf.mxu2 }
 0x1f6   : > { %v1637_v22 = vadd.f32 %v1497_v39, %v1028_v12  ;;  %v2034_v55 = vpop.f32.mrf.mxu3  ;;  %v1030_v49 = vpop.f32.mrf.mxu1  ;;  %v7480_v39 = vld [vmem:[%s6648_s6 + $0x1e8] sm:$0xff] }
 0x1f7   : > { %v1031_v47 = vadd.f32 %v1030_v49, %v7047_v26 }
 0x1f8   : > { %v2174_v23 = vadd.f32 %v2034_v55, %v1637_v22  ;;  %v5698_v22 = vld [vmem:[%s6648_s6 + $0x1e9] sm:$0xff] }
 0x1f9   : > { %v2571_v51 = vpop.f32.mrf.mxu0  ;;  %5434 = vmatmul.msk.f32.gmra.mxu1 %vm331_vm1, %v7396_v29 }
 0x1fa   : > { %v7455_v31 = vadd.f32 %v2568_v13, %v2174_v23  ;;  %5500 = vmatmul.msk.f32.gmra.mxu2 %vm331_vm1, %v1184_v34 }
 0x1fb   : > { %5632 = vmatmul.msk.f32.gmra.mxu3 %vm331_vm1, %v7452_v61 }
 0x1fc   : > { %5762 = vmatmul.msk.f32.gmra.mxu0 %vm331_vm1, %v5696_v54  ;;  %v1187_v54 = vld [vmem:[%s6648_s6 + $0x1ca] sm:$0xff] }
 0x1fd   : > { %v1500_v3 = vpop.f32.mrf.mxu2 }
 0x1fe   : > { %v1638_v27 = vadd.f32 %v1500_v3, %v1031_v47  ;;  %v2037_v62 = vpop.f32.mrf.mxu3  ;;  %v1033_v21 = vpop.f32.mrf.mxu1  ;;  %v7494_v3 = vld [vmem:[%s6648_s6 + $0x1f0] sm:$0xff] }
 0x1ff   : > { %v1034_v26 = vadd.f32 %v1033_v21, %v7062_v50 }
 0x200   : > { %v2175_v46 = vadd.f32 %v2037_v62, %v1638_v27  ;;  %v5699_v27 = vld [vmem:[%s6648_s6 + $0x1f1] sm:$0xff] }
 0x201   : > { %v2574_v29 = vpop.f32.mrf.mxu0  ;;  %5435 = vmatmul.msk.f32.gmra.mxu1 %vm331_vm1, %v7410_v35 }
 0x202   : > { %v7469_v43 = vadd.f32 %v2571_v51, %v2175_v46  ;;  %5501 = vmatmul.msk.f32.gmra.mxu2 %vm331_vm1, %v1185_v33 }
 0x203   : > { %5633 = vmatmul.msk.f32.gmra.mxu3 %vm331_vm1, %v7466_v42 }
 0x204   : > { %5763 = vmatmul.msk.f32.gmra.mxu0 %vm331_vm1, %v5697_v0  ;;  %v1188_v0 = vld [vmem:[%s6648_s6 + $0x1d2] sm:$0xff] }
 0x205   : > { %v1503_v45 = vpop.f32.mrf.mxu2 }
 0x206   : > { %v1639_v57 = vadd.f32 %v1503_v45, %v1034_v26  ;;  %v2040_v8 = vpop.f32.mrf.mxu3  ;;  %v1036_v13 = vpop.f32.mrf.mxu1  ;;  %v7508_v45 = vld [vmem:[%s6648_s6 + $0x1f8] sm:$0xff] }
 0x207   : > { %v1037_v50 = vadd.f32 %v1036_v13, %v7077_v58 }
 0x208   : > { %v2176_v12 = vadd.f32 %v2040_v8, %v1639_v57  ;;  %v5700_v57 = vld [vmem:[%s6648_s6 + $0x1f9] sm:$0xff] }
 0x209   : > { %v2577_v35 = vpop.f32.mrf.mxu0  ;;  %5436 = vmatmul.msk.f32.gmra.mxu1 %vm331_vm1, %v7424_v53 }
 0x20a   : > { %v7483_v55 = vadd.f32 %v2574_v29, %v2176_v12  ;;  %5502 = vmatmul.msk.f32.gmra.mxu2 %vm331_vm1, %v1186_v15 }
 0x20b   : > { %5634 = vmatmul.msk.f32.gmra.mxu3 %vm331_vm1, %v7480_v39 }
 0x20c   : > { %5764 = vmatmul.msk.f32.gmra.mxu0 %vm331_vm1, %v5698_v22  ;;  %v1189_v22 = vld [vmem:[%s6648_s6 + $0x1e2] sm:$0xff] }
 0x20d   : > { %v1506_v49 = vpop.f32.mrf.mxu2 }
 0x20e   : > { %v1640_v34 = vadd.f32 %v1506_v49, %v1037_v50  ;;  %v2043_v23 = vpop.f32.mrf.mxu3  ;;  %v1039_v51 = vpop.f32.mrf.mxu1  ;;  %v7522_v49 = vld [vmem:[%s6648_s6 + $0x208] sm:$0xff] }
 0x20f   : > { %v1040_v58 = vadd.f32 %v1039_v51, %v7092_v2 }
 0x210   : > { %v2177_v47 = vadd.f32 %v2043_v23, %v1640_v34  ;;  %v5701_v34 = vld [vmem:[%s6648_s6 + $0x209] sm:$0xff] }
 0x211   : > { %v2580_v53 = vpop.f32.mrf.mxu0  ;;  %5437 = vmatmul.msk.f32.gmra.mxu1 %vm331_vm1, %v7438_v60 }
 0x212   : > { %v7497_v62 = vadd.f32 %v2577_v35, %v2177_v47  ;;  %5503 = vmatmul.msk.f32.gmra.mxu2 %vm331_vm1, %v1187_v54 }
 0x213   : > { %5635 = vmatmul.msk.f32.gmra.mxu3 %vm331_vm1, %v7494_v3 }
 0x214   : > { %5765 = vmatmul.msk.f32.gmra.mxu0 %vm331_vm1, %v5699_v27  ;;  %v1190_v27 = vld [vmem:[%s6648_s6 + $0x1ea] sm:$0xff] }
 0x215   : > { %v1509_v21 = vpop.f32.mrf.mxu2 }
 0x216   : > { %v1641_v33 = vadd.f32 %v1509_v21, %v1040_v58  ;;  %v2046_v46 = vpop.f32.mrf.mxu3  ;;  %v1042_v29 = vpop.f32.mrf.mxu1  ;;  %v7536_v21 = vld [vmem:[%s6648_s6 + $0x210] sm:$0xff] }
 0x217   : > { %v1043_v2 = vadd.f32 %v1042_v29, %v7107_v14 }
 0x218   : > { %v2178_v26 = vadd.f32 %v2046_v46, %v1641_v33  ;;  %v5702_v33 = vld [vmem:[%s6648_s6 + $0x211] sm:$0xff] }
 0x219   : > { %v2583_v60 = vpop.f32.mrf.mxu0  ;;  %5438 = vmatmul.msk.f32.gmra.mxu1 %vm331_vm1, %v7452_v61 }
 0x21a   : > { %v7511_v8 = vadd.f32 %v2580_v53, %v2178_v26  ;;  %5504 = vmatmul.msk.f32.gmra.mxu2 %vm331_vm1, %v1188_v0 }
 0x21b   : > { %5636 = vmatmul.msk.f32.gmra.mxu3 %vm331_vm1, %v7508_v45 }
 0x21c   : > { %5766 = vmatmul.msk.f32.gmra.mxu0 %vm331_vm1, %v5700_v57  ;;  %v1191_v57 = vld [vmem:[%s6648_s6 + $0x1f2] sm:$0xff] }
 0x21d   : > { %v1512_v13 = vpop.f32.mrf.mxu2 }
 0x21e   : > { %v1642_v15 = vadd.f32 %v1512_v13, %v1043_v2  ;;  %v2049_v12 = vpop.f32.mrf.mxu3  ;;  %v1045_v35 = vpop.f32.mrf.mxu1  ;;  %v7550_v13 = vld [vmem:[%s6648_s6 + $0x218] sm:$0xff] }
 0x21f   : > { %v1046_v14 = vadd.f32 %v1045_v35, %v6890_v18 }
 0x220   : > { %v2179_v50 = vadd.f32 %v2049_v12, %v1642_v15  ;;  %v5703_v15 = vld [vmem:[%s6648_s6 + $0x219] sm:$0xff] }
 0x221   : > { %v2586_v61 = vpop.f32.mrf.mxu0  ;;  %5439 = vmatmul.msk.f32.gmra.mxu1 %vm331_vm1, %v7466_v42 }
 0x222   : > { %v7525_v23 = vadd.f32 %v2583_v60, %v2179_v50  ;;  %5505 = vmatmul.msk.f32.gmra.mxu2 %vm331_vm1, %v1189_v22 }
 0x223   : > { %5637 = vmatmul.msk.f32.gmra.mxu3 %vm331_vm1, %v7522_v49 }
 0x224   : > { %5767 = vmatmul.msk.f32.gmra.mxu0 %vm331_vm1, %v5701_v34  ;;  %v1192_v34 = vld [vmem:[%s6648_s6 + $0x1fa] sm:$0xff] }
 0x225   : > { %v1515_v51 = vpop.f32.mrf.mxu2 }
 0x226   : > { %v1643_v54 = vadd.f32 %v1515_v51, %v1046_v14  ;;  %v2052_v47 = vpop.f32.mrf.mxu3  ;;  %v1048_v53 = vpop.f32.mrf.mxu1  ;;  %v7564_v51 = vld [vmem:[%s6648_s6 + $0x220] sm:$0xff] }
 0x227   : > { %v1049_v18 = vadd.f32 %v1048_v53, %v6906_v24 }
 0x228   : > { %v2180_v58 = vadd.f32 %v2052_v47, %v1643_v54  ;;  %v5704_v54 = vld [vmem:[%s6648_s6 + $0x221] sm:$0xff] }
 0x229   : > { %v2589_v42 = vpop.f32.mrf.mxu0  ;;  %5440 = vmatmul.msk.f32.gmra.mxu1 %vm331_vm1, %v7480_v39 }
 0x22a   : > { %v7539_v46 = vadd.f32 %v2586_v61, %v2180_v58  ;;  %5506 = vmatmul.msk.f32.gmra.mxu2 %vm331_vm1, %v1190_v27 }
 0x22b   : > { %5638 = vmatmul.msk.f32.gmra.mxu3 %vm331_vm1, %v7536_v21 }
 0x22c   : > { %5768 = vmatmul.msk.f32.gmra.mxu0 %vm331_vm1, %v5702_v33 }
 0x22d   : > { %v1518_v29 = vpop.f32.mrf.mxu2 }
 0x22e   : > { %v1644_v0 = vadd.f32 %v1518_v29, %v1049_v18  ;;  %v2055_v26 = vpop.f32.mrf.mxu3  ;;  %v1051_v60 = vpop.f32.mrf.mxu1  ;;  %v1193_v18 = vld [vmem:[%s6648_s6 + $0x20a] sm:$0xff] }
 0x22f   : > { %v1052_v24 = vadd.f32 %v1051_v60, %v6922_v28  ;;  %v8665_v28 = vld [vmem:[#allocation11_spill] sm:$0xff] }
 0x230   : > { %v2181_v2 = vadd.f32 %v2055_v26, %v1644_v0  ;;  %v7578_v0 = vld [vmem:[%s6648_s6 + $0x230] sm:$0xff] }
 0x231   : > { %v2592_v39 = vpop.f32.mrf.mxu0  ;;  %5441 = vmatmul.msk.f32.gmra.mxu1 %vm331_vm1, %v7494_v3  ;;  %v5705_v26 = vld [vmem:[%s6648_s6 + $0x231] sm:$0xff] }
 0x232   : > { %v7553_v12 = vadd.f32 %v2589_v42, %v2181_v2  ;;  %5507 = vmatmul.msk.f32.gmra.mxu2 %vm331_vm1, %v1191_v57  ;;  %v8666_v57 = vld [vmem:[#allocation13_spill] sm:$0xff] }
 0x233   : > { %5639 = vmatmul.msk.f32.gmra.mxu3 %vm331_vm1, %v7550_v13 }
 0x234   : > { %5769 = vmatmul.msk.f32.gmra.mxu0 %vm331_vm1, %v5703_v15 }
 0x235   : > { %v1521_v35 = vpop.f32.mrf.mxu2 }
 0x236   : > { %v1645_v22 = vadd.f32 %v1521_v35, %v1052_v24  ;;  %v2058_v50 = vpop.f32.mrf.mxu3  ;;  %v1054_v61 = vpop.f32.mrf.mxu1 }
 0x237   : > { %v1055_v53 = vadd.f32 %v1054_v61, %v8665_v28  ;;  %v7592_v61 = vld [vmem:[%s6648_s6 + $0x238] sm:$0xff] }
 0x238   : > { %v2182_v14 = vadd.f32 %v2058_v50, %v1645_v22  ;;  %v1194_v22 = vld [vmem:[%s6648_s6 + $0x212] sm:$0xff] }
 0x239   : > { %v2595_v3 = vpop.f32.mrf.mxu0  ;;  %5442 = vmatmul.msk.f32.gmra.mxu1 %vm331_vm1, %v7508_v45 }
 0x23a   : > { %v7567_v47 = vadd.f32 %v2592_v39, %v2182_v14  ;;  %5508 = vmatmul.msk.f32.gmra.mxu2 %vm331_vm1, %v1192_v34  ;;  %v5706_v34 = vld [vmem:[%s6648_s6 + $0x239] sm:$0xff] }
 0x23b   : > { %5640 = vmatmul.msk.f32.gmra.mxu3 %vm331_vm1, %v7564_v51 }
 0x23c   : > { %5770 = vmatmul.msk.f32.gmra.mxu0 %vm331_vm1, %v5704_v54 }
 0x23d   : > { %v1524_v27 = vpop.f32.mrf.mxu2 }
 0x23e   : > { %v1646_v58 = vadd.f32 %v1524_v27, %v1055_v53  ;;  %v2061_v42 = vpop.f32.mrf.mxu3  ;;  %v1057_v33 = vpop.f32.mrf.mxu1 }
 0x23f   : > { %v1058_v2 = vadd.f32 %v1057_v33, %v8666_v57 }
 0x240   : > { %v2183_v29 = vadd.f32 %v2061_v42, %v1646_v58  ;;  %v1195_v42 = vld [vmem:[%s6648_s6 + $0x21a] sm:$0xff] }
 0x241   : > { %v2598_v45 = vpop.f32.mrf.mxu0  ;;  %5443 = vmatmul.msk.f32.gmra.mxu1 %vm331_vm1, %v7522_v49 }
 0x242   : > { %v7581_v60 = vadd.f32 %v2595_v3, %v2183_v29  ;;  %5509 = vmatmul.msk.f32.gmra.mxu2 %vm331_vm1, %v1193_v18  ;;  %v8667_v3 = vld [vmem:[#allocation15_spill] sm:$0xff] }
 0x243   : > { %5641 = vmatmul.msk.f32.gmra.mxu3 %vm331_vm1, %v7578_v0  ;;  %v7606_v18 = vld [vmem:[%s6648_s6 + $0x240] sm:$0xff] }
 0x244   : > { %5771 = vmatmul.msk.f32.gmra.mxu0 %vm331_vm1, %v5705_v26  ;;  %v5707_v29 = vld [vmem:[%s6648_s6 + $0x241] sm:$0xff]  ;;  %v8668_v26 = vld [vmem:[#allocation17_spill] sm:$0xff] }
 0x245   : > { %v1527_v39 = vpop.f32.mrf.mxu2 }
 0x246   : > { %v1647_v15 = vadd.f32 %v1527_v39, %v1058_v2  ;;  %v2064_v24 = vpop.f32.mrf.mxu3  ;;  %v1060_v35 = vpop.f32.mrf.mxu1 }
 0x247   : > { %v1061_v54 = vadd.f32 %v1060_v35, %v8667_v3  ;;  %v1196_v35 = vld [vmem:[%s6648_s6 + $0x222] sm:$0xff] }
 0x248   : > { %v2184_v50 = vadd.f32 %v2064_v24, %v1647_v15  ;;  %v8669_v3 = vld [vmem:[#allocation19_spill] sm:$0xff] }
 0x249   : > { %v2601_v49 = vpop.f32.mrf.mxu0  ;;  %5444 = vmatmul.msk.f32.gmra.mxu1 %vm331_vm1, %v7536_v21 }
 0x24a   : > { %v7595_v14 = vadd.f32 %v2598_v45, %v2184_v50  ;;  %5510 = vmatmul.msk.f32.gmra.mxu2 %vm331_vm1, %v1194_v22  ;;  %v7620_v50 = vld [vmem:[%s6648_s6 + $0x248] sm:$0xff] }
 0x24b   : > { %5642 = vmatmul.msk.f32.gmra.mxu3 %vm331_vm1, %v7592_v61 }
 0x24c   : > { %5772 = vmatmul.msk.f32.gmra.mxu0 %vm331_vm1, %v5706_v34 }
 0x24d   : > { %v1530_v28 = vpop.f32.mrf.mxu2 }
 0x24e   : > { %v1648_v53 = vadd.f32 %v1530_v28, %v1061_v54  ;;  %v2067_v27 = vpop.f32.mrf.mxu3  ;;  %v1063_v58 = vpop.f32.mrf.mxu1 }
 0x24f   : > { %v1064_v57 = vadd.f32 %v1063_v58, %v8668_v26 }
 0x250   : > { %v2185_v33 = vadd.f32 %v2067_v27, %v1648_v53 }
 0x251   : > { %v2604_v21 = vpop.f32.mrf.mxu0  ;;  %5445 = vmatmul.msk.f32.gmra.mxu1 %vm331_vm1, %v7550_v13 }
 0x252   : > { %v7609_v45 = vadd.f32 %v2601_v49, %v2185_v33  ;;  %5511 = vmatmul.msk.f32.gmra.mxu2 %vm331_vm1, %v1195_v42  ;;  %v5708_v49 = vld [vmem:[%s6648_s6 + $0x249] sm:$0xff]  ;;  %v1197_v42 = vld [vmem:[%s6648_s6 + $0x232] sm:$0xff] }
 0x253   : > { %5643 = vmatmul.msk.f32.gmra.mxu3 %vm331_vm1, %v7606_v18 }
 0x254   : > { %5773 = vmatmul.msk.f32.gmra.mxu0 %vm331_vm1, %v5707_v29  ;;  %v5709_v29 = vld [vmem:[%s6648_s6 + $0x259] sm:$0xff] }
 0x255   : > { %v1533_v2 = vpop.f32.mrf.mxu2 }
 0x256   : > { %v1649_v39 = vadd.f32 %v1533_v2, %v1064_v57  ;;  %v2070_v15 = vpop.f32.mrf.mxu3  ;;  %v1066_v24 = vpop.f32.mrf.mxu1  ;;  %v8670_v57 = vld [vmem:[#allocation21_spill] sm:$0xff] }
 0x257   : > { %v1067_v54 = vadd.f32 %v1066_v24, %v8669_v3  ;;  %v5710_v3 = vld [vmem:[%s6648_s6 + $0x261] sm:$0xff] }
 0x258   : > { %v2186_v22 = vadd.f32 %v2070_v15, %v1649_v39 }
 0x259   : > { %v2607_v13 = vpop.f32.mrf.mxu0  ;;  %5446 = vmatmul.msk.f32.gmra.mxu1 %vm331_vm1, %v7564_v51 }
 0x25a   : > { %v7623_v34 = vadd.f32 %v2604_v21, %v2186_v22  ;;  %5512 = vmatmul.msk.f32.gmra.mxu2 %vm331_vm1, %v1196_v35  ;;  %v7634_v21 = vld [vmem:[%s6648_s6 + $0x258] sm:$0xff] }
 0x25b   : > { %5644 = vmatmul.msk.f32.gmra.mxu3 %vm331_vm1, %v7620_v50  ;;  %v1198_v22 = vld [vmem:[%s6648_s6 + $0x23a] sm:$0xff] }
 0x25c   : > { %5774 = vmatmul.msk.f32.gmra.mxu0 %vm331_vm1, %v5708_v49  ;;  %v7648_v49 = vld [vmem:[%s6648_s6 + $0x260] sm:$0xff] }
 0x25d   : > { %v1536_v28 = vpop.f32.mrf.mxu2 }
 0x25e   : > { %v1650_v53 = vadd.f32 %v1536_v28, %v1067_v54  ;;  %v2073_v27 = vpop.f32.mrf.mxu3  ;;  %v1069_v58 = vpop.f32.mrf.mxu1  ;;  %v8671_v28 = vld [vmem:[#allocation23_spill] sm:$0xff] }
 0x25f   : > { %v1070_v2 = vadd.f32 %v1069_v58, %v8670_v57  ;;  %v7662_v57 = vld [vmem:[%s6648_s6 + $0x268] sm:$0xff] }
 0x260   : > { %v2187_v33 = vadd.f32 %v2073_v27, %v1650_v53 }
 0x261   : > { %v2610_v51 = vpop.f32.mrf.mxu0  ;;  %5447 = vmatmul.msk.f32.gmra.mxu1 %vm331_vm1, %v7578_v0 }
 0x262   : > { %v7637_v26 = vadd.f32 %v2607_v13, %v2187_v33  ;;  %5513 = vmatmul.msk.f32.gmra.mxu2 %vm331_vm1, %v1197_v42 }
 0x263   : > { %5645 = vmatmul.msk.f32.gmra.mxu3 %vm331_vm1, %v7634_v21 }
 0x264   : > { %5775 = vmatmul.msk.f32.gmra.mxu0 %vm331_vm1, %v5709_v29  ;;  %v1199_v29 = vld [vmem:[%s6648_s6 + $0x242] sm:$0xff] }
 0x265   : > { %v1539_v39 = vpop.f32.mrf.mxu2 }
 0x266   : > { %v1651_v15 = vadd.f32 %v1539_v39, %v1070_v2  ;;  %v2076_v24 = vpop.f32.mrf.mxu3  ;;  %v1072_v35 = vpop.f32.mrf.mxu1  ;;  %v5711_v2 = vld [vmem:[%s6648_s6 + $0x269] sm:$0xff] }
 0x267   : > { %v1073_v53 = vadd.f32 %v1072_v35, %v8671_v28  ;;  %v1200_v28 = vld [vmem:[%s6648_s6 + $0x24a] sm:$0xff] }
 0x268   : > { %v2188_v13 = vadd.f32 %v2076_v24, %v1651_v15  ;;  %v8672_v15 = vld [vmem:[#allocation25_spill] sm:$0xff] }
 0x269   : > { %v2613_v0 = vpop.f32.mrf.mxu0  ;;  %5448 = vmatmul.msk.f32.gmra.mxu1 %vm331_vm1, %v7592_v61 }
 0x26a   : > { %v7651_v54 = vadd.f32 %v2610_v51, %v2188_v13  ;;  %5514 = vmatmul.msk.f32.gmra.mxu2 %vm331_vm1, %v1198_v22 }
 0x26b   : > { %5646 = vmatmul.msk.f32.gmra.mxu3 %vm331_vm1, %v7648_v49 }
 0x26c   : > { %5776 = vmatmul.msk.f32.gmra.mxu0 %vm331_vm1, %v5710_v3 }
 0x26d   : > { %v1542_v27 = vpop.f32.mrf.mxu2 }
 0x26e   : > { %v1652_v58 = vadd.f32 %v1542_v27, %v1073_v53  ;;  %v2079_v42 = vpop.f32.mrf.mxu3  ;;  %v1075_v33 = vpop.f32.mrf.mxu1  ;;  %v7676_v53 = vld [vmem:[%s6648_s6 + $0x270] sm:$0xff] }
 0x26f   : > { %v1076_v24 = vadd.f32 %v1075_v33, %v8672_v15  ;;  %v5712_v27 = vld [vmem:[%s6648_s6 + $0x271] sm:$0xff] }
 0x270   : > { %v2189_v51 = vadd.f32 %v2079_v42, %v1652_v58  ;;  %v8673_v42 = vld [vmem:[#allocation27_spill] sm:$0xff] }
 0x271   : > { %v2616_v61 = vpop.f32.mrf.mxu0  ;;  %5449 = vmatmul.msk.f32.gmra.mxu1 %vm331_vm1, %v7606_v18 }
 0x272   : > { %v7665_v39 = vadd.f32 %v2613_v0, %v2189_v51  ;;  %5515 = vmatmul.msk.f32.gmra.mxu2 %vm331_vm1, %v1199_v29 }
 0x273   : > { %5647 = vmatmul.msk.f32.gmra.mxu3 %vm331_vm1, %v7662_v57 }
 0x274   : > { %5777 = vmatmul.msk.f32.gmra.mxu0 %vm331_vm1, %v5711_v2 }
 0x275   : > { %v1545_v35 = vpop.f32.mrf.mxu2 }
 0x276   : > { %v1653_v22 = vadd.f32 %v1545_v35, %v1076_v24  ;;  %v2082_v13 = vpop.f32.mrf.mxu3  ;;  %v1078_v3 = vpop.f32.mrf.mxu1  ;;  %v1201_v24 = vld [vmem:[%s6648_s6 + $0x25a] sm:$0xff] }
 0x277   : > { %v1079_v33 = vadd.f32 %v1078_v3, %v8673_v42  ;;  %v5583_v35 = vld [vmem:[%s6648_s6 + $0x280] sm:$0xff]  ;;  %v8675_v3 = vld [vmem:[#allocation29_spill] sm:$0xff] }
 0x278   : > { %v2190_v0 = vadd.f32 %v2082_v13, %v1653_v22 }
 0x279   : > { %v2619_v18 = vpop.f32.mrf.mxu0  ;;  %5450 = vmatmul.msk.f32.gmra.mxu1 %vm331_vm1, %v7620_v50  ;;  %v5713_v50 = vld [vmem:[%s6648_s6 + $0x281] sm:$0xff] }
 0x27a   : > { %v7679_v58 = vadd.f32 %v2616_v61, %v2190_v0  ;;  %5516 = vmatmul.msk.f32.gmra.mxu2 %vm331_vm1, %v1200_v28 }
 0x27b   : > { %5648 = vmatmul.msk.f32.gmra.mxu3 %vm331_vm1, %v7676_v53 }
 0x27c   : > { %5778 = vmatmul.msk.f32.gmra.mxu0 %vm331_vm1, %v5712_v27 }
 0x27d   : > { %v1548_v29 = vpop.f32.mrf.mxu2 }
 0x27e   : > { %v1654_v51 = vadd.f32 %v1548_v29, %v1079_v33  ;;  %v2085_v2 = vpop.f32.mrf.mxu3  ;;  %v1081_v15 = vpop.f32.mrf.mxu1  ;;  %v1202_v29 = vld [vmem:[%s6648_s6 + $0x262] sm:$0xff] }
 0x27f   : > { %v1082_v28 = vadd.f32 %v1081_v15, %v8675_v3  ;;  %v8677_v15 = vld [vmem:[#allocation31_spill] sm:$0xff] }
 0x280   : > { %v2191_v61 = vadd.f32 %v2085_v2, %v1654_v51 }
 0x281   : > { %v2622_v22 = vpop.f32.mrf.mxu0  ;;  %5451 = vmatmul.msk.f32.gmra.mxu1 %vm331_vm1, %v7634_v21  ;;  %v5714_v21 = vld [vmem:[%s6648_s6 + $0x289] sm:$0xff] }
 0x282   : > { %v7691_v13 = vadd.f32 %v2619_v18, %v2191_v61  ;;  %5517 = vmatmul.msk.f32.gmra.mxu2 %vm331_vm1, %v1201_v24  ;;  %v5584_v18 = vld [vmem:[%s6648_s6 + $0x288] sm:$0xff] }
 0x283   : > { %5649 = vmatmul.msk.f32.gmra.mxu3 %vm331_vm1, %v5583_v35 }
 0x284   : > { %8674 = vst [vmem:[#allocation11_spill] sm:$0xff] %v7691_v13  ;;  %5779 = vmatmul.msk.f32.gmra.mxu0 %vm331_vm1, %v5713_v50 }
 0x285   : > { %v1551_v0 = vpop.f32.mrf.mxu2 }
 0x286   : > { %v1655_v27 = vadd.f32 %v1551_v0, %v1082_v28  ;;  %v2088_v42 = vpop.f32.mrf.mxu3  ;;  %v1084_v33 = vpop.f32.mrf.mxu1  ;;  %v1203_v0 = vld [vmem:[%s6648_s6 + $0x26a] sm:$0xff] }
 0x287   : > { %v1085_v24 = vadd.f32 %v1084_v33, %v8677_v15  ;;  %v8679_v33 = vld [vmem:[#allocation33_spill] sm:$0xff] }
 0x288   : > { %v2192_v51 = vadd.f32 %v2088_v42, %v1655_v27 }
 0x289   : > { %v2625_v2 = vpop.f32.mrf.mxu0  ;;  %5452 = vmatmul.msk.f32.gmra.mxu1 %vm331_vm1, %v7648_v49  ;;  %v5715_v49 = vld [vmem:[%s6648_s6 + $0x291] sm:$0xff] }
 0x28a   : > { %v7702_v61 = vadd.f32 %v2622_v22, %v2192_v51  ;;  %5518 = vmatmul.msk.f32.gmra.mxu2 %vm331_vm1, %v1202_v29  ;;  %v5585_v22 = vld [vmem:[%s6648_s6 + $0x290] sm:$0xff] }
 0x28b   : > { %5650 = vmatmul.msk.f32.gmra.mxu3 %vm331_vm1, %v5584_v18 }
 0x28c   : > { %8676 = vst [vmem:[#allocation13_spill] sm:$0xff] %v7702_v61  ;;  %5780 = vmatmul.msk.f32.gmra.mxu0 %vm331_vm1, %v5714_v21 }
 0x28d   : > { %v1554_v35 = vpop.f32.mrf.mxu2 }
 0x28e   : > { %v1656_v50 = vadd.f32 %v1554_v35, %v1085_v24  ;;  %v2091_v3 = vpop.f32.mrf.mxu3  ;;  %v1087_v28 = vpop.f32.mrf.mxu1  ;;  %v1204_v35 = vld [vmem:[%s6648_s6 + $0x272] sm:$0xff] }
 0x28f   : > { %v1088_v29 = vadd.f32 %v1087_v28, %v8679_v33  ;;  %v8681_v28 = vld [vmem:[#allocation35_spill] sm:$0xff] }
 0x290   : > { %v2193_v27 = vadd.f32 %v2091_v3, %v1656_v50  ;;  %v5586_v50 = vld [vmem:[%s6648_s6 + $0x298] sm:$0xff] }
 0x291   : > { %v2628_v42 = vpop.f32.mrf.mxu0  ;;  %5453 = vmatmul.msk.f32.gmra.mxu1 %vm331_vm1, %v7662_v57  ;;  %v5716_v57 = vld [vmem:[%s6648_s6 + $0x299] sm:$0xff] }
 0x292   : > { %v7713_v51 = vadd.f32 %v2625_v2, %v2193_v27  ;;  %5519 = vmatmul.msk.f32.gmra.mxu2 %vm331_vm1, %v1203_v0 }
 0x293   : > { %5651 = vmatmul.msk.f32.gmra.mxu3 %vm331_vm1, %v5585_v22 }
 0x294   : > { %8678 = vst [vmem:[#allocation15_spill] sm:$0xff] %v7713_v51  ;;  %5781 = vmatmul.msk.f32.gmra.mxu0 %vm331_vm1, %v5715_v49  ;;  %v5918_v51 = vld [vmem:[%s6648_s6 + $0x68] sm:$0xff] }
 0x295   : > { %v1557_v18 = vpop.f32.mrf.mxu2 }
 0x296   : > { %v1657_v21 = vadd.f32 %v1557_v18, %v1088_v29  ;;  %v2094_v15 = vpop.f32.mrf.mxu3  ;;  %v1090_v24 = vpop.f32.mrf.mxu1  ;;  %v5783_v18 = vld [vmem:[%s6648_s6 + $0x2a] sm:$0xff] }
 0x297   : > { %v1091_v27 = vadd.f32 %v1090_v24, %v8681_v28  ;;  %v8683_v24 = vld [vmem:[#allocation8_spill] sm:$0xff] }
 0x298   : > { %v2194_v2 = vadd.f32 %v2094_v15, %v1657_v21  ;;  %v5915_v21 = vld [vmem:[%s6648_s6 + $0x50] sm:$0xff] }
 0x299   : > { %v2631_v3 = vpop.f32.mrf.mxu0  ;;  %5454 = vmatmul.msk.f32.gmra.mxu1 %vm331_vm1, %v7676_v53  ;;  %v6045_v15 = vld [vmem:[%s6648_s6 + $0x51] sm:$0xff] }
 0x29a   : > { %v7724_v0 = vadd.f32 %v2628_v42, %v2194_v2  ;;  %5520 = vmatmul.msk.f32.gmra.mxu2 %vm331_vm1, %v1204_v35  ;;  %v7736_v2 = vld [vmem:[%s6648_s6 + $0x52] sm:$0xff] }
 0x29b   : > { %5652 = vmatmul.msk.f32.gmra.mxu3 %vm331_vm1, %v5586_v50 }
 0x29c   : > { %8680 = vst [vmem:[#allocation17_spill] sm:$0xff] %v7724_v0  ;;  %5782 = vmatmul.msk.f32.gmra.mxu0 %vm331_vm1, %v5716_v57  ;;  %v5917_v0 = vld [vmem:[%s6648_s6 + $0x60] sm:$0xff] }
 0x29d   : > { %v1560_v22 = vpop.f32.mrf.mxu2 }
 0x29e   : > { %v1658_v49 = vadd.f32 %v1560_v22, %v1091_v27  ;;  %v2097_v33 = vpop.f32.mrf.mxu3  ;;  %v1093_v29 = vpop.f32.mrf.mxu1 }
 0x29f   : > { %v1094_v50 = vadd.f32 %v1093_v29, %v8683_v24  ;;  %v8685_v29 = vld [vmem:[#allocation9_spill] sm:$0xff] }
 0x2a0   : > { %v2195_v42 = vadd.f32 %v2097_v33, %v1658_v49  ;;  %v5784_v49 = vld [vmem:[%s6648_s6 + $0x32] sm:$0xff] }
 0x2a1   : > { %v2634_v53 = vpop.f32.mrf.mxu0  ;;  %5849 = vmatmul.msk.f32.vlgmr.msra.gmra.mxu1 %vm331_vm1, %v5783_v18  ;;  %v5916_v33 = vld [vmem:[%s6648_s6 + $0x58] sm:$0xff] }
 0x2a2   : > { %v7738_v35 = vadd.f32 %v2631_v3, %v2195_v42  ;;  %5981 = vmatmul.msk.f32.vlgmr.msra.gmra.mxu2 %vm331_vm1, %v5915_v21  ;;  %v6046_v42 = vld [vmem:[%s6648_s6 + $0x59] sm:$0xff] }
 0x2a3   : > { %6111 = vmatmul.msk.f32.vlgmr.msra.gmra.mxu3 %vm331_vm1, %v6045_v15  ;;  %v7750_v21 = vld [vmem:[%s6648_s6 + $0x5a] sm:$0xff] }
 0x2a4   : > { %8682 = vst [vmem:[#allocation19_spill] sm:$0xff] %v7738_v35  ;;  %6241 = vmatmul.msk.f32.vlgmr.msra.gmra.mxu0 %vm331_vm1, %v7736_v2  ;;  %v5785_v35 = vld [vmem:[%s6648_s6 + $0x3a] sm:$0xff] }
 0x2a5   : > { %v1563_v57 = vpop.f32.mrf.mxu2 }
 0x2a6   : > { %v1659_v28 = vadd.f32 %v1563_v57, %v1094_v50  ;;  %v2100_v27 = vpop.f32.mrf.mxu3  ;;  %v1096_v22 = vpop.f32.mrf.mxu1 }
 0x2a7   : > { %v1097_v24 = vadd.f32 %v1096_v22, %v8685_v29  ;;  %v8687_v22 = vld [vmem:[#allocation10_spill] sm:$0xff] }
 0x2a8   : > { %v2196_v3 = vadd.f32 %v2100_v27, %v1659_v28 }
 0x2a9   : > { %v2637_v18 = vpop.f32.mrf.mxu0  ;;  %5850 = vmatmul.msk.f32.gmra.mxu1 %vm331_vm1, %v5784_v49 }
 0x2aa   : > { %v7752_v15 = vadd.f32 %v2634_v53, %v2196_v3  ;;  %5982 = vmatmul.msk.f32.gmra.mxu2 %vm331_vm1, %v5916_v33  ;;  %v6047_v3 = vld [vmem:[%s6648_s6 + $0x61] sm:$0xff] }
 0x2ab   : > { %6112 = vmatmul.msk.f32.gmra.mxu3 %vm331_vm1, %v6046_v42  ;;  %v7764_v33 = vld [vmem:[%s6648_s6 + $0x62] sm:$0xff] }
 0x2ac   : > { %8684 = vst [vmem:[#allocation21_spill] sm:$0xff] %v7752_v15  ;;  %6242 = vmatmul.msk.f32.gmra.mxu0 %vm331_vm1, %v7750_v21  ;;  %v5786_v15 = vld [vmem:[%s6648_s6 + $0x42] sm:$0xff] }
 0x2ad   : > { %v1566_v50 = vpop.f32.mrf.mxu2 }
 0x2ae   : > { %v1660_v57 = vadd.f32 %v1566_v50, %v1097_v24  ;;  %v2103_v28 = vpop.f32.mrf.mxu3  ;;  %v1099_v27 = vpop.f32.mrf.mxu1 }
 0x2af   : > { %v1100_v29 = vadd.f32 %v1099_v27, %v8687_v22  ;;  %v8689_v27 = vld [vmem:[#allocation12_spill] sm:$0xff] }
 0x2b0   : > { %v2197_v53 = vadd.f32 %v2103_v28, %v1660_v57 }
 0x2b1   : > { %v2640_v49 = vpop.f32.mrf.mxu0  ;;  %5851 = vmatmul.msk.f32.gmra.mxu1 %vm331_vm1, %v5785_v35 }
 0x2b2   : > { %v7766_v42 = vadd.f32 %v2637_v18, %v2197_v53  ;;  %5983 = vmatmul.msk.f32.gmra.mxu2 %vm331_vm1, %v5917_v0  ;;  %v6048_v53 = vld [vmem:[%s6648_s6 + $0x69] sm:$0xff] }
 0x2b3   : > { %6113 = vmatmul.msk.f32.gmra.mxu3 %vm331_vm1, %v6047_v3  ;;  %v6178_v0 = vld [vmem:[%s6648_s6 + $0x6a] sm:$0xff] }
 0x2b4   : > { %8686 = vst [vmem:[#allocation23_spill] sm:$0xff] %v7766_v42  ;;  %6243 = vmatmul.msk.f32.gmra.mxu0 %vm331_vm1, %v7764_v33 }
 0x2b5   : > { %v1569_v24 = vpop.f32.mrf.mxu2 }
 0x2b6   : > { %v1661_v50 = vadd.f32 %v1569_v24, %v1100_v29  ;;  %v2106_v57 = vpop.f32.mrf.mxu3  ;;  %v1102_v28 = vpop.f32.mrf.mxu1 }
 0x2b7   : > { %v1103_v3 = vadd.f32 %v1102_v28, %v8689_v27 }
 0x2b8   : > { %v2198_v18 = vadd.f32 %v2106_v57, %v1661_v50  ;;  %v5919_v57 = vld [vmem:[%s6648_s6 + $0x78] sm:$0xff] }
 0x2b9   : > { %v2643_v35 = vpop.f32.mrf.mxu0  ;;  %5852 = vmatmul.msk.f32.gmra.mxu1 %vm331_vm1, %v5786_v15  ;;  %v6179_v15 = vld [vmem:[%s6648_s6 + $0x7a] sm:$0xff] }
 0x2ba   : > { %v7778_v42 = vadd.f32 %v2640_v49, %v2198_v18  ;;  %5984 = vmatmul.msk.f32.gmra.mxu2 %vm331_vm1, %v5918_v51  ;;  %v6049_v49 = vld [vmem:[%s6648_s6 + $0x79] sm:$0xff] }
 0x2bb   : > { %6114 = vmatmul.msk.f32.gmra.mxu3 %vm331_vm1, %v6048_v53  ;;  %v8691_v51 = vld [vmem:[#allocation14_spill] sm:$0xff] }
 0x2bc   : > { %8688 = vst [vmem:[#allocation25_spill] sm:$0xff] %v7778_v42  ;;  %6244 = vmatmul.msk.f32.gmra.mxu0 %vm331_vm1, %v6178_v0 }
 0x2bd   : > { %v1572_v22 = vpop.f32.mrf.mxu2 }
 0x2be   : > { %v1662_v29 = vadd.f32 %v1572_v22, %v1103_v3  ;;  %v2109_v24 = vpop.f32.mrf.mxu3  ;;  %v1105_v50 = vpop.f32.mrf.mxu1 }
 0x2bf   : > { %v1106_v28 = vadd.f32 %v1105_v50, %v8691_v51  ;;  %v8693_v50 = vld [vmem:[#allocation16_spill] sm:$0xff] }
 0x2c0   : > { %v2199_v61 = vadd.f32 %v2109_v24, %v1662_v29  ;;  %v5920_v29 = vld [vmem:[%s6648_s6 + $0x80] sm:$0xff] }
 0x2c1   : > { %v2646_v18 = vpop.f32.mrf.mxu0  ;;  %5853 = vmatmul.msk.f32.gmra.mxu1 %vm331_vm1, %v7736_v2  ;;  %v6180_v2 = vld [vmem:[%s6648_s6 + $0x82] sm:$0xff] }
 0x2c2   : > { %v7788_v42 = vadd.f32 %v2643_v35, %v2199_v61  ;;  %5985 = vmatmul.msk.f32.gmra.mxu2 %vm331_vm1, %v5919_v57  ;;  %v6050_v61 = vld [vmem:[%s6648_s6 + $0x81] sm:$0xff] }
 0x2c3   : > { %6115 = vmatmul.msk.f32.gmra.mxu3 %vm331_vm1, %v6049_v49 }
 0x2c4   : > { %8690 = vst [vmem:[#allocation27_spill] sm:$0xff] %v7788_v42  ;;  %6245 = vmatmul.msk.f32.gmra.mxu0 %vm331_vm1, %v6179_v15 }
 0x2c5   : > { %v1575_v53 = vpop.f32.mrf.mxu2 }
 0x2c6   : > { %v1663_v27 = vadd.f32 %v1575_v53, %v1106_v28  ;;  %v2112_v3 = vpop.f32.mrf.mxu3  ;;  %v1108_v22 = vpop.f32.mrf.mxu1 }
 0x2c7   : > { %v1109_v57 = vadd.f32 %v1108_v22, %v8693_v50  ;;  %v8695_v22 = vld [vmem:[#allocation18_spill] sm:$0xff] }
 0x2c8   : > { %v2200_v24 = vadd.f32 %v2112_v3, %v1663_v27  ;;  %v5921_v27 = vld [vmem:[%s6648_s6 + $0x88] sm:$0xff] }
 0x2c9   : > { %v2649_v35 = vpop.f32.mrf.mxu0  ;;  %5854 = vmatmul.msk.f32.gmra.mxu1 %vm331_vm1, %v7750_v21  ;;  %v6181_v21 = vld [vmem:[%s6648_s6 + $0x8a] sm:$0xff] }
 0x2ca   : > { %v7799_v42 = vadd.f32 %v2646_v18, %v2200_v24  ;;  %5986 = vmatmul.msk.f32.gmra.mxu2 %vm331_vm1, %v5920_v29  ;;  %v6051_v18 = vld [vmem:[%s6648_s6 + $0x89] sm:$0xff] }
 0x2cb   : > { %6116 = vmatmul.msk.f32.gmra.mxu3 %vm331_vm1, %v6050_v61 }
 0x2cc   : > { %8692 = vst [vmem:[#allocation29_spill] sm:$0xff] %v7799_v42  ;;  %6246 = vmatmul.msk.f32.gmra.mxu0 %vm331_vm1, %v6180_v2 }
 0x2cd   : > { %v1578_v49 = vpop.f32.mrf.mxu2 }
 0x2ce   : > { %v1664_v51 = vadd.f32 %v1578_v49, %v1109_v57  ;;  %v2115_v28 = vpop.f32.mrf.mxu3  ;;  %v1111_v53 = vpop.f32.mrf.mxu1 }
 0x2cf   : > { %v1112_v29 = vadd.f32 %v1111_v53, %v8695_v22  ;;  %v8697_v53 = vld [vmem:[#allocation20_spill] sm:$0xff] }
 0x2d0   : > { %v2201_v3 = vadd.f32 %v2115_v28, %v1664_v51  ;;  %v5922_v51 = vld [vmem:[%s6648_s6 + $0x90] sm:$0xff] }
 0x2d1   : > { %v2652_v24 = vpop.f32.mrf.mxu0  ;;  %5855 = vmatmul.msk.f32.gmra.mxu1 %vm331_vm1, %v7764_v33  ;;  %v6182_v33 = vld [vmem:[%s6648_s6 + $0x92] sm:$0xff] }
 0x2d2   : > { %v7810_v42 = vadd.f32 %v2649_v35, %v2201_v3  ;;  %5987 = vmatmul.msk.f32.gmra.mxu2 %vm331_vm1, %v5921_v27  ;;  %v6052_v35 = vld [vmem:[%s6648_s6 + $0x91] sm:$0xff] }
 0x2d3   : > { %6117 = vmatmul.msk.f32.gmra.mxu3 %vm331_vm1, %v6051_v18 }
 0x2d4   : > { %8694 = vst [vmem:[#allocation31_spill] sm:$0xff] %v7810_v42  ;;  %6247 = vmatmul.msk.f32.gmra.mxu0 %vm331_vm1, %v6181_v21 }
 0x2d5   : > { %v1581_v61 = vpop.f32.mrf.mxu2 }
 0x2d6   : > { %v1665_v50 = vadd.f32 %v1581_v61, %v1112_v29  ;;  %v2118_v57 = vpop.f32.mrf.mxu3  ;;  %v1114_v49 = vpop.f32.mrf.mxu1 }
 0x2d7   : > { %v1115_v27 = vadd.f32 %v1114_v49, %v8697_v53  ;;  %v8699_v49 = vld [vmem:[#allocation22_spill] sm:$0xff] }
 0x2d8   : > { %v2202_v28 = vadd.f32 %v2118_v57, %v1665_v50  ;;  %v5923_v50 = vld [vmem:[%s6648_s6 + $0xa0] sm:$0xff] }
 0x2d9   : > { %v2655_v3 = vpop.f32.mrf.mxu0  ;;  %5856 = vmatmul.msk.f32.gmra.mxu1 %vm331_vm1, %v6178_v0  ;;  %v6183_v0 = vld [vmem:[%s6648_s6 + $0xa2] sm:$0xff] }
 0x2da   : > { %v7821_v42 = vadd.f32 %v2652_v24, %v2202_v28  ;;  %5988 = vmatmul.msk.f32.gmra.mxu2 %vm331_vm1, %v5922_v51  ;;  %v6053_v24 = vld [vmem:[%s6648_s6 + $0xa1] sm:$0xff] }
 0x2db   : > { %6118 = vmatmul.msk.f32.gmra.mxu3 %vm331_vm1, %v6052_v35 }
 0x2dc   : > { %8696 = vst [vmem:[#allocation33_spill] sm:$0xff] %v7821_v42  ;;  %6248 = vmatmul.msk.f32.gmra.mxu0 %vm331_vm1, %v6182_v33 }
 0x2dd   : > { %v1584_v18 = vpop.f32.mrf.mxu2 }
 0x2de   : > { %v1666_v22 = vadd.f32 %v1584_v18, %v1115_v27  ;;  %v2121_v29 = vpop.f32.mrf.mxu3  ;;  %v1117_v61 = vpop.f32.mrf.mxu1 }
 0x2df   : > { %v1118_v51 = vadd.f32 %v1117_v61, %v8699_v49  ;;  %v8701_v61 = vld [vmem:[#allocation24_spill] sm:$0xff] }
 0x2e0   : > { %v2203_v57 = vadd.f32 %v2121_v29, %v1666_v22  ;;  %v5924_v22 = vld [vmem:[%s6648_s6 + $0xa8] sm:$0xff] }
 0x2e1   : > { %v2658_v28 = vpop.f32.mrf.mxu0  ;;  %5857 = vmatmul.msk.f32.gmra.mxu1 %vm331_vm1, %v6179_v15  ;;  %v6184_v15 = vld [vmem:[%s6648_s6 + $0xaa] sm:$0xff] }
 0x2e2   : > { %v7831_v42 = vadd.f32 %v2655_v3, %v2203_v57  ;;  %5989 = vmatmul.msk.f32.gmra.mxu2 %vm331_vm1, %v5923_v50  ;;  %v6054_v3 = vld [vmem:[%s6648_s6 + $0xa9] sm:$0xff] }
 0x2e3   : > { %6119 = vmatmul.msk.f32.gmra.mxu3 %vm331_vm1, %v6053_v24 }
 0x2e4   : > { %8698 = vst [vmem:[#allocation35_spill] sm:$0xff] %v7831_v42  ;;  %6249 = vmatmul.msk.f32.gmra.mxu0 %vm331_vm1, %v6183_v0 }
 0x2e5   : > { %v1587_v35 = vpop.f32.mrf.mxu2 }
 0x2e6   : > { %v1667_v53 = vadd.f32 %v1587_v35, %v1118_v51  ;;  %v2124_v27 = vpop.f32.mrf.mxu3  ;;  %v1120_v18 = vpop.f32.mrf.mxu1 }
 0x2e7   : > { %v1121_v50 = vadd.f32 %v1120_v18, %v8701_v61  ;;  %v8703_v18 = vld [vmem:[#allocation26_spill] sm:$0xff] }
 0x2e8   : > { %v2204_v29 = vadd.f32 %v2124_v27, %v1667_v53  ;;  %v5925_v53 = vld [vmem:[%s6648_s6 + $0xb0] sm:$0xff] }
 0x2e9   : > { %v2661_v57 = vpop.f32.mrf.mxu0  ;;  %5858 = vmatmul.msk.f32.gmra.mxu1 %vm331_vm1, %v6180_v2  ;;  %v6185_v2 = vld [vmem:[%s6648_s6 + $0xb2] sm:$0xff] }
 0x2ea   : > { %v7841_v42 = vadd.f32 %v2658_v28, %v2204_v29  ;;  %5990 = vmatmul.msk.f32.gmra.mxu2 %vm331_vm1, %v5924_v22  ;;  %v6055_v28 = vld [vmem:[%s6648_s6 + $0xb1] sm:$0xff] }
 0x2eb   : > { %6120 = vmatmul.msk.f32.gmra.mxu3 %vm331_vm1, %v6054_v3 }
 0x2ec   : > { %8700 = vst [vmem:[#allocation8_spill] sm:$0xff] %v7841_v42  ;;  %6250 = vmatmul.msk.f32.gmra.mxu0 %vm331_vm1, %v6184_v15 }
 0x2ed   : > { %v1590_v24 = vpop.f32.mrf.mxu2 }
 0x2ee   : > { %v1668_v49 = vadd.f32 %v1590_v24, %v1121_v50  ;;  %v2127_v51 = vpop.f32.mrf.mxu3  ;;  %v1123_v35 = vpop.f32.mrf.mxu1 }
 0x2ef   : > { %v1124_v22 = vadd.f32 %v1123_v35, %v8703_v18  ;;  %v8705_v35 = vld [vmem:[#allocation28_spill] sm:$0xff] }
 0x2f0   : > { %v2205_v27 = vadd.f32 %v2127_v51, %v1668_v49  ;;  %v5926_v49 = vld [vmem:[%s6648_s6 + $0xb8] sm:$0xff] }
 0x2f1   : > { %v2664_v29 = vpop.f32.mrf.mxu0  ;;  %5859 = vmatmul.msk.f32.gmra.mxu1 %vm331_vm1, %v6181_v21  ;;  %v6186_v21 = vld [vmem:[%s6648_s6 + $0xba] sm:$0xff] }
 0x2f2   : > { %v7851_v42 = vadd.f32 %v2661_v57, %v2205_v27  ;;  %5991 = vmatmul.msk.f32.gmra.mxu2 %vm331_vm1, %v5925_v53  ;;  %v6056_v57 = vld [vmem:[%s6648_s6 + $0xb9] sm:$0xff] }
 0x2f3   : > { %6121 = vmatmul.msk.f32.gmra.mxu3 %vm331_vm1, %v6055_v28 }
 0x2f4   : > { %8702 = vst [vmem:[#allocation9_spill] sm:$0xff] %v7851_v42  ;;  %6251 = vmatmul.msk.f32.gmra.mxu0 %vm331_vm1, %v6185_v2 }
 0x2f5   : > { %v1593_v3 = vpop.f32.mrf.mxu2 }
 0x2f6   : > { %v1669_v61 = vadd.f32 %v1593_v3, %v1124_v22  ;;  %v2130_v50 = vpop.f32.mrf.mxu3  ;;  %v1126_v24 = vpop.f32.mrf.mxu1 }
 0x2f7   : > { %v1127_v53 = vadd.f32 %v1126_v24, %v8705_v35  ;;  %v8707_v24 = vld [vmem:[#allocation30_spill] sm:$0xff] }
 0x2f8   : > { %v2206_v51 = vadd.f32 %v2130_v50, %v1669_v61  ;;  %v5927_v61 = vld [vmem:[%s6648_s6 + $0xc8] sm:$0xff] }
 0x2f9   : > { %v2667_v27 = vpop.f32.mrf.mxu0  ;;  %5860 = vmatmul.msk.f32.gmra.mxu1 %vm331_vm1, %v6182_v33  ;;  %v6187_v33 = vld [vmem:[%s6648_s6 + $0xca] sm:$0xff] }
 0x2fa   : > { %v7861_v42 = vadd.f32 %v2664_v29, %v2206_v51  ;;  %5992 = vmatmul.msk.f32.gmra.mxu2 %vm331_vm1, %v5926_v49  ;;  %v6057_v29 = vld [vmem:[%s6648_s6 + $0xc9] sm:$0xff] }
 0x2fb   : > { %6122 = vmatmul.msk.f32.gmra.mxu3 %vm331_vm1, %v6056_v57 }
 0x2fc   : > { %8704 = vst [vmem:[#allocation10_spill] sm:$0xff] %v7861_v42  ;;  %6252 = vmatmul.msk.f32.gmra.mxu0 %vm331_vm1, %v6186_v21 }
 0x2fd   : > { %v1596_v28 = vpop.f32.mrf.mxu2 }
 0x2fe   : > { %v1670_v18 = vadd.f32 %v1596_v28, %v1127_v53  ;;  %v2133_v22 = vpop.f32.mrf.mxu3  ;;  %v1129_v3 = vpop.f32.mrf.mxu1 }
 0x2ff   : > { %v1130_v49 = vadd.f32 %v1129_v3, %v8707_v24  ;;  %v8709_v3 = vld [vmem:[#allocation32_spill] sm:$0xff] }
 0x300   : > { %v2207_v50 = vadd.f32 %v2133_v22, %v1670_v18  ;;  %v5928_v18 = vld [vmem:[%s6648_s6 + $0xd0] sm:$0xff] }
 0x301   : > { %v2670_v51 = vpop.f32.mrf.mxu0  ;;  %5861 = vmatmul.msk.f32.gmra.mxu1 %vm331_vm1, %v6183_v0  ;;  %v7881_v0 = vld [vmem:[%s6648_s6 + $0xd2] sm:$0xff] }
 0x302   : > { %v7871_v42 = vadd.f32 %v2667_v27, %v2207_v50  ;;  %5993 = vmatmul.msk.f32.gmra.mxu2 %vm331_vm1, %v5927_v61  ;;  %v6058_v27 = vld [vmem:[%s6648_s6 + $0xd1] sm:$0xff] }
 0x303   : > { %6123 = vmatmul.msk.f32.gmra.mxu3 %vm331_vm1, %v6057_v29 }
 0x304   : > { %8706 = vst [vmem:[#allocation12_spill] sm:$0xff] %v7871_v42  ;;  %6253 = vmatmul.msk.f32.gmra.mxu0 %vm331_vm1, %v6187_v33 }
 0x305   : > { %v1599_v57 = vpop.f32.mrf.mxu2 }
 0x306   : > { %v1671_v35 = vadd.f32 %v1599_v57, %v1130_v49  ;;  %v2136_v53 = vpop.f32.mrf.mxu3  ;;  %v1132_v28 = vpop.f32.mrf.mxu1 }
 0x307   : > { %v1133_v29 = vadd.f32 %v1132_v28, %v8709_v3  ;;  %v8711_v28 = vld [vmem:[#allocation34_spill] sm:$0xff] }
 0x308   : > { %v2208_v22 = vadd.f32 %v2136_v53, %v1671_v35  ;;  %v5929_v53 = vld [vmem:[%s6648_s6 + $0xd8] sm:$0xff] }
 0x309   : > { %v2673_v50 = vpop.f32.mrf.mxu0  ;;  %5862 = vmatmul.msk.f32.gmra.mxu1 %vm331_vm1, %v6184_v15  ;;  %v7894_v15 = vld [vmem:[%s6648_s6 + $0xda] sm:$0xff] }
 0x30a   : > { %v7883_v61 = vadd.f32 %v2670_v51, %v2208_v22  ;;  %5994 = vmatmul.msk.f32.gmra.mxu2 %vm331_vm1, %v5928_v18  ;;  %v6059_v51 = vld [vmem:[%s6648_s6 + $0xd9] sm:$0xff] }
 0x30b   : > { %6124 = vmatmul.msk.f32.gmra.mxu3 %vm331_vm1, %v6058_v27 }
 0x30c   : > { %8708 = vst [vmem:[#allocation14_spill] sm:$0xff] %v7883_v61  ;;  %6254 = vmatmul.msk.f32.gmra.mxu0 %vm331_vm1, %v7881_v0 }
 0x30d   : > { %v1602_v24 = vpop.f32.mrf.mxu2 }
 0x30e   : > { %v1672_v49 = vadd.f32 %v1602_v24, %v1133_v29  ;;  %v2139_v57 = vpop.f32.mrf.mxu3  ;;  %v1135_v35 = vpop.f32.mrf.mxu1 }
 0x30f   : > { %v1136_v27 = vadd.f32 %v1135_v35, %v8711_v28  ;;  %v8713_v35 = vld [vmem:[#allocation36_spill] sm:$0xff] }
 0x310   : > { %v2209_v42 = vadd.f32 %v2139_v57, %v1672_v49  ;;  %v5930_v57 = vld [vmem:[%s6648_s6 + $0xe0] sm:$0xff] }
 0x311   : > { %v2676_v22 = vpop.f32.mrf.mxu0  ;;  %5863 = vmatmul.msk.f32.gmra.mxu1 %vm331_vm1, %v6185_v2  ;;  %v7907_v2 = vld [vmem:[%s6648_s6 + $0xe2] sm:$0xff] }
 0x312   : > { %v7896_v18 = vadd.f32 %v2673_v50, %v2209_v42  ;;  %5995 = vmatmul.msk.f32.gmra.mxu2 %vm331_vm1, %v5929_v53  ;;  %v6060_v42 = vld [vmem:[%s6648_s6 + $0xe1] sm:$0xff] }
 0x313   : > { %6125 = vmatmul.msk.f32.gmra.mxu3 %vm331_vm1, %v6059_v51 }
 0x314   : > { %8710 = vst [vmem:[#allocation16_spill] sm:$0xff] %v7896_v18  ;;  %6255 = vmatmul.msk.f32.gmra.mxu0 %vm331_vm1, %v7894_v15 }
 0x315   : > { %v1605_v3 = vpop.f32.mrf.mxu2 }
 0x316   : > { %v1673_v29 = vadd.f32 %v1605_v3, %v1136_v27  ;;  %v2142_v24 = vpop.f32.mrf.mxu3  ;;  %v1138_v49 = vpop.f32.mrf.mxu1 }
 0x317   : > { %v1139_v51 = vadd.f32 %v1138_v49, %v8713_v35 }
 0x318   : > { %v2210_v61 = vadd.f32 %v2142_v24, %v1673_v29  ;;  %v5931_v24 = vld [vmem:[%s6648_s6 + $0xf0] sm:$0xff] }
 0x319   : > { %v2679_v50 = vpop.f32.mrf.mxu0  ;;  %5864 = vmatmul.msk.f32.gmra.mxu1 %vm331_vm1, %v6186_v21  ;;  %v7920_v21 = vld [vmem:[%s6648_s6 + $0xf2] sm:$0xff] }
 0x31a   : > { %v7909_v53 = vadd.f32 %v2676_v22, %v2210_v61  ;;  %5996 = vmatmul.msk.f32.gmra.mxu2 %vm331_vm1, %v5930_v57  ;;  %v6061_v61 = vld [vmem:[%s6648_s6 + $0xf1] sm:$0xff] }
 0x31b   : > { %6126 = vmatmul.msk.f32.gmra.mxu3 %vm331_vm1, %v6060_v42 }
 0x31c   : > { %8712 = vst [vmem:[#allocation18_spill] sm:$0xff] %v7909_v53  ;;  %6256 = vmatmul.msk.f32.gmra.mxu0 %vm331_vm1, %v7907_v2  ;;  %v7965_v53 = vld [vmem:[%s6648_s6 + $0x10a] sm:$0xff] }
 0x31d   : > { %v1608_v28 = vpop.f32.mrf.mxu2 }
 0x31e   : > { %v1674_v27 = vadd.f32 %v1608_v28, %v1139_v51  ;;  %v2145_v3 = vpop.f32.mrf.mxu3  ;;  %v3024_v29 = vpop.f32.mrf.mxu1 }
 0x31f   : > { %v3216_v49 = vadd.f32 %v3024_v29, %v7132_v30 }
 0x320   : > { %v2211_v18 = vadd.f32 %v2145_v3, %v1674_v27  ;;  %v7937_v3 = vld [vmem:[%s6648_s6 + $0xfa] sm:$0xff] }
 0x321   : > { %v4629_v22 = vpop.f32.mrf.mxu0  ;;  %5865 = vmatmul.msk.f32.gmra.mxu1 %vm331_vm1, %v6187_v33  ;;  %v6062_v33 = vld [vmem:[%s6648_s6 + $0xf9] sm:$0xff] }
 0x322   : > { %v7922_v57 = vadd.f32 %v2679_v50, %v2211_v18  ;;  %5997 = vmatmul.msk.f32.gmra.mxu2 %vm331_vm1, %v5931_v24  ;;  %v5932_v50 = vld [vmem:[%s6648_s6 + $0xf8] sm:$0xff] }
 0x323   : > { %6127 = vmatmul.msk.f32.gmra.mxu3 %vm331_vm1, %v6061_v61 }
 0x324   : > { %8714 = vst [vmem:[#allocation20_spill] sm:$0xff] %v7922_v57  ;;  %6257 = vmatmul.msk.f32.gmra.mxu0 %vm331_vm1, %v7920_v21  ;;  %v6064_v57 = vld [vmem:[%s6648_s6 + $0x109] sm:$0xff] }
 0x325   : > { %v3561_v42 = vpop.f32.mrf.mxu2 }
 0x326   : > { %v3753_v35 = vadd.f32 %v3561_v42, %v3216_v49  ;;  %v4095_v51 = vpop.f32.mrf.mxu3  ;;  %v3027_v18 = vpop.f32.mrf.mxu1  ;;  %v5933_v42 = vld [vmem:[%s6648_s6 + $0x100] sm:$0xff] }
 0x327   : > { %v3217_v30 = vadd.f32 %v3027_v18, %v7142_v4 }
 0x328   : > { %v4287_v28 = vadd.f32 %v4095_v51, %v3753_v35  ;;  %v6063_v35 = vld [vmem:[%s6648_s6 + $0x101] sm:$0xff] }
 0x329   : > { %v4632_v27 = vpop.f32.mrf.mxu0  ;;  %5866 = vmatmul.msk.f32.gmra.mxu1 %vm331_vm1, %v7881_v0 }
 0x32a   : > { %v4821_v24 = vadd.f32 %v4629_v22, %v4287_v28  ;;  %5998 = vmatmul.msk.f32.gmra.mxu2 %vm331_vm1, %v5932_v50  ;;  %v7952_v50 = vld [vmem:[%s6648_s6 + $0x102] sm:$0xff] }
 0x32b   : > { %6128 = vmatmul.msk.f32.gmra.mxu3 %vm331_vm1, %v6062_v33 }
 0x32c   : > { %6258 = vmatmul.msk.f32.gmra.mxu0 %vm331_vm1, %v7937_v3  ;;  %4885 = vst [vmem:[%s7946_s29] sm:$0xff] %v4821_v24  ;;  %v5019_v4 = vmul.f32 %v4821_v24, %v4821_v24 }
 0x32d   : > { %v3564_v29 = vpop.f32.mrf.mxu2 }
 0x32e   : > { %v3754_v61 = vadd.f32 %v3564_v29, %v3217_v30  ;;  %v4098_v22 = vpop.f32.mrf.mxu3  ;;  %v3030_v49 = vpop.f32.mrf.mxu1 }
 0x32f   : > { %v3218_v18 = vadd.f32 %v3030_v49, %v7152_v10 }
 0x330   : > { %v4288_v0 = vadd.f32 %v4098_v22, %v3754_v61 }
 0x331   : > { %v4635_v51 = vpop.f32.mrf.mxu0  ;;  %5867 = vmatmul.msk.f32.gmra.mxu1 %vm331_vm1, %v7894_v15 }
 0x332   : > { %v4822_v28 = vadd.f32 %v4632_v27, %v4288_v0  ;;  %5999 = vmatmul.msk.f32.gmra.mxu2 %vm331_vm1, %v5933_v42  ;;  %v5934_v0 = vld [vmem:[%s6648_s6 + $0x108] sm:$0xff] }
 0x333   : > { %6129 = vmatmul.msk.f32.gmra.mxu3 %vm331_vm1, %v6063_v35 }
 0x334   : > { %6259 = vmatmul.msk.f32.gmra.mxu0 %vm331_vm1, %v7952_v50  ;;  %4886 = vst [vmem:[%s7946_s29 + $0x8] sm:$0xff] %v4822_v28  ;;  %v4949_v33 = vadd.f32 %v4822_v28, %v4821_v24  ;;  %v5020_v30 = vmul.f32 %v4822_v28, %v4822_v28 }
 0x335   : > { %v3567_v29 = vpop.f32.mrf.mxu2 }
 0x336   : > { %v5083_v27 = vadd.f32 %v5020_v30, %v5019_v4  ;;  %v3755_v61 = vadd.f32 %v3567_v29, %v3218_v18  ;;  %v4101_v15 = vpop.f32.mrf.mxu3  ;;  %v3033_v22 = vpop.f32.mrf.mxu1 }
 0x337   : > { %v3219_v10 = vadd.f32 %v3033_v22, %v7162_v5 }
 0x338   : > { %v4289_v42 = vadd.f32 %v4101_v15, %v3755_v61  ;;  %v6065_v61 = vld [vmem:[%s6648_s6 + $0x119] sm:$0xff] }
 0x339   : > { %v4638_v35 = vpop.f32.mrf.mxu0  ;;  %5868 = vmatmul.msk.f32.gmra.mxu1 %vm331_vm1, %v7907_v2  ;;  %v5935_v2 = vld [vmem:[%s6648_s6 + $0x118] sm:$0xff] }
 0x33a   : > { %v4823_v13 = vadd.f32 %v4635_v51, %v4289_v42  ;;  %6000 = vmatmul.msk.f32.gmra.mxu2 %vm331_vm1, %v5934_v0 }
 0x33b   : > { %6130 = vmatmul.msk.f32.gmra.mxu3 %vm331_vm1, %v6064_v57  ;;  %v7978_v57 = vld [vmem:[%s6648_s6 + $0x11a] sm:$0xff] }
 0x33c   : > { %6260 = vmatmul.msk.f32.gmra.mxu0 %vm331_vm1, %v7965_v53  ;;  %4887 = vst [vmem:[%s7946_s29 + $0x10] sm:$0xff] %v4823_v13  ;;  %v4950_v24 = vadd.f32 %v4949_v33, %v4823_v13  ;;  %v5021_v49 = vmul.f32 %v4823_v13, %v4823_v13 }
 0x33d   : > { %v3570_v28 = vpop.f32.mrf.mxu2 }
 0x33e   : > { %v5084_v51 = vadd.f32 %v5083_v27, %v5021_v49  ;;  %v3756_v4 = vadd.f32 %v3570_v28, %v3219_v10  ;;  %v4104_v18 = vpop.f32.mrf.mxu3  ;;  %v3036_v30 = vpop.f32.mrf.mxu1  ;;  %v6066_v28 = vld [vmem:[%s6648_s6 + $0x121] sm:$0xff] }
 0x33f   : > { %v3220_v5 = vadd.f32 %v3036_v30, %v7172_v9 }
 0x340   : > { %v4290_v29 = vadd.f32 %v4104_v18, %v3756_v4  ;;  %v7991_v18 = vld [vmem:[%s6648_s6 + $0x122] sm:$0xff] }
 0x341   : > { %v4641_v15 = vpop.f32.mrf.mxu0  ;;  %5869 = vmatmul.msk.f32.gmra.mxu1 %vm331_vm1, %v7920_v21  ;;  %v5936_v21 = vld [vmem:[%s6648_s6 + $0x120] sm:$0xff] }
 0x342   : > { %v4824_v0 = vadd.f32 %v4638_v35, %v4290_v29  ;;  %6001 = vmatmul.msk.f32.gmra.mxu2 %vm331_vm1, %v5935_v2 }
 0x343   : > { %6131 = vmatmul.msk.f32.gmra.mxu3 %vm331_vm1, %v6065_v61 }
 0x344   : > { %6261 = vmatmul.msk.f32.gmra.mxu0 %vm331_vm1, %v7978_v57  ;;  %4888 = vst [vmem:[%s7946_s29 + $0x18] sm:$0xff] %v4824_v0  ;;  %v4951_v13 = vadd.f32 %v4950_v24, %v4824_v0  ;;  %v5022_v33 = vmul.f32 %v4824_v0, %v4824_v0 }
 0x345   : > { %v3573_v27 = vpop.f32.mrf.mxu2 }
 0x346   : > { %v5085_v22 = vadd.f32 %v5084_v51, %v5022_v33  ;;  %v3757_v42 = vadd.f32 %v3573_v27, %v3220_v5  ;;  %v4107_v35 = vpop.f32.mrf.mxu3  ;;  %v3039_v10 = vpop.f32.mrf.mxu1  ;;  %v6067_v33 = vld [vmem:[%s6648_s6 + $0x129] sm:$0xff] }
 0x347   : > { %v3221_v9 = vadd.f32 %v3039_v10, %v7182_v36 }
 0x348   : > { %v4291_v49 = vadd.f32 %v4107_v35, %v3757_v42  ;;  %v8004_v42 = vld [vmem:[%s6648_s6 + $0x12a] sm:$0xff] }
 0x349   : > { %v4644_v4 = vpop.f32.mrf.mxu0  ;;  %5870 = vmatmul.msk.f32.gmra.mxu1 %vm331_vm1, %v7937_v3  ;;  %v5937_v3 = vld [vmem:[%s6648_s6 + $0x128] sm:$0xff] }
 0x34a   : > { %v4825_v2 = vadd.f32 %v4641_v15, %v4291_v49  ;;  %6002 = vmatmul.msk.f32.gmra.mxu2 %vm331_vm1, %v5936_v21 }
 0x34b   : > { %6132 = vmatmul.msk.f32.gmra.mxu3 %vm331_vm1, %v6066_v28 }
 0x34c   : > { %6262 = vmatmul.msk.f32.gmra.mxu0 %vm331_vm1, %v7991_v18  ;;  %4889 = vst [vmem:[%s7946_s29 + $0x20] sm:$0xff] %v4825_v2  ;;  %v4952_v24 = vadd.f32 %v4951_v13, %v4825_v2  ;;  %v5023_v51 = vmul.f32 %v4825_v2, %v4825_v2 }
 0x34d   : > { %v3576_v30 = vpop.f32.mrf.mxu2 }
 0x34e   : > { %v5086_v29 = vadd.f32 %v5085_v22, %v5023_v51  ;;  %v3758_v61 = vadd.f32 %v3576_v30, %v3221_v9  ;;  %v4110_v15 = vpop.f32.mrf.mxu3  ;;  %v3042_v0 = vpop.f32.mrf.mxu1  ;;  %v6068_v9 = vld [vmem:[%s6648_s6 + $0x131] sm:$0xff] }
 0x34f   : > { %v3222_v36 = vadd.f32 %v3042_v0, %v7192_v48  ;;  %v8017_v30 = vld [vmem:[%s6648_s6 + $0x132] sm:$0xff] }
 0x350   : > { %v4292_v5 = vadd.f32 %v4110_v15, %v3758_v61 }
 0x351   : > { %v4647_v27 = vpop.f32.mrf.mxu0  ;;  %5871 = vmatmul.msk.f32.gmra.mxu1 %vm331_vm1, %v7952_v50  ;;  %v5938_v50 = vld [vmem:[%s6648_s6 + $0x130] sm:$0xff] }
 0x352   : > { %v4826_v35 = vadd.f32 %v4644_v4, %v4292_v5  ;;  %6003 = vmatmul.msk.f32.gmra.mxu2 %vm331_vm1, %v5937_v3 }
 0x353   : > { %6133 = vmatmul.msk.f32.gmra.mxu3 %vm331_vm1, %v6067_v33 }
 0x354   : > { %6263 = vmatmul.msk.f32.gmra.mxu0 %vm331_vm1, %v8004_v42  ;;  %4890 = vst [vmem:[%s7946_s29 + $0x28] sm:$0xff] %v4826_v35  ;;  %v4953_v13 = vadd.f32 %v4952_v24, %v4826_v35  ;;  %v5024_v22 = vmul.f32 %v4826_v35, %v4826_v35  ;;  %v6069_v35 = vld [vmem:[%s6648_s6 + $0x141] sm:$0xff] }
 0x355   : > { %v3579_v10 = vpop.f32.mrf.mxu2 }
 0x356   : > { %v5087_v21 = vadd.f32 %v5086_v29, %v5024_v22  ;;  %v3759_v49 = vadd.f32 %v3579_v10, %v3222_v36  ;;  %v4113_v28 = vpop.f32.mrf.mxu3  ;;  %v3045_v4 = vpop.f32.mrf.mxu1  ;;  %v8030_v22 = vld [vmem:[%s6648_s6 + $0x142] sm:$0xff] }
 0x357   : > { %v3223_v48 = vadd.f32 %v3045_v4, %v7202_v16 }
 0x358   : > { %v4293_v2 = vadd.f32 %v4113_v28, %v3759_v49 }
 0x359   : > { %v4650_v51 = vpop.f32.mrf.mxu0  ;;  %5872 = vmatmul.msk.f32.gmra.mxu1 %vm331_vm1, %v7965_v53  ;;  %v5939_v53 = vld [vmem:[%s6648_s6 + $0x140] sm:$0xff] }
 0x35a   : > { %v4827_v61 = vadd.f32 %v4647_v27, %v4293_v2  ;;  %6004 = vmatmul.msk.f32.gmra.mxu2 %vm331_vm1, %v5938_v50 }
 0x35b   : > { %6134 = vmatmul.msk.f32.gmra.mxu3 %vm331_vm1, %v6068_v9 }
 0x35c   : > { %6264 = vmatmul.msk.f32.gmra.mxu0 %vm331_vm1, %v8017_v30  ;;  %4891 = vst [vmem:[%s7946_s29 + $0x30] sm:$0xff] %v4827_v61  ;;  %v4954_v24 = vadd.f32 %v4953_v13, %v4827_v61  ;;  %v5025_v29 = vmul.f32 %v4827_v61, %v4827_v61 }
 0x35d   : > { %v3582_v15 = vpop.f32.mrf.mxu2 }
 0x35e   : > { %v5088_v0 = vadd.f32 %v5087_v21, %v5025_v29  ;;  %v3760_v3 = vadd.f32 %v3582_v15, %v3223_v48  ;;  %v4116_v5 = vpop.f32.mrf.mxu3  ;;  %v3048_v33 = vpop.f32.mrf.mxu1  ;;  %v8043_v48 = vld [vmem:[%s6648_s6 + $0x14a] sm:$0xff] }
 0x35f   : > { %v3224_v16 = vadd.f32 %v3048_v33, %v7212_v25 }
 0x360   : > { %v4294_v27 = vadd.f32 %v4116_v5, %v3760_v3 }
 0x361   : > { %v4653_v36 = vpop.f32.mrf.mxu0  ;;  %5873 = vmatmul.msk.f32.gmra.mxu1 %vm331_vm1, %v7978_v57  ;;  %v5940_v57 = vld [vmem:[%s6648_s6 + $0x148] sm:$0xff] }
 0x362   : > { %v4828_v10 = vadd.f32 %v4650_v51, %v4294_v27  ;;  %6005 = vmatmul.msk.f32.gmra.mxu2 %vm331_vm1, %v5939_v53  ;;  %v6070_v51 = vld [vmem:[%s6648_s6 + $0x149] sm:$0xff] }
 0x363   : > { %6135 = vmatmul.msk.f32.gmra.mxu3 %vm331_vm1, %v6069_v35  ;;  %v6071_v35 = vld [vmem:[%s6648_s6 + $0x151] sm:$0xff] }
 0x364   : > { %6265 = vmatmul.msk.f32.gmra.mxu0 %vm331_vm1, %v8030_v22  ;;  %4892 = vst [vmem:[%s7946_s29 + $0x38] sm:$0xff] %v4828_v10  ;;  %v4955_v13 = vadd.f32 %v4954_v24, %v4828_v10  ;;  %v5026_v21 = vmul.f32 %v4828_v10, %v4828_v10  ;;  %v8056_v10 = vld [vmem:[%s6648_s6 + $0x152] sm:$0xff] }
 0x365   : > { %v3585_v49 = vpop.f32.mrf.mxu2 }
 0x366   : > { %v5089_v28 = vadd.f32 %v5088_v0, %v5026_v21  ;;  %v3761_v4 = vadd.f32 %v3585_v49, %v3224_v16  ;;  %v4119_v50 = vpop.f32.mrf.mxu3  ;;  %v3051_v2 = vpop.f32.mrf.mxu1 }
 0x367   : > { %v3225_v25 = vadd.f32 %v3051_v2, %v7222_v38 }
 0x368   : > { %v4295_v9 = vadd.f32 %v4119_v50, %v3761_v4 }
 0x369   : > { %v4656_v61 = vpop.f32.mrf.mxu0  ;;  %5874 = vmatmul.msk.f32.gmra.mxu1 %vm331_vm1, %v7991_v18  ;;  %v5941_v18 = vld [vmem:[%s6648_s6 + $0x150] sm:$0xff] }
 0x36a   : > { %v4829_v29 = vadd.f32 %v4653_v36, %v4295_v9  ;;  %6006 = vmatmul.msk.f32.gmra.mxu2 %vm331_vm1, %v5940_v57  ;;  %v6072_v9 = vld [vmem:[%s6648_s6 + $0x159] sm:$0xff] }
 0x36b   : > { %6136 = vmatmul.msk.f32.gmra.mxu3 %vm331_vm1, %v6070_v51 }
 0x36c   : > { %6266 = vmatmul.msk.f32.gmra.mxu0 %vm331_vm1, %v8043_v48  ;;  %4893 = vst [vmem:[%s7946_s29 + $0x40] sm:$0xff] %v4829_v29  ;;  %v4956_v24 = vadd.f32 %v4955_v13, %v4829_v29  ;;  %v5027_v15 = vmul.f32 %v4829_v29, %v4829_v29 }
 0x36d   : > { %v3588_v0 = vpop.f32.mrf.mxu2 }
 0x36e   : > { %v5090_v3 = vadd.f32 %v5089_v28, %v5027_v15  ;;  %v3762_v5 = vadd.f32 %v3588_v0, %v3225_v25  ;;  %v4122_v33 = vpop.f32.mrf.mxu3  ;;  %v3054_v53 = vpop.f32.mrf.mxu1 }
 0x36f   : > { %v3226_v38 = vadd.f32 %v3054_v53, %v7234_v40 }
 0x370   : > { %v4296_v27 = vadd.f32 %v4122_v33, %v3762_v5 }
 0x371   : > { %v4659_v36 = vpop.f32.mrf.mxu0  ;;  %5875 = vmatmul.msk.f32.gmra.mxu1 %vm331_vm1, %v8004_v42  ;;  %v5942_v42 = vld [vmem:[%s6648_s6 + $0x158] sm:$0xff] }
 0x372   : > { %v4830_v16 = vadd.f32 %v4656_v61, %v4296_v27  ;;  %6007 = vmatmul.msk.f32.gmra.mxu2 %vm331_vm1, %v5941_v18  ;;  %v8069_v61 = vld [vmem:[%s6648_s6 + $0x15a] sm:$0xff]  ;;  %v6073_v18 = vld [vmem:[%s6648_s6 + $0x169] sm:$0xff] }
 0x373   : > { %6137 = vmatmul.msk.f32.gmra.mxu3 %vm331_vm1, %v6071_v35  ;;  %v8082_v35 = vld [vmem:[%s6648_s6 + $0x16a] sm:$0xff] }
 0x374   : > { %6267 = vmatmul.msk.f32.gmra.mxu0 %vm331_vm1, %v8056_v10  ;;  %4894 = vst [vmem:[%s7946_s29 + $0x48] sm:$0xff] %v4830_v16  ;;  %v4957_v13 = vadd.f32 %v4956_v24, %v4830_v16  ;;  %v5028_v21 = vmul.f32 %v4830_v16, %v4830_v16 }
 0x375   : > { %v3591_v49 = vpop.f32.mrf.mxu2 }
 0x376   : > { %v5091_v28 = vadd.f32 %v5090_v3, %v5028_v21  ;;  %v3763_v4 = vadd.f32 %v3591_v49, %v3226_v38  ;;  %v4125_v50 = vpop.f32.mrf.mxu3  ;;  %v3057_v2 = vpop.f32.mrf.mxu1 }
 0x377   : > { %v3227_v40 = vadd.f32 %v3057_v2, %v7248_v7  ;;  %v6074_v2 = vld [vmem:[%s6648_s6 + $0x171] sm:$0xff] }
 0x378   : > { %v4297_v57 = vadd.f32 %v4125_v50, %v3763_v4 }
 0x379   : > { %v4662_v51 = vpop.f32.mrf.mxu0  ;;  %5876 = vmatmul.msk.f32.gmra.mxu1 %vm331_vm1, %v8017_v30  ;;  %v5943_v30 = vld [vmem:[%s6648_s6 + $0x168] sm:$0xff] }
 0x37a   : > { %v4831_v29 = vadd.f32 %v4659_v36, %v4297_v57  ;;  %6008 = vmatmul.msk.f32.gmra.mxu2 %vm331_vm1, %v5942_v42  ;;  %v8095_v57 = vld [vmem:[%s6648_s6 + $0x172] sm:$0xff] }
 0x37b   : > { %6138 = vmatmul.msk.f32.gmra.mxu3 %vm331_vm1, %v6072_v9 }
 0x37c   : > { %6268 = vmatmul.msk.f32.gmra.mxu0 %vm331_vm1, %v8069_v61  ;;  %4895 = vst [vmem:[%s7946_s29 + $0x50] sm:$0xff] %v4831_v29  ;;  %v4958_v25 = vadd.f32 %v4957_v13, %v4831_v29  ;;  %v5029_v24 = vmul.f32 %v4831_v29, %v4831_v29 }
 0x37d   : > { %v3594_v15 = vpop.f32.mrf.mxu2 }
 0x37e   : > { %v5092_v0 = vadd.f32 %v5091_v28, %v5029_v24  ;;  %v3764_v3 = vadd.f32 %v3594_v15, %v3227_v40  ;;  %v4128_v5 = vpop.f32.mrf.mxu3  ;;  %v3060_v33 = vpop.f32.mrf.mxu1 }
 0x37f   : > { %v3228_v7 = vadd.f32 %v3060_v33, %v7261_v59 }
 0x380   : > { %v4298_v53 = vadd.f32 %v4128_v5, %v3764_v3  ;;  %v6075_v5 = vld [vmem:[%s6648_s6 + $0x179] sm:$0xff] }
 0x381   : > { %v4665_v27 = vpop.f32.mrf.mxu0  ;;  %5877 = vmatmul.msk.f32.gmra.mxu1 %vm331_vm1, %v8030_v22  ;;  %v5944_v22 = vld [vmem:[%s6648_s6 + $0x170] sm:$0xff] }
 0x382   : > { %v4832_v36 = vadd.f32 %v4662_v51, %v4298_v53  ;;  %6009 = vmatmul.msk.f32.gmra.mxu2 %vm331_vm1, %v5943_v30  ;;  %v8108_v30 = vld [vmem:[%s6648_s6 + $0x17a] sm:$0xff] }
 0x383   : > { %6139 = vmatmul.msk.f32.gmra.mxu3 %vm331_vm1, %v6073_v18 }
 0x384   : > { %6269 = vmatmul.msk.f32.gmra.mxu0 %vm331_vm1, %v8082_v35  ;;  %4896 = vst [vmem:[%s7946_s29 + $0x58] sm:$0xff] %v4832_v36  ;;  %v4959_v16 = vadd.f32 %v4958_v25, %v4832_v36  ;;  %v5030_v38 = vmul.f32 %v4832_v36, %v4832_v36 }
 0x385   : > { %v3597_v13 = vpop.f32.mrf.mxu2 }
 0x386   : > { %v5093_v21 = vadd.f32 %v5092_v0, %v5030_v38  ;;  %v3765_v49 = vadd.f32 %v3597_v13, %v3228_v7  ;;  %v4131_v28 = vpop.f32.mrf.mxu3  ;;  %v3063_v4 = vpop.f32.mrf.mxu1 }
 0x387   : > { %v3229_v59 = vadd.f32 %v3063_v4, %v7274_v41  ;;  %v8121_v4 = vld [vmem:[%s6648_s6 + $0x182] sm:$0xff] }
 0x388   : > { %v4299_v50 = vadd.f32 %v4131_v28, %v3765_v49  ;;  %v6076_v49 = vld [vmem:[%s6648_s6 + $0x181] sm:$0xff] }
 0x389   : > { %v4668_v42 = vpop.f32.mrf.mxu0  ;;  %5878 = vmatmul.msk.f32.gmra.mxu1 %vm331_vm1, %v8043_v48  ;;  %v5945_v48 = vld [vmem:[%s6648_s6 + $0x178] sm:$0xff] }
 0x38a   : > { %v4833_v9 = vadd.f32 %v4665_v27, %v4299_v50  ;;  %6010 = vmatmul.msk.f32.gmra.mxu2 %vm331_vm1, %v5944_v22 }
 0x38b   : > { %6140 = vmatmul.msk.f32.gmra.mxu3 %vm331_vm1, %v6074_v2 }
 0x38c   : > { %6270 = vmatmul.msk.f32.gmra.mxu0 %vm331_vm1, %v8095_v57  ;;  %4897 = vst [vmem:[%s7946_s29 + $0x60] sm:$0xff] %v4833_v9  ;;  %v4960_v51 = vadd.f32 %v4959_v16, %v4833_v9  ;;  %v5031_v29 = vmul.f32 %v4833_v9, %v4833_v9 }
 0x38d   : > { %v3600_v40 = vpop.f32.mrf.mxu2 }
 0x38e   : > { %v5094_v25 = vadd.f32 %v5093_v21, %v5031_v29  ;;  %v3766_v24 = vadd.f32 %v3600_v40, %v3229_v59  ;;  %v4134_v15 = vpop.f32.mrf.mxu3  ;;  %v3066_v0 = vpop.f32.mrf.mxu1 }
 0x38f   : > { %v3230_v41 = vadd.f32 %v3066_v0, %v7287_v32 }
 0x390   : > { %v4300_v3 = vadd.f32 %v4134_v15, %v3766_v24  ;;  %v8134_v15 = vld [vmem:[%s6648_s6 + $0x192] sm:$0xff] }
 0x391   : > { %v4671_v33 = vpop.f32.mrf.mxu0  ;;  %5879 = vmatmul.msk.f32.gmra.mxu1 %vm331_vm1, %v8056_v10  ;;  %v5946_v10 = vld [vmem:[%s6648_s6 + $0x180] sm:$0xff] }
 0x392   : > { %v4834_v53 = vadd.f32 %v4668_v42, %v4300_v3  ;;  %6011 = vmatmul.msk.f32.gmra.mxu2 %vm331_vm1, %v5945_v48 }
 0x393   : > { %6141 = vmatmul.msk.f32.gmra.mxu3 %vm331_vm1, %v6075_v5 }
 0x394   : > { %6271 = vmatmul.msk.f32.gmra.mxu0 %vm331_vm1, %v8108_v30  ;;  %4898 = vst [vmem:[%s7946_s29 + $0x68] sm:$0xff] %v4834_v53  ;;  %v4961_v18 = vadd.f32 %v4960_v51, %v4834_v53  ;;  %v5032_v27 = vmul.f32 %v4834_v53, %v4834_v53 }
 0x395   : > { %v3603_v36 = vpop.f32.mrf.mxu2 }
 0x396   : > { %v5095_v7 = vadd.f32 %v5094_v25, %v5032_v27  ;;  %v3767_v16 = vadd.f32 %v3603_v36, %v3230_v41  ;;  %v4137_v38 = vpop.f32.mrf.mxu3  ;;  %v3069_v13 = vpop.f32.mrf.mxu1  ;;  %v6077_v25 = vld [vmem:[%s6648_s6 + $0x191] sm:$0xff]  ;;  %v6078_v36 = vld [vmem:[%s6648_s6 + $0x199] sm:$0xff] }
 0x397   : > { %v3231_v32 = vadd.f32 %v3069_v13, %v7301_v17 }
 0x398   : > { %v4301_v21 = vadd.f32 %v4137_v38, %v3767_v16  ;;  %v8147_v16 = vld [vmem:[%s6648_s6 + $0x19a] sm:$0xff] }
 0x399   : > { %v4674_v28 = vpop.f32.mrf.mxu0  ;;  %5880 = vmatmul.msk.f32.gmra.mxu1 %vm331_vm1, %v8069_v61  ;;  %v5947_v61 = vld [vmem:[%s6648_s6 + $0x190] sm:$0xff] }
 0x39a   : > { %v4835_v22 = vadd.f32 %v4671_v33, %v4301_v21  ;;  %6012 = vmatmul.msk.f32.gmra.mxu2 %vm331_vm1, %v5946_v10 }
 0x39b   : > { %6142 = vmatmul.msk.f32.gmra.mxu3 %vm331_vm1, %v6076_v49 }
 0x39c   : > { %6272 = vmatmul.msk.f32.gmra.mxu0 %vm331_vm1, %v8121_v4  ;;  %4899 = vst [vmem:[%s7946_s29 + $0x70] sm:$0xff] %v4835_v22  ;;  %v4962_v50 = vadd.f32 %v4961_v18, %v4835_v22  ;;  %v5033_v2 = vmul.f32 %v4835_v22, %v4835_v22 }
 0x39d   : > { %v3606_v42 = vpop.f32.mrf.mxu2 }
 0x39e   : > { %v5096_v9 = vadd.f32 %v5095_v7, %v5033_v2  ;;  %v3768_v59 = vadd.f32 %v3606_v42, %v3231_v32  ;;  %v4140_v51 = vpop.f32.mrf.mxu3  ;;  %v3072_v29 = vpop.f32.mrf.mxu1  ;;  %v6079_v2 = vld [vmem:[%s6648_s6 + $0x1a1] sm:$0xff] }
 0x39f   : > { %v3232_v17 = vadd.f32 %v3072_v29, %v7315_v44 }
 0x3a0   : > { %v4302_v40 = vadd.f32 %v4140_v51, %v3768_v59 }
 0x3a1   : > { %v4677_v24 = vpop.f32.mrf.mxu0  ;;  %5881 = vmatmul.msk.f32.gmra.mxu1 %vm331_vm1, %v8082_v35  ;;  %v5948_v35 = vld [vmem:[%s6648_s6 + $0x198] sm:$0xff] }
 0x3a2   : > { %v4836_v0 = vadd.f32 %v4674_v28, %v4302_v40  ;;  %6013 = vmatmul.msk.f32.gmra.mxu2 %vm331_vm1, %v5947_v61 }
 0x3a3   : > { %6143 = vmatmul.msk.f32.gmra.mxu3 %vm331_vm1, %v6077_v25 }
 0x3a4   : > { %6273 = vmatmul.msk.f32.gmra.mxu0 %vm331_vm1, %v8134_v15  ;;  %4900 = vst [vmem:[%s7946_s29 + $0x78] sm:$0xff] %v4836_v0  ;;  %v4963_v48 = vadd.f32 %v4962_v50, %v4836_v0  ;;  %v5034_v3 = vmul.f32 %v4836_v0, %v4836_v0 }
 0x3a5   : > { %v3609_v5 = vpop.f32.mrf.mxu2 }
 0x3a6   : > { %v5097_v33 = vadd.f32 %v5096_v9, %v5034_v3  ;;  %v3769_v53 = vadd.f32 %v3609_v5, %v3232_v17  ;;  %v4143_v41 = vpop.f32.mrf.mxu3  ;;  %v3075_v18 = vpop.f32.mrf.mxu1  ;;  %v8160_v9 = vld [vmem:[%s6648_s6 + $0x1a2] sm:$0xff]  ;;  %v8173_v5 = vld [vmem:[%s6648_s6 + $0x1aa] sm:$0xff] }
 0x3a7   : > { %v3233_v44 = vadd.f32 %v3075_v18, %v7329_v37 }
 0x3a8   : > { %v4303_v27 = vadd.f32 %v4143_v41, %v3769_v53 }
 0x3a9   : > { %v4680_v7 = vpop.f32.mrf.mxu0  ;;  %5882 = vmatmul.msk.f32.gmra.mxu1 %vm331_vm1, %v8095_v57  ;;  %v5949_v57 = vld [vmem:[%s6648_s6 + $0x1a0] sm:$0xff] }
 0x3aa   : > { %v4837_v38 = vadd.f32 %v4677_v24, %v4303_v27  ;;  %6014 = vmatmul.msk.f32.gmra.mxu2 %vm331_vm1, %v5948_v35 }
 0x3ab   : > { %6144 = vmatmul.msk.f32.gmra.mxu3 %vm331_vm1, %v6078_v36 }
 0x3ac   : > { %6274 = vmatmul.msk.f32.gmra.mxu0 %vm331_vm1, %v8147_v16  ;;  %4901 = vst [vmem:[%s7946_s29 + $0x80] sm:$0xff] %v4837_v38  ;;  %v4964_v13 = vadd.f32 %v4963_v48, %v4837_v38  ;;  %v5035_v10 = vmul.f32 %v4837_v38, %v4837_v38  ;;  %v6080_v48 = vld [vmem:[%s6648_s6 + $0x1a9] sm:$0xff] }
 0x3ad   : > { %v3612_v21 = vpop.f32.mrf.mxu2 }
 0x3ae   : > { %v5098_v49 = vadd.f32 %v5097_v33, %v5035_v10  ;;  %v3770_v28 = vadd.f32 %v3612_v21, %v3233_v44  ;;  %v4146_v22 = vpop.f32.mrf.mxu3  ;;  %v3078_v32 = vpop.f32.mrf.mxu1  ;;  %v6081_v44 = vld [vmem:[%s6648_s6 + $0x1b9] sm:$0xff] }
 0x3af   : > { %v3234_v37 = vadd.f32 %v3078_v32, %v7343_v1  ;;  %v8186_v10 = vld [vmem:[%s6648_s6 + $0x1ba] sm:$0xff] }
 0x3b0   : > { %v4304_v50 = vadd.f32 %v4146_v22, %v3770_v28 }
 0x3b1   : > { %v4683_v42 = vpop.f32.mrf.mxu0  ;;  %5883 = vmatmul.msk.f32.gmra.mxu1 %vm331_vm1, %v8108_v30  ;;  %v5950_v30 = vld [vmem:[%s6648_s6 + $0x1a8] sm:$0xff] }
 0x3b2   : > { %v4838_v59 = vadd.f32 %v4680_v7, %v4304_v50  ;;  %6015 = vmatmul.msk.f32.gmra.mxu2 %vm331_vm1, %v5949_v57 }
 0x3b3   : > { %6145 = vmatmul.msk.f32.gmra.mxu3 %vm331_vm1, %v6079_v2 }
 0x3b4   : > { %6275 = vmatmul.msk.f32.gmra.mxu0 %vm331_vm1, %v8160_v9  ;;  %4902 = vst [vmem:[%s7946_s29 + $0x88] sm:$0xff] %v4838_v59  ;;  %v4965_v51 = vadd.f32 %v4964_v13, %v4838_v59  ;;  %v5036_v29 = vmul.f32 %v4838_v59, %v4838_v59  ;;  %v6082_v59 = vld [vmem:[%s6648_s6 + $0x1c1] sm:$0xff] }
 0x3b5   : > { %v3615_v61 = vpop.f32.mrf.mxu2 }
 0x3b6   : > { %v5099_v40 = vadd.f32 %v5098_v49, %v5036_v29  ;;  %v3771_v25 = vadd.f32 %v3615_v61, %v3234_v37  ;;  %v4149_v24 = vpop.f32.mrf.mxu3  ;;  %v3081_v0 = vpop.f32.mrf.mxu1 }
 0x3b7   : > { %v3235_v1 = vadd.f32 %v3081_v0, %v7357_v6 }
 0x3b8   : > { %v4305_v17 = vadd.f32 %v4149_v24, %v3771_v25 }
 0x3b9   : > { %v4686_v3 = vpop.f32.mrf.mxu0  ;;  %5884 = vmatmul.msk.f32.gmra.mxu1 %vm331_vm1, %v8121_v4  ;;  %v5951_v4 = vld [vmem:[%s6648_s6 + $0x1b8] sm:$0xff] }
 0x3ba   : > { %v4839_v33 = vadd.f32 %v4683_v42, %v4305_v17  ;;  %6016 = vmatmul.msk.f32.gmra.mxu2 %vm331_vm1, %v5950_v30 }
 0x3bb   : > { %6146 = vmatmul.msk.f32.gmra.mxu3 %vm331_vm1, %v6080_v48 }
 0x3bc   : > { %6276 = vmatmul.msk.f32.gmra.mxu0 %vm331_vm1, %v8173_v5  ;;  %4903 = vst [vmem:[%s7946_s29 + $0x90] sm:$0xff] %v4839_v33  ;;  %v4966_v53 = vadd.f32 %v4965_v51, %v4839_v33  ;;  %v5037_v41 = vmul.f32 %v4839_v33, %v4839_v33  ;;  %v8199_v51 = vld [vmem:[%s6648_s6 + $0x1c2] sm:$0xff] }
 0x3bd   : > { %v3618_v18 = vpop.f32.mrf.mxu2 }
 0x3be   : > { %v5100_v35 = vadd.f32 %v5099_v40, %v5037_v41  ;;  %v3772_v27 = vadd.f32 %v3618_v18, %v3235_v1  ;;  %v4152_v36 = vpop.f32.mrf.mxu3  ;;  %v3084_v7 = vpop.f32.mrf.mxu1  ;;  %v8212_v1 = vld [vmem:[%s6648_s6 + $0x1ca] sm:$0xff] }
 0x3bf   : > { %v3236_v6 = vadd.f32 %v3084_v7, %v7371_v19 }
 0x3c0   : > { %v4306_v38 = vadd.f32 %v4152_v36, %v3772_v27 }
 0x3c1   : > { %v4689_v13 = vpop.f32.mrf.mxu0  ;;  %5885 = vmatmul.msk.f32.gmra.mxu1 %vm331_vm1, %v8134_v15  ;;  %v5952_v15 = vld [vmem:[%s6648_s6 + $0x1c0] sm:$0xff] }
 0x3c2   : > { %v4840_v21 = vadd.f32 %v4686_v3, %v4306_v38  ;;  %6017 = vmatmul.msk.f32.gmra.mxu2 %vm331_vm1, %v5951_v4  ;;  %v6083_v3 = vld [vmem:[%s6648_s6 + $0x1c9] sm:$0xff] }
 0x3c3   : > { %6147 = vmatmul.msk.f32.gmra.mxu3 %vm331_vm1, %v6081_v44  ;;  %v6084_v44 = vld [vmem:[%s6648_s6 + $0x1d1] sm:$0xff] }
 0x3c4   : > { %6277 = vmatmul.msk.f32.gmra.mxu0 %vm331_vm1, %v8186_v10  ;;  %4904 = vst [vmem:[%s7946_s29 + $0x98] sm:$0xff] %v4840_v21  ;;  %v4967_v49 = vadd.f32 %v4966_v53, %v4840_v21  ;;  %v5038_v28 = vmul.f32 %v4840_v21, %v4840_v21  ;;  %v8225_v21 = vld [vmem:[%s6648_s6 + $0x1d2] sm:$0xff] }
 0x3c5   : > { %v3621_v22 = vpop.f32.mrf.mxu2 }
 0x3c6   : > { %v5101_v32 = vadd.f32 %v5100_v35, %v5038_v28  ;;  %v3773_v57 = vadd.f32 %v3621_v22, %v3236_v6  ;;  %v4155_v50 = vpop.f32.mrf.mxu3  ;;  %v3087_v2 = vpop.f32.mrf.mxu1 }
 0x3c7   : > { %v3237_v19 = vadd.f32 %v3087_v2, %v7385_v63 }
 0x3c8   : > { %v4307_v42 = vadd.f32 %v4155_v50, %v3773_v57 }
 0x3c9   : > { %v4692_v37 = vpop.f32.mrf.mxu0  ;;  %5886 = vmatmul.msk.f32.gmra.mxu1 %vm331_vm1, %v8147_v16  ;;  %v5953_v16 = vld [vmem:[%s6648_s6 + $0x1c8] sm:$0xff] }
 0x3ca   : > { %v4841_v29 = vadd.f32 %v4689_v13, %v4307_v42  ;;  %6018 = vmatmul.msk.f32.gmra.mxu2 %vm331_vm1, %v5952_v15  ;;  %v6085_v42 = vld [vmem:[%s6648_s6 + $0x1e1] sm:$0xff] }
 0x3cb   : > { %6148 = vmatmul.msk.f32.gmra.mxu3 %vm331_vm1, %v6082_v59 }
 0x3cc   : > { %6278 = vmatmul.msk.f32.gmra.mxu0 %vm331_vm1, %v8199_v51  ;;  %4905 = vst [vmem:[%s7946_s29 + $0xa0] sm:$0xff] %v4841_v29  ;;  %v4968_v61 = vadd.f32 %v4967_v49, %v4841_v29  ;;  %v5039_v40 = vmul.f32 %v4841_v29, %v4841_v29 }
 0x3cd   : > { %v3624_v25 = vpop.f32.mrf.mxu2 }
 0x3ce   : > { %v5102_v24 = vadd.f32 %v5101_v32, %v5039_v40  ;;  %v3774_v0 = vadd.f32 %v3624_v25, %v3237_v19  ;;  %v4158_v30 = vpop.f32.mrf.mxu3  ;;  %v3090_v17 = vpop.f32.mrf.mxu1 }
 0x3cf   : > { %v3238_v63 = vadd.f32 %v3090_v17, %v7399_v56 }
 0x3d0   : > { %v4308_v48 = vadd.f32 %v4158_v30, %v3774_v0 }
 0x3d1   : > { %v4695_v33 = vpop.f32.mrf.mxu0  ;;  %5887 = vmatmul.msk.f32.gmra.mxu1 %vm331_vm1, %v8160_v9  ;;  %v5954_v9 = vld [vmem:[%s6648_s6 + $0x1d0] sm:$0xff] }
 0x3d2   : > { %v4842_v53 = vadd.f32 %v4692_v37, %v4308_v48  ;;  %6019 = vmatmul.msk.f32.gmra.mxu2 %vm331_vm1, %v5953_v16  ;;  %v8238_v37 = vld [vmem:[%s6648_s6 + $0x1e2] sm:$0xff] }
 0x3d3   : > { %6149 = vmatmul.msk.f32.gmra.mxu3 %vm331_vm1, %v6083_v3  ;;  %v6086_v16 = vld [vmem:[%s6648_s6 + $0x1e9] sm:$0xff] }
 0x3d4   : > { %6279 = vmatmul.msk.f32.gmra.mxu0 %vm331_vm1, %v8212_v1  ;;  %4906 = vst [vmem:[%s7946_s29 + $0xa8] sm:$0xff] %v4842_v53  ;;  %v4969_v41 = vadd.f32 %v4968_v61, %v4842_v53  ;;  %v5040_v18 = vmul.f32 %v4842_v53, %v4842_v53  ;;  %v8251_v3 = vld [vmem:[%s6648_s6 + $0x1ea] sm:$0xff] }
 0x3d5   : > { %v3627_v35 = vpop.f32.mrf.mxu2 }
 0x3d6   : > { %v5103_v27 = vadd.f32 %v5102_v24, %v5040_v18  ;;  %v3775_v36 = vadd.f32 %v3627_v35, %v3238_v63  ;;  %v4161_v7 = vpop.f32.mrf.mxu3  ;;  %v3093_v4 = vpop.f32.mrf.mxu1 }
 0x3d7   : > { %v3239_v56 = vadd.f32 %v3093_v4, %v7413_v52  ;;  %v6087_v4 = vld [vmem:[%s6648_s6 + $0x1f1] sm:$0xff] }
 0x3d8   : > { %v4309_v38 = vadd.f32 %v4161_v7, %v3775_v36 }
 0x3d9   : > { %v4698_v13 = vpop.f32.mrf.mxu0  ;;  %5888 = vmatmul.msk.f32.gmra.mxu1 %vm331_vm1, %v8173_v5  ;;  %v5955_v5 = vld [vmem:[%s6648_s6 + $0x1e0] sm:$0xff] }
 0x3da   : > { %v4843_v6 = vadd.f32 %v4695_v33, %v4309_v38  ;;  %6020 = vmatmul.msk.f32.gmra.mxu2 %vm331_vm1, %v5954_v9  ;;  %v8264_v38 = vld [vmem:[%s6648_s6 + $0x1f2] sm:$0xff] }
 0x3db   : > { %6150 = vmatmul.msk.f32.gmra.mxu3 %vm331_vm1, %v6084_v44 }
 0x3dc   : > { %6280 = vmatmul.msk.f32.gmra.mxu0 %vm331_vm1, %v8225_v21  ;;  %4907 = vst [vmem:[%s7946_s29 + $0xb0] sm:$0xff] %v4843_v6  ;;  %v4970_v49 = vadd.f32 %v4969_v41, %v4843_v6  ;;  %v5041_v28 = vmul.f32 %v4843_v6, %v4843_v6 }
 0x3dd   : > { %v3630_v22 = vpop.f32.mrf.mxu2 }
 0x3de   : > { %v5104_v32 = vadd.f32 %v5103_v27, %v5041_v28  ;;  %v3776_v57 = vadd.f32 %v3630_v22, %v3239_v56  ;;  %v4164_v50 = vpop.f32.mrf.mxu3  ;;  %v3096_v2 = vpop.f32.mrf.mxu1 }
 0x3df   : > { %v3240_v52 = vadd.f32 %v3096_v2, %v7427_v11 }
 0x3e0   : > { %v4310_v15 = vadd.f32 %v4164_v50, %v3776_v57  ;;  %v6088_v50 = vld [vmem:[%s6648_s6 + $0x1f9] sm:$0xff] }
 0x3e1   : > { %v4701_v59 = vpop.f32.mrf.mxu0  ;;  %5889 = vmatmul.msk.f32.gmra.mxu1 %vm331_vm1, %v8186_v10  ;;  %v5956_v10 = vld [vmem:[%s6648_s6 + $0x1e8] sm:$0xff] }
 0x3e2   : > { %v4844_v29 = vadd.f32 %v4698_v13, %v4310_v15  ;;  %6021 = vmatmul.msk.f32.gmra.mxu2 %vm331_vm1, %v5955_v5  ;;  %v8277_v5 = vld [vmem:[%s6648_s6 + $0x1fa] sm:$0xff] }
 0x3e3   : > { %6151 = vmatmul.msk.f32.gmra.mxu3 %vm331_vm1, %v6085_v42 }
 0x3e4   : > { %6281 = vmatmul.msk.f32.gmra.mxu0 %vm331_vm1, %v8238_v37  ;;  %4908 = vst [vmem:[%s7946_s29 + $0xb8] sm:$0xff] %v4844_v29  ;;  %v4971_v19 = vadd.f32 %v4970_v49, %v4844_v29  ;;  %v5042_v61 = vmul.f32 %v4844_v29, %v4844_v29 }
 0x3e5   : > { %v3633_v40 = vpop.f32.mrf.mxu2 }
 0x3e6   : > { %v5105_v25 = vadd.f32 %v5104_v32, %v5042_v61  ;;  %v3777_v24 = vadd.f32 %v3633_v40, %v3240_v52  ;;  %v4167_v0 = vpop.f32.mrf.mxu3  ;;  %v3099_v30 = vpop.f32.mrf.mxu1 }
 0x3e7   : > { %v3241_v11 = vadd.f32 %v3099_v30, %v7441_v20  ;;  %v8290_v30 = vld [vmem:[%s6648_s6 + $0x20a] sm:$0xff] }
 0x3e8   : > { %v4311_v17 = vadd.f32 %v4167_v0, %v3777_v24  ;;  %v6089_v24 = vld [vmem:[%s6648_s6 + $0x209] sm:$0xff] }
 0x3e9   : > { %v4704_v48 = vpop.f32.mrf.mxu0  ;;  %5890 = vmatmul.msk.f32.gmra.mxu1 %vm331_vm1, %v8199_v51  ;;  %v5957_v51 = vld [vmem:[%s6648_s6 + $0x1f0] sm:$0xff] }
 0x3ea   : > { %v4845_v33 = vadd.f32 %v4701_v59, %v4311_v17  ;;  %6022 = vmatmul.msk.f32.gmra.mxu2 %vm331_vm1, %v5956_v10 }
 0x3eb   : > { %6152 = vmatmul.msk.f32.gmra.mxu3 %vm331_vm1, %v6086_v16 }
 0x3ec   : > { %6282 = vmatmul.msk.f32.gmra.mxu0 %vm331_vm1, %v8251_v3  ;;  %4909 = vst [vmem:[%s7946_s29 + $0xc0] sm:$0xff] %v4845_v33  ;;  %v4972_v53 = vadd.f32 %v4971_v19, %v4845_v33  ;;  %v5043_v63 = vmul.f32 %v4845_v33, %v4845_v33 }
 0x3ed   : > { %v3636_v41 = vpop.f32.mrf.mxu2 }
 0x3ee   : > { %v5106_v18 = vadd.f32 %v5105_v25, %v5043_v63  ;;  %v3778_v35 = vadd.f32 %v3636_v41, %v3241_v11  ;;  %v4170_v27 = vpop.f32.mrf.mxu3  ;;  %v3102_v36 = vpop.f32.mrf.mxu1 }
 0x3ef   : > { %v3242_v20 = vadd.f32 %v3102_v36, %v7455_v31 }
 0x3f0   : > { %v4312_v7 = vadd.f32 %v4170_v27, %v3778_v35  ;;  %v8303_v27 = vld [vmem:[%s6648_s6 + $0x212] sm:$0xff] }
 0x3f1   : > { %v4707_v9 = vpop.f32.mrf.mxu0  ;;  %5891 = vmatmul.msk.f32.gmra.mxu1 %vm331_vm1, %v8212_v1  ;;  %v5958_v1 = vld [vmem:[%s6648_s6 + $0x1f8] sm:$0xff] }
 0x3f2   : > { %v4846_v44 = vadd.f32 %v4704_v48, %v4312_v7  ;;  %6023 = vmatmul.msk.f32.gmra.mxu2 %vm331_vm1, %v5957_v51 }
 0x3f3   : > { %6153 = vmatmul.msk.f32.gmra.mxu3 %vm331_vm1, %v6087_v4 }
 0x3f4   : > { %6283 = vmatmul.msk.f32.gmra.mxu0 %vm331_vm1, %v8264_v38  ;;  %4910 = vst [vmem:[%s7946_s29 + $0xc8] sm:$0xff] %v4846_v44  ;;  %v4973_v13 = vadd.f32 %v4972_v53, %v4846_v44  ;;  %v5044_v6 = vmul.f32 %v4846_v44, %v4846_v44 }
 0x3f5   : > { %v3639_v56 = vpop.f32.mrf.mxu2 }
 0x3f6   : > { %v5107_v49 = vadd.f32 %v5106_v18, %v5044_v6  ;;  %v3779_v28 = vadd.f32 %v3639_v56, %v3242_v20  ;;  %v4173_v22 = vpop.f32.mrf.mxu3  ;;  %v3105_v32 = vpop.f32.mrf.mxu1  ;;  %v6090_v18 = vld [vmem:[%s6648_s6 + $0x211] sm:$0xff]  ;;  %v6091_v56 = vld [vmem:[%s6648_s6 + $0x219] sm:$0xff] }
 0x3f7   : > { %v3243_v31 = vadd.f32 %v3105_v32, %v7469_v43 }
 0x3f8   : > { %v4313_v57 = vadd.f32 %v4173_v22, %v3779_v28  ;;  %v8316_v28 = vld [vmem:[%s6648_s6 + $0x21a] sm:$0xff] }
 0x3f9   : > { %v4710_v2 = vpop.f32.mrf.mxu0  ;;  %5892 = vmatmul.msk.f32.gmra.mxu1 %vm331_vm1, %v8225_v21  ;;  %v5959_v21 = vld [vmem:[%s6648_s6 + $0x208] sm:$0xff] }
 0x3fa   : > { %v4847_v15 = vadd.f32 %v4707_v9, %v4313_v57  ;;  %6024 = vmatmul.msk.f32.gmra.mxu2 %vm331_vm1, %v5958_v1 }
 0x3fb   : > { %6154 = vmatmul.msk.f32.gmra.mxu3 %vm331_vm1, %v6088_v50 }
 0x3fc   : > { %6284 = vmatmul.msk.f32.gmra.mxu0 %vm331_vm1, %v8277_v5  ;;  %4911 = vst [vmem:[%s7946_s29 + $0xd0] sm:$0xff] %v4847_v15  ;;  %v4974_v42 = vadd.f32 %v4973_v13, %v4847_v15  ;;  %v5045_v59 = vmul.f32 %v4847_v15, %v4847_v15 }
 0x3fd   : > { %v3642_v29 = vpop.f32.mrf.mxu2 }
 0x3fe   : > { %v5108_v52 = vadd.f32 %v5107_v49, %v5045_v59  ;;  %v3780_v19 = vadd.f32 %v3642_v29, %v3243_v31  ;;  %v4176_v61 = vpop.f32.mrf.mxu3  ;;  %v3108_v40 = vpop.f32.mrf.mxu1  ;;  %v6092_v59 = vld [vmem:[%s6648_s6 + $0x221] sm:$0xff] }
 0x3ff   : > { %v3244_v43 = vadd.f32 %v3108_v40, %v7483_v55 }
 0x400   : > { %v4314_v25 = vadd.f32 %v4176_v61, %v3780_v19 }
 0x401   : > { %v4713_v0 = vpop.f32.mrf.mxu0  ;;  %5893 = vmatmul.msk.f32.gmra.mxu1 %vm331_vm1, %v8238_v37  ;;  %v5960_v37 = vld [vmem:[%s6648_s6 + $0x210] sm:$0xff] }
 0x402   : > { %v4848_v10 = vadd.f32 %v4710_v2, %v4314_v25  ;;  %6025 = vmatmul.msk.f32.gmra.mxu2 %vm331_vm1, %v5959_v21 }
 0x403   : > { %6155 = vmatmul.msk.f32.gmra.mxu3 %vm331_vm1, %v6089_v24 }
 0x404   : > { %6285 = vmatmul.msk.f32.gmra.mxu0 %vm331_vm1, %v8290_v30  ;;  %4912 = vst [vmem:[%s7946_s29 + $0xd8] sm:$0xff] %v4848_v10  ;;  %v4975_v17 = vadd.f32 %v4974_v42, %v4848_v10  ;;  %v5046_v16 = vmul.f32 %v4848_v10, %v4848_v10 }
 0x405   : > { %v3645_v48 = vpop.f32.mrf.mxu2 }
 0x406   : > { %v5109_v33 = vadd.f32 %v5108_v52, %v5046_v16  ;;  %v3781_v11 = vadd.f32 %v3645_v48, %v3244_v43  ;;  %v4179_v53 = vpop.f32.mrf.mxu3  ;;  %v3111_v63 = vpop.f32.mrf.mxu1  ;;  %v8329_v52 = vld [vmem:[%s6648_s6 + $0x222] sm:$0xff]  ;;  %v8342_v48 = vld [vmem:[%s6648_s6 + $0x232] sm:$0xff] }
 0x407   : > { %v3245_v55 = vadd.f32 %v3111_v63, %v7497_v62 }
 0x408   : > { %v4315_v41 = vadd.f32 %v4179_v53, %v3781_v11 }
 0x409   : > { %v4716_v35 = vpop.f32.mrf.mxu0  ;;  %5894 = vmatmul.msk.f32.gmra.mxu1 %vm331_vm1, %v8251_v3  ;;  %v5961_v3 = vld [vmem:[%s6648_s6 + $0x218] sm:$0xff] }
 0x40a   : > { %v4849_v36 = vadd.f32 %v4713_v0, %v4315_v41  ;;  %6026 = vmatmul.msk.f32.gmra.mxu2 %vm331_vm1, %v5960_v37 }
 0x40b   : > { %6156 = vmatmul.msk.f32.gmra.mxu3 %vm331_vm1, %v6090_v18 }
 0x40c   : > { %6286 = vmatmul.msk.f32.gmra.mxu0 %vm331_vm1, %v8303_v27  ;;  %4913 = vst [vmem:[%s7946_s29 + $0xe0] sm:$0xff] %v4849_v36  ;;  %v4976_v51 = vadd.f32 %v4975_v17, %v4849_v36  ;;  %v5047_v7 = vmul.f32 %v4849_v36, %v4849_v36  ;;  %v6093_v17 = vld [vmem:[%s6648_s6 + $0x231] sm:$0xff] }
 0x40d   : > { %v3648_v4 = vpop.f32.mrf.mxu2 }
 0x40e   : > { %v5110_v9 = vadd.f32 %v5109_v33, %v5047_v7  ;;  %v3782_v44 = vadd.f32 %v3648_v4, %v3245_v55  ;;  %v4182_v20 = vpop.f32.mrf.mxu3  ;;  %v3114_v13 = vpop.f32.mrf.mxu1  ;;  %v6094_v55 = vld [vmem:[%s6648_s6 + $0x239] sm:$0xff] }
 0x40f   : > { %v3246_v62 = vadd.f32 %v3114_v13, %v7511_v8  ;;  %v8355_v7 = vld [vmem:[%s6648_s6 + $0x23a] sm:$0xff] }
 0x410   : > { %v4316_v6 = vadd.f32 %v4182_v20, %v3782_v44 }
 0x411   : > { %v4719_v49 = vpop.f32.mrf.mxu0  ;;  %5895 = vmatmul.msk.f32.gmra.mxu1 %vm331_vm1, %v8264_v38  ;;  %v5962_v38 = vld [vmem:[%s6648_s6 + $0x220] sm:$0xff] }
 0x412   : > { %v4850_v22 = vadd.f32 %v4716_v35, %v4316_v6  ;;  %6027 = vmatmul.msk.f32.gmra.mxu2 %vm331_vm1, %v5961_v3 }
 0x413   : > { %6157 = vmatmul.msk.f32.gmra.mxu3 %vm331_vm1, %v6091_v56 }
 0x414   : > { %6287 = vmatmul.msk.f32.gmra.mxu0 %vm331_vm1, %v8316_v28  ;;  %4914 = vst [vmem:[%s7946_s29 + $0xe8] sm:$0xff] %v4850_v22  ;;  %v4977_v32 = vadd.f32 %v4976_v51, %v4850_v22  ;;  %v5048_v1 = vmul.f32 %v4850_v22, %v4850_v22  ;;  %v6095_v22 = vld [vmem:[%s6648_s6 + $0x241] sm:$0xff] }
 0x415   : > { %v3651_v57 = vpop.f32.mrf.mxu2 }
 0x416   : > { %v5111_v50 = vadd.f32 %v5110_v9, %v5048_v1  ;;  %v3783_v2 = vadd.f32 %v3651_v57, %v3246_v62  ;;  %v4185_v15 = vpop.f32.mrf.mxu3  ;;  %v3117_v31 = vpop.f32.mrf.mxu1 }
 0x417   : > { %v3247_v8 = vadd.f32 %v3117_v31, %v7525_v23 }
 0x418   : > { %v4317_v42 = vadd.f32 %v4185_v15, %v3783_v2 }
 0x419   : > { %v4722_v29 = vpop.f32.mrf.mxu0  ;;  %5896 = vmatmul.msk.f32.gmra.mxu1 %vm331_vm1, %v8277_v5  ;;  %v5963_v5 = vld [vmem:[%s6648_s6 + $0x230] sm:$0xff] }
 0x41a   : > { %v4851_v19 = vadd.f32 %v4719_v49, %v4317_v42  ;;  %6028 = vmatmul.msk.f32.gmra.mxu2 %vm331_vm1, %v5962_v38 }
 0x41b   : > { %6158 = vmatmul.msk.f32.gmra.mxu3 %vm331_vm1, %v6092_v59 }
 0x41c   : > { %6288 = vmatmul.msk.f32.gmra.mxu0 %vm331_vm1, %v8329_v52  ;;  %4915 = vst [vmem:[%s7946_s29 + $0xf0] sm:$0xff] %v4851_v19  ;;  %v4978_v61 = vadd.f32 %v4977_v32, %v4851_v19  ;;  %v5049_v40 = vmul.f32 %v4851_v19, %v4851_v19  ;;  %v8368_v32 = vld [vmem:[%s6648_s6 + $0x242] sm:$0xff] }
 0x41d   : > { %v3654_v21 = vpop.f32.mrf.mxu2 }
 0x41e   : > { %v5112_v25 = vadd.f32 %v5111_v50, %v5049_v40  ;;  %v3784_v24 = vadd.f32 %v3654_v21, %v3247_v8  ;;  %v4188_v0 = vpop.f32.mrf.mxu3  ;;  %v3120_v10 = vpop.f32.mrf.mxu1  ;;  %v8381_v8 = vld [vmem:[%s6648_s6 + $0x24a] sm:$0xff] }
 0x41f   : > { %v3248_v23 = vadd.f32 %v3120_v10, %v7539_v46 }
 0x420   : > { %v4318_v43 = vadd.f32 %v4188_v0, %v3784_v24 }
 0x421   : > { %v4725_v16 = vpop.f32.mrf.mxu0  ;;  %5897 = vmatmul.msk.f32.gmra.mxu1 %vm331_vm1, %v8290_v30  ;;  %v5964_v30 = vld [vmem:[%s6648_s6 + $0x238] sm:$0xff] }
 0x422   : > { %v4852_v33 = vadd.f32 %v4722_v29, %v4318_v43  ;;  %6029 = vmatmul.msk.f32.gmra.mxu2 %vm331_vm1, %v5963_v5  ;;  %v6096_v29 = vld [vmem:[%s6648_s6 + $0x249] sm:$0xff] }
 0x423   : > { %6159 = vmatmul.msk.f32.gmra.mxu3 %vm331_vm1, %v6093_v17  ;;  %v6097_v17 = vld [vmem:[%s6648_s6 + $0x259] sm:$0xff] }
 0x424   : > { %6289 = vmatmul.msk.f32.gmra.mxu0 %vm331_vm1, %v8342_v48  ;;  %4916 = vst [vmem:[%s7946_s29 + $0xf8] sm:$0xff] %v4852_v33  ;;  %v4979_v11 = vadd.f32 %v4978_v61, %v4852_v33  ;;  %v5050_v53 = vmul.f32 %v4852_v33, %v4852_v33  ;;  %v8394_v33 = vld [vmem:[%s6648_s6 + $0x25a] sm:$0xff] }
 0x425   : > { %v3657_v63 = vpop.f32.mrf.mxu2 }
 0x426   : > { %v5113_v37 = vadd.f32 %v5112_v25, %v5050_v53  ;;  %v3785_v41 = vadd.f32 %v3657_v63, %v3248_v23  ;;  %v4191_v18 = vpop.f32.mrf.mxu3  ;;  %v3123_v35 = vpop.f32.mrf.mxu1 }
 0x427   : > { %v3249_v46 = vadd.f32 %v3123_v35, %v7553_v12 }
 0x428   : > { %v4319_v36 = vadd.f32 %v4191_v18, %v3785_v41 }
 0x429   : > { %v4728_v51 = vpop.f32.mrf.mxu0  ;;  %5898 = vmatmul.msk.f32.gmra.mxu1 %vm331_vm1, %v8303_v27  ;;  %v5965_v27 = vld [vmem:[%s6648_s6 + $0x240] sm:$0xff] }
 0x42a   : > { %v4853_v4 = vadd.f32 %v4725_v16, %v4319_v36  ;;  %6030 = vmatmul.msk.f32.gmra.mxu2 %vm331_vm1, %v5964_v30  ;;  %v6098_v36 = vld [vmem:[%s6648_s6 + $0x261] sm:$0xff] }
 0x42b   : > { %6160 = vmatmul.msk.f32.gmra.mxu3 %vm331_vm1, %v6094_v55 }
 0x42c   : > { %6290 = vmatmul.msk.f32.gmra.mxu0 %vm331_vm1, %v8355_v7  ;;  %4917 = vst [vmem:[%s7946_s29 + $0x100] sm:$0xff] %v4853_v4  ;;  %v4980_v9 = vadd.f32 %v4979_v11, %v4853_v4  ;;  %v5051_v44 = vmul.f32 %v4853_v4, %v4853_v4 }
 0x42d   : > { %v3660_v20 = vpop.f32.mrf.mxu2 }
 0x42e   : > { %v5114_v13 = vadd.f32 %v5113_v37, %v5051_v44  ;;  %v3786_v3 = vadd.f32 %v3660_v20, %v3249_v46  ;;  %v4194_v6 = vpop.f32.mrf.mxu3  ;;  %v3126_v56 = vpop.f32.mrf.mxu1 }
 0x42f   : > { %v3250_v12 = vadd.f32 %v3126_v56, %v7567_v47 }
 0x430   : > { %v4320_v49 = vadd.f32 %v4194_v6, %v3786_v3 }
 0x431   : > { %v4731_v62 = vpop.f32.mrf.mxu0  ;;  %5899 = vmatmul.msk.f32.gmra.mxu1 %vm331_vm1, %v8316_v28  ;;  %v5966_v28 = vld [vmem:[%s6648_s6 + $0x248] sm:$0xff] }
 0x432   : > { %v4854_v1 = vadd.f32 %v4728_v51, %v4320_v49  ;;  %6031 = vmatmul.msk.f32.gmra.mxu2 %vm331_vm1, %v5965_v27  ;;  %v8407_v51 = vld [vmem:[%s6648_s6 + $0x262] sm:$0xff] }
 0x433   : > { %6161 = vmatmul.msk.f32.gmra.mxu3 %vm331_vm1, %v6095_v22  ;;  %v6099_v27 = vld [vmem:[%s6648_s6 + $0x269] sm:$0xff] }
 0x434   : > { %6291 = vmatmul.msk.f32.gmra.mxu0 %vm331_vm1, %v8368_v32  ;;  %4918 = vst [vmem:[%s7946_s29 + $0x108] sm:$0xff] %v4854_v1  ;;  %v4981_v57 = vadd.f32 %v4980_v9, %v4854_v1  ;;  %v5052_v50 = vmul.f32 %v4854_v1, %v4854_v1  ;;  %v8420_v22 = vld [vmem:[%s6648_s6 + $0x26a] sm:$0xff] }
 0x435   : > { %v3663_v2 = vpop.f32.mrf.mxu2 }
 0x436   : > { %v5115_v15 = vadd.f32 %v5114_v13, %v5052_v50  ;;  %v3787_v31 = vadd.f32 %v3663_v2, %v3250_v12  ;;  %v4197_v38 = vpop.f32.mrf.mxu3  ;;  %v3129_v42 = vpop.f32.mrf.mxu1 }
 0x437   : > { %v3251_v47 = vadd.f32 %v3129_v42, %v7581_v60  ;;  %v6100_v42 = vld [vmem:[%s6648_s6 + $0x271] sm:$0xff] }
 0x438   : > { %v4321_v59 = vadd.f32 %v4197_v38, %v3787_v31 }
 0x439   : > { %v4734_v19 = vpop.f32.mrf.mxu0  ;;  %5900 = vmatmul.msk.f32.gmra.mxu1 %vm331_vm1, %v8329_v52  ;;  %v5967_v52 = vld [vmem:[%s6648_s6 + $0x258] sm:$0xff] }
 0x43a   : > { %v4855_v61 = vadd.f32 %v4731_v62, %v4321_v59  ;;  %6032 = vmatmul.msk.f32.gmra.mxu2 %vm331_vm1, %v5966_v28  ;;  %v8433_v59 = vld [vmem:[%s6648_s6 + $0x272] sm:$0xff] }
 0x43b   : > { %6162 = vmatmul.msk.f32.gmra.mxu3 %vm331_vm1, %v6096_v29 }
 0x43c   : > { %6292 = vmatmul.msk.f32.gmra.mxu0 %vm331_vm1, %v8381_v8  ;;  %4919 = vst [vmem:[%s7946_s29 + $0x110] sm:$0xff] %v4855_v61  ;;  %v4982_v40 = vadd.f32 %v4981_v57, %v4855_v61  ;;  %v5053_v21 = vmul.f32 %v4855_v61, %v4855_v61 }
 0x43d   : > { %v3666_v25 = vpop.f32.mrf.mxu2 }
 0x43e   : > { %v5116_v24 = vadd.f32 %v5115_v15, %v5053_v21  ;;  %v3788_v0 = vadd.f32 %v3666_v25, %v3251_v47  ;;  %v4200_v10 = vpop.f32.mrf.mxu3  ;;  %v3132_v5 = vpop.f32.mrf.mxu1 }
 0x43f   : > { %v3252_v60 = vadd.f32 %v3132_v5, %v7595_v14 }
 0x440   : > { %v4322_v43 = vadd.f32 %v4200_v10, %v3788_v0  ;;  %v6101_v10 = vld [vmem:[%s6648_s6 + $0x281] sm:$0xff] }
 0x441   : > { %v4737_v16 = vpop.f32.mrf.mxu0  ;;  %5901 = vmatmul.msk.f32.gmra.mxu1 %vm331_vm1, %v8342_v48  ;;  %v5968_v48 = vld [vmem:[%s6648_s6 + $0x260] sm:$0xff] }
 0x442   : > { %v4856_v23 = vadd.f32 %v4734_v19, %v4322_v43  ;;  %6033 = vmatmul.msk.f32.gmra.mxu2 %vm331_vm1, %v5967_v52  ;;  %v8446_v52 = vld [vmem:[%s6648_s6 + $0x282] sm:$0xff] }
 0x443   : > { %6163 = vmatmul.msk.f32.gmra.mxu3 %vm331_vm1, %v6097_v17 }
 0x444   : > { %6293 = vmatmul.msk.f32.gmra.mxu0 %vm331_vm1, %v8394_v33  ;;  %4920 = vst [vmem:[%s7946_s29 + $0x118] sm:$0xff] %v4856_v23  ;;  %v4983_v11 = vadd.f32 %v4982_v40, %v4856_v23  ;;  %v5054_v53 = vmul.f32 %v4856_v23, %v4856_v23 }
 0x445   : > { %v3669_v63 = vpop.f32.mrf.mxu2 }
 0x446   : > { %v5117_v37 = vadd.f32 %v5116_v24, %v5054_v53  ;;  %v3789_v41 = vadd.f32 %v3669_v63, %v3252_v60  ;;  %v4203_v18 = vpop.f32.mrf.mxu3  ;;  %v3135_v35 = vpop.f32.mrf.mxu1 }
 0x447   : > { %v3253_v14 = vadd.f32 %v3135_v35, %v7609_v45  ;;  %v8459_v35 = vld [vmem:[%s6648_s6 + $0x28a] sm:$0xff] }
 0x448   : > { %v4323_v30 = vadd.f32 %v4203_v18, %v3789_v41  ;;  %v6102_v41 = vld [vmem:[%s6648_s6 + $0x289] sm:$0xff] }
 0x449   : > { %v4740_v55 = vpop.f32.mrf.mxu0  ;;  %5902 = vmatmul.msk.f32.gmra.mxu1 %vm331_vm1, %v8355_v7  ;;  %v5969_v7 = vld [vmem:[%s6648_s6 + $0x268] sm:$0xff] }
 0x44a   : > { %v4857_v4 = vadd.f32 %v4737_v16, %v4323_v30  ;;  %6034 = vmatmul.msk.f32.gmra.mxu2 %vm331_vm1, %v5968_v48 }
 0x44b   : > { %6164 = vmatmul.msk.f32.gmra.mxu3 %vm331_vm1, %v6098_v36 }
 0x44c   : > { %6294 = vmatmul.msk.f32.gmra.mxu0 %vm331_vm1, %v8407_v51  ;;  %4921 = vst [vmem:[%s7946_s29 + $0x120] sm:$0xff] %v4857_v4  ;;  %v4984_v46 = vadd.f32 %v4983_v11, %v4857_v4  ;;  %v5055_v9 = vmul.f32 %v4857_v4, %v4857_v4 }
 0x44d   : > { %v3672_v44 = vpop.f32.mrf.mxu2 }
 0x44e   : > { %v5118_v20 = vadd.f32 %v5117_v37, %v5055_v9  ;;  %v3790_v13 = vadd.f32 %v3672_v44, %v3253_v14  ;;  %v4206_v3 = vpop.f32.mrf.mxu3  ;;  %v3138_v6 = vpop.f32.mrf.mxu1 }
 0x44f   : > { %v3254_v45 = vadd.f32 %v3138_v6, %v7623_v34 }
 0x450   : > { %v4324_v56 = vadd.f32 %v4206_v3, %v3790_v13  ;;  %v8472_v3 = vld [vmem:[%s6648_s6 + $0x292] sm:$0xff] }
 0x451   : > { %v4743_v49 = vpop.f32.mrf.mxu0  ;;  %5903 = vmatmul.msk.f32.gmra.mxu1 %vm331_vm1, %v8368_v32  ;;  %v5970_v32 = vld [vmem:[%s6648_s6 + $0x270] sm:$0xff] }
 0x452   : > { %v4858_v62 = vadd.f32 %v4740_v55, %v4324_v56  ;;  %6035 = vmatmul.msk.f32.gmra.mxu2 %vm331_vm1, %v5969_v7 }
 0x453   : > { %6165 = vmatmul.msk.f32.gmra.mxu3 %vm331_vm1, %v6099_v27 }
 0x454   : > { %6295 = vmatmul.msk.f32.gmra.mxu0 %vm331_vm1, %v8420_v22  ;;  %4922 = vst [vmem:[%s7946_s29 + $0x128] sm:$0xff] %v4858_v62  ;;  %v4985_v1 = vadd.f32 %v4984_v46, %v4858_v62  ;;  %v5056_v12 = vmul.f32 %v4858_v62, %v4858_v62 }
 0x455   : > { %v3675_v57 = vpop.f32.mrf.mxu2 }
 0x456   : > { %v5119_v50 = vadd.f32 %v5118_v20, %v5056_v12  ;;  %v3791_v2 = vadd.f32 %v3675_v57, %v3254_v45  ;;  %v4209_v15 = vpop.f32.mrf.mxu3  ;;  %v3141_v31 = vpop.f32.mrf.mxu1  ;;  %v6103_v20 = vld [vmem:[%s6648_s6 + $0x291] sm:$0xff]  ;;  %v6104_v57 = vld [vmem:[%s6648_s6 + $0x299] sm:$0xff] }
 0x457   : > { %v3255_v34 = vadd.f32 %v3141_v31, %v7637_v26 }
 0x458   : > { %v4325_v38 = vadd.f32 %v4209_v15, %v3791_v2  ;;  %v8485_v2 = vld [vmem:[%s6648_s6 + $0x29a] sm:$0xff] }
 0x459   : > { %v4746_v28 = vpop.f32.mrf.mxu0  ;;  %5904 = vmatmul.msk.f32.gmra.mxu1 %vm331_vm1, %v8381_v8  ;;  %v5971_v8 = vld [vmem:[%s6648_s6 + $0x280] sm:$0xff] }
 0x45a   : > { %v4859_v29 = vadd.f32 %v4743_v49, %v4325_v38  ;;  %6036 = vmatmul.msk.f32.gmra.mxu2 %vm331_vm1, %v5970_v32 }
 0x45b   : > { %6166 = vmatmul.msk.f32.gmra.mxu3 %vm331_vm1, %v6100_v42 }
 0x45c   : > { %6296 = vmatmul.msk.f32.gmra.mxu0 %vm331_vm1, %v8433_v59  ;;  %4923 = vst [vmem:[%s7946_s29 + $0x130] sm:$0xff] %v4859_v29  ;;  %v4986_v19 = vadd.f32 %v4985_v1, %v4859_v29  ;;  %v5057_v61 = vmul.f32 %v4859_v29, %v4859_v29 }
 0x45d   : > { %v3678_v47 = vpop.f32.mrf.mxu2 }
 0x45e   : > { %v5120_v40 = vadd.f32 %v5119_v50, %v5057_v61  ;;  %v3792_v21 = vadd.f32 %v3678_v47, %v3255_v34  ;;  %v4212_v25 = vpop.f32.mrf.mxu3  ;;  %v3144_v24 = vpop.f32.mrf.mxu1  ;;  %v6105_v47 = vld [vmem:[%s6648_s6 + $0x2a9] sm:$0xff] }
 0x45f   : > { %v3256_v26 = vadd.f32 %v3144_v24, %v7651_v54  ;;  %v8716_v24 = vld [vmem:[#allocation13_spill] sm:$0xff] }
 0x460   : > { %v4326_v0 = vadd.f32 %v4212_v25, %v3792_v21  ;;  %v6235_v21 = vld [vmem:[%s6648_s6 + $0x2aa] sm:$0xff] }
 0x461   : > { %v4749_v5 = vpop.f32.mrf.mxu0  ;;  %5905 = vmatmul.msk.f32.gmra.mxu1 %vm331_vm1, %v8394_v33  ;;  %v5972_v33 = vld [vmem:[%s6648_s6 + $0x288] sm:$0xff] }
 0x462   : > { %v4860_v43 = vadd.f32 %v4746_v28, %v4326_v0  ;;  %6037 = vmatmul.msk.f32.gmra.mxu2 %vm331_vm1, %v5971_v8 }
 0x463   : > { %6167 = vmatmul.msk.f32.gmra.mxu3 %vm331_vm1, %v6101_v10 }
 0x464   : > { %6297 = vmatmul.msk.f32.gmra.mxu0 %vm331_vm1, %v8446_v52  ;;  %4924 = vst [vmem:[%s7946_s29 + $0x138] sm:$0xff] %v4860_v43  ;;  %v4987_v17 = vadd.f32 %v4986_v19, %v4860_v43  ;;  %v5058_v16 = vmul.f32 %v4860_v43, %v4860_v43 }
 0x465   : > { %v3681_v23 = vpop.f32.mrf.mxu2 }
 0x466   : > { %v5121_v60 = vadd.f32 %v5120_v40, %v5058_v16  ;;  %v3793_v11 = vadd.f32 %v3681_v23, %v3256_v26  ;;  %v4215_v53 = vpop.f32.mrf.mxu3  ;;  %v3147_v63 = vpop.f32.mrf.mxu1  ;;  %v5976_v23 = vld [vmem:[%s6648_s6 + $0x2b0] sm:$0xff] }
 0x467   : > { %v3257_v54 = vadd.f32 %v3147_v63, %v7665_v39 }
 0x468   : > { %v4327_v37 = vadd.f32 %v4215_v53, %v3793_v11  ;;  %v6236_v53 = vld [vmem:[%s6648_s6 + $0x2b2] sm:$0xff] }
 0x469   : > { %v4752_v18 = vpop.f32.mrf.mxu0  ;;  %5906 = vmatmul.msk.f32.gmra.mxu1 %vm331_vm1, %v8407_v51  ;;  %v5973_v51 = vld [vmem:[%s6648_s6 + $0x290] sm:$0xff] }
 0x46a   : > { %v4861_v48 = vadd.f32 %v4749_v5, %v4327_v37  ;;  %6038 = vmatmul.msk.f32.gmra.mxu2 %vm331_vm1, %v5972_v33  ;;  %v8717_v33 = vld [vmem:[#allocation15_spill] sm:$0xff] }
 0x46b   : > { %6168 = vmatmul.msk.f32.gmra.mxu3 %vm331_vm1, %v6102_v41 }
 0x46c   : > { %6298 = vmatmul.msk.f32.gmra.mxu0 %vm331_vm1, %v8459_v35  ;;  %4925 = vst [vmem:[%s7946_s29 + $0x140] sm:$0xff] %v4861_v48  ;;  %v4988_v30 = vadd.f32 %v4987_v17, %v4861_v48  ;;  %v5059_v36 = vmul.f32 %v4861_v48, %v4861_v48 }
 0x46d   : > { %v3684_v55 = vpop.f32.mrf.mxu2 }
 0x46e   : > { %v5122_v4 = vadd.f32 %v5121_v60, %v5059_v36  ;;  %v3794_v14 = vadd.f32 %v3684_v55, %v3257_v54  ;;  %v4218_v46 = vpop.f32.mrf.mxu3  ;;  %v3150_v9 = vpop.f32.mrf.mxu1  ;;  %v6106_v60 = vld [vmem:[%s6648_s6 + $0x2b1] sm:$0xff] }
 0x46f   : > { %v3258_v39 = vadd.f32 %v3150_v9, %v7679_v58  ;;  %v8715_v58 = vld [vmem:[#allocation11_spill] sm:$0xff] }
 0x470   : > { %v4328_v44 = vadd.f32 %v4218_v46, %v3794_v14  ;;  %v6107_v14 = vld [vmem:[%s6648_s6 + $0x2b9] sm:$0xff] }
 0x471   : > { %v4755_v13 = vpop.f32.mrf.mxu0  ;;  %5907 = vmatmul.msk.f32.gmra.mxu1 %vm331_vm1, %v8420_v22  ;;  %v5974_v22 = vld [vmem:[%s6648_s6 + $0x298] sm:$0xff] }
 0x472   : > { %v4862_v6 = vadd.f32 %v4752_v18, %v4328_v44  ;;  %6039 = vmatmul.msk.f32.gmra.mxu2 %vm331_vm1, %v5973_v51  ;;  %v6237_v9 = vld [vmem:[%s6648_s6 + $0x2ba] sm:$0xff]  ;;  %v8718_v44 = vld [vmem:[#allocation17_spill] sm:$0xff] }
 0x473   : > { %6169 = vmatmul.msk.f32.gmra.mxu3 %vm331_vm1, %v6103_v20 }
 0x474   : > { %6299 = vmatmul.msk.f32.gmra.mxu0 %vm331_vm1, %v8472_v3  ;;  %4926 = vst [vmem:[%s7946_s29 + $0x148] sm:$0xff] %v4862_v6  ;;  %v4989_v7 = vadd.f32 %v4988_v30, %v4862_v6  ;;  %v5060_v56 = vmul.f32 %v4862_v6, %v4862_v6 }
 0x475   : > { %v3687_v27 = vpop.f32.mrf.mxu2 }
 0x476   : > { %v5123_v49 = vadd.f32 %v5122_v4, %v5060_v56  ;;  %v3795_v62 = vadd.f32 %v3687_v27, %v3258_v39  ;;  %v4221_v45 = vpop.f32.mrf.mxu3  ;;  %v3153_v1 = vpop.f32.mrf.mxu1  ;;  %v5977_v4 = vld [vmem:[%s6648_s6 + $0x2b8] sm:$0xff] }
 0x477   : > { %v3259_v31 = vadd.f32 %v3153_v1, %v8715_v58 }
 0x478   : > { %v4329_v12 = vadd.f32 %v4221_v45, %v3795_v62  ;;  %v5978_v62 = vld [vmem:[%s6648_s6 + $0x2c0] sm:$0xff] }
 0x479   : > { %v4758_v50 = vpop.f32.mrf.mxu0  ;;  %5908 = vmatmul.msk.f32.gmra.mxu1 %vm331_vm1, %v8433_v59  ;;  %v5975_v59 = vld [vmem:[%s6648_s6 + $0x2a8] sm:$0xff] }
 0x47a   : > { %v4863_v15 = vadd.f32 %v4755_v13, %v4329_v12  ;;  %6040 = vmatmul.msk.f32.gmra.mxu2 %vm331_vm1, %v5974_v22  ;;  %v6108_v45 = vld [vmem:[%s6648_s6 + $0x2c1] sm:$0xff] }
 0x47b   : > { %6170 = vmatmul.msk.f32.gmra.mxu3 %vm331_vm1, %v6104_v57  ;;  %v6238_v22 = vld [vmem:[%s6648_s6 + $0x2c2] sm:$0xff]  ;;  %s5171_s6 = sadd.s32 %s6315_s4, %s6309_s5 }
 0x47c   : > { %6300 = vmatmul.msk.f32.gmra.mxu0 %vm331_vm1, %v8485_v2  ;;  %4927 = vst [vmem:[%s7946_s29 + $0x150] sm:$0xff] %v4863_v15  ;;  %v4990_v32 = vadd.f32 %v4989_v7, %v4863_v15  ;;  %v5061_v38 = vmul.f32 %v4863_v15, %v4863_v15  ;;  %v8719_v57 = vld [vmem:[#allocation19_spill] sm:$0xff]  ;;  %s6310_s7 = sshll.u32 %s5171_s6, 3 }
 0x47d   : > { %v3690_v42 = vpop.f32.mrf.mxu2  ;;  %s5173_s10 = scalar_lea.hbm %s8632_s2, %s6310_s7  ;;  %s6418_s7 = scalar_lea.hbm %s8632_s2, 2048 }
 0x47e   : > { %v5124_v28 = vadd.f32 %v5123_v49, %v5061_v38  ;;  %v3796_v29 = vadd.f32 %v3690_v42, %v3259_v31  ;;  %v4224_v34 = vpop.f32.mrf.mxu3  ;;  %v3156_v19 = vpop.f32.mrf.mxu1  ;;  %s5176_s20 = sshll.u32 %s5173_s10, 4  ;;  %s5177_s20 = int_to_ptr.hbm [resolvable:$true] %s5176_s20 }
 0x47f   : > { %v3260_v8 = vadd.f32 %v3156_v19, %v8716_v24  ;;  %v8720_v19 = vld [vmem:[#allocation21_spill] sm:$0xff]  ;;  %s6412_s28 = sshra.s32 %s5177_s20, 4  ;;  %s6413_s28 = int_to_ptr.hbm [resolvable:$true] %s6412_s28 }
 0x480   : > { %v4330_v61 = vadd.f32 %v4224_v34, %v3796_v29  ;;  %s6414_s4 = scalar_lea.hbm %s6413_s28, 512  ;;  %p6419_p2 = scmp.lt.s32.totalorder %s6413_s28, %s8632_s2 }
 0x481   : > { %v4761_v40 = vpop.f32.mrf.mxu0  ;;  %5909 = vmatmul.msk.f32.gmra.mxu1 %vm331_vm1, %v8446_v52  ;;  %p6415_p13 = scmp.ne.s32.totalorder %s6413_s28, %s6414_s4  ;;  %p6420_p4 = scmp.lt.s32.totalorder %s6418_s7, %s6414_s4 }
 0x482   : > { %v4864_v25 = vadd.f32 %v4758_v50, %v4330_v61  ;;  %6041 = vmatmul.msk.f32.gmra.mxu2 %vm331_vm1, %v5975_v59 }
 0x483   : > { %6171 = vmatmul.msk.f32.gmra.mxu3 %vm331_vm1, %v6105_v47  ;;  %p6416_p0 = pnand %p6415_p13, %p6599_p3  ;;  %p6421_p5 = por %p6420_p4, %p6419_p2 }
 0x484   : > { %6301 = vmatmul.msk.f32.gmra.mxu0 %vm331_vm1, %v6235_v21  ;;  %4928 = vst [vmem:[%s7946_s29 + $0x158] sm:$0xff] %v4864_v25  ;;  %v4991_v0 = vadd.f32 %v4990_v32, %v4864_v25  ;;  %v5062_v10 = vmul.f32 %v4864_v25, %v4864_v25 }
 0x485   : > { %v3693_v5 = vpop.f32.mrf.mxu2  ;;  %p6417_p1 = pneg %p6416_p0 }
 0x486   : > { %v5125_v43 = vadd.f32 %v5124_v28, %v5062_v10  ;;  %v3797_v26 = vadd.f32 %v3693_v5, %v3260_v8  ;;  %v4227_v17 = vpop.f32.mrf.mxu3  ;;  %v3159_v16 = vpop.f32.mrf.mxu1 }
 0x487   : > { %v3261_v37 = vadd.f32 %v3159_v16, %v8717_v33  ;;  %p6422_p6 = pnand %p6421_p5, %p6417_p1 }
 0x488   : > { %v4331_v52 = vadd.f32 %v4227_v17, %v3797_v26 }
 0x489   : > { %v4764_v11 = vpop.f32.mrf.mxu0  ;;  %5910 = vmatmul.msk.f32.gmra.mxu1 %vm331_vm1, %v8459_v35 }
 0x48a   : > { %v4865_v63 = vadd.f32 %v4761_v40, %v4331_v52  ;;  %6042 = vmatmul.msk.f32.gmra.mxu2 %vm331_vm1, %v5976_v23 }
 0x48b   : > { %6172 = vmatmul.msk.f32.gmra.mxu3 %vm331_vm1, %v6106_v60 }
 0x48c   : > { %6302 = vmatmul.msk.f32.gmra.mxu0 %vm331_vm1, %v6236_v53  ;;  %4929 = vst [vmem:[%s7946_s29 + $0x160] sm:$0xff] %v4865_v63  ;;  %v4992_v41 = vadd.f32 %v4991_v0, %v4865_v63  ;;  %v5063_v18 = vmul.f32 %v4865_v63, %v4865_v63 }
 0x48d   : > { %v3696_v48 = vpop.f32.mrf.mxu2 }
 0x48e   : > { %v5126_v54 = vadd.f32 %v5125_v43, %v5063_v18  ;;  %v3798_v30 = vadd.f32 %v3696_v48, %v3261_v37  ;;  %v4230_v36 = vpop.f32.mrf.mxu3  ;;  %v3162_v55 = vpop.f32.mrf.mxu1  ;;  %v8721_v43 = vld [vmem:[#allocation23_spill] sm:$0xff] }
 0x48f   : > { %v3262_v20 = vadd.f32 %v3162_v55, %v8718_v44 }
 0x490   : > { %v4332_v35 = vadd.f32 %v4230_v36, %v3798_v30 }
 0x491   : > { %v4767_v46 = vpop.f32.mrf.mxu0  ;;  %5911 = vmatmul.msk.f32.gmra.mxu1 %vm331_vm1, %v8472_v3 }
 0x492   : > { %v4866_v51 = vadd.f32 %v4764_v11, %v4332_v35  ;;  %6043 = vmatmul.msk.f32.gmra.mxu2 %vm331_vm1, %v5977_v4 }
 0x493   : > { %6173 = vmatmul.msk.f32.gmra.mxu3 %vm331_vm1, %v6107_v14 }
 0x494   : > { %6303 = vmatmul.msk.f32.gmra.mxu0 %vm331_vm1, %v6237_v9  ;;  %4930 = vst [vmem:[%s7946_s29 + $0x168] sm:$0xff] %v4866_v51  ;;  %v4993_v13 = vadd.f32 %v4992_v41, %v4866_v51  ;;  %v5064_v6 = vmul.f32 %v4866_v51, %v4866_v51  ;;  %v8722_v41 = vld [vmem:[#allocation25_spill] sm:$0xff]  ;;  %v8723_v51 = vld [vmem:[#allocation27_spill] sm:$0xff] }
 0x495   : > { %v3699_v39 = vpop.f32.mrf.mxu2 }
 0x496   : > { %v5127_v7 = vadd.f32 %v5126_v54, %v5064_v6  ;;  %v3799_v56 = vadd.f32 %v3699_v39, %v3262_v20  ;;  %v4233_v27 = vpop.f32.mrf.mxu3  ;;  %v3165_v49 = vpop.f32.mrf.mxu1 }
 0x497   : > { %v3263_v50 = vadd.f32 %v3165_v49, %v8719_v57 }
 0x498   : > { %v4333_v3 = vadd.f32 %v4233_v27, %v3799_v56 }
 0x499   : > { %v4770_v1 = vpop.f32.mrf.mxu0  ;;  %5912 = vmatmul.msk.f32.gmra.mxu1 %vm331_vm1, %v8485_v2 }
 0x49a   : > { %v4867_v12 = vadd.f32 %v4767_v46, %v4333_v3  ;;  %6044 = vmatmul.msk.f32.gmra.mxu2 %vm331_vm1, %v5978_v62 }
 0x49b   : > { %6174 = vmatmul.msk.f32.gmra.mxu3 %vm331_vm1, %v6108_v45  ;;  %v8724_v45 = vld [vmem:[#allocation29_spill] sm:$0xff] }
 0x49c   : > { %6304 = vmatmul.msk.f32.gmra.mxu0 %vm331_vm1, %v6238_v22  ;;  %4931 = vst [vmem:[%s7946_s29 + $0x170] sm:$0xff] %v4867_v12  ;;  %v4994_v15 = vadd.f32 %v4993_v13, %v4867_v12  ;;  %v5065_v58 = vmul.f32 %v4867_v12, %v4867_v12 }
 0x49d   : > { %v3702_v31 = vpop.f32.mrf.mxu2 }
 0x49e   : > { %v5128_v32 = vadd.f32 %v5127_v7, %v5065_v58  ;;  %v3800_v38 = vadd.f32 %v3702_v31, %v3263_v50  ;;  %v4236_v42 = vpop.f32.mrf.mxu3  ;;  %v3168_v28 = vpop.f32.mrf.mxu1 }
 0x49f   : > { %v3264_v59 = vadd.f32 %v3168_v28, %v8720_v19  ;;  %v8725_v28 = vld [vmem:[#allocation31_spill] sm:$0xff] }
 0x4a0   : > { %v4334_v29 = vadd.f32 %v4236_v42, %v3800_v38 }
 0x4a1   : > { %v4773_v2 = vpop.f32.mrf.mxu0 }
 0x4a2   : > { %v4868_v34 = vadd.f32 %v4770_v1, %v4334_v29 }
 0x4a4   : > { %4932 = vst [vmem:[%s7946_s29 + $0x178] sm:$0xff] %v4868_v34  ;;  %v4995_v61 = vadd.f32 %v4994_v15, %v4868_v34  ;;  %v5066_v47 = vmul.f32 %v4868_v34, %v4868_v34 }
 0x4a5   : > { %v3705_v40 = vpop.f32.mrf.mxu2 }
 0x4a6   : > { %v5129_v21 = vadd.f32 %v5128_v32, %v5066_v47  ;;  %v3801_v25 = vadd.f32 %v3705_v40, %v3264_v59  ;;  %v4239_v24 = vpop.f32.mrf.mxu3  ;;  %v3171_v8 = vpop.f32.mrf.mxu1 }
 0x4a7   : > { %v3265_v26 = vadd.f32 %v3171_v8, %v8721_v43  ;;  %v8726_v8 = vld [vmem:[#allocation33_spill] sm:$0xff] }
 0x4a8   : > { %v4335_v0 = vadd.f32 %v4239_v24, %v3801_v25 }
 0x4a9   : > { %v4776_v10 = vpop.f32.mrf.mxu0 }
 0x4aa   : > { %v4869_v5 = vadd.f32 %v4773_v2, %v4335_v0 }
 0x4ac   : > { %4933 = vst [vmem:[%s7946_s29 + $0x180] sm:$0xff] %v4869_v5  ;;  %v4996_v17 = vadd.f32 %v4995_v61, %v4869_v5  ;;  %v5067_v16 = vmul.f32 %v4869_v5, %v4869_v5 }
 0x4ad   : > { %v3708_v23 = vpop.f32.mrf.mxu2 }
 0x4ae   : > { %v5130_v52 = vadd.f32 %v5129_v21, %v5067_v16  ;;  %v3802_v60 = vadd.f32 %v3708_v23, %v3265_v26  ;;  %v4242_v11 = vpop.f32.mrf.mxu3  ;;  %v3174_v53 = vpop.f32.mrf.mxu1 }
 0x4af   : > { %v3266_v18 = vadd.f32 %v3174_v53, %v8722_v41  ;;  %v8727_v53 = vld [vmem:[#allocation35_spill] sm:$0xff] }
 0x4b0   : > { %v4336_v63 = vadd.f32 %v4242_v11, %v3802_v60 }
 0x4b1   : > { %v4779_v33 = vpop.f32.mrf.mxu0 }
 0x4b2   : > { %v4870_v37 = vadd.f32 %v4776_v10, %v4336_v63 }
 0x4b4   : > { %4934 = vst [vmem:[%s7946_s29 + $0x188] sm:$0xff] %v4870_v37  ;;  %v4997_v48 = vadd.f32 %v4996_v17, %v4870_v37  ;;  %v5068_v54 = vmul.f32 %v4870_v37, %v4870_v37 }
 0x4b5   : > { %v3711_v30 = vpop.f32.mrf.mxu2 }
 0x4b6   : > { %v5131_v36 = vadd.f32 %v5130_v52, %v5068_v54  ;;  %v3803_v55 = vadd.f32 %v3711_v30, %v3266_v18  ;;  %v4245_v4 = vpop.f32.mrf.mxu3  ;;  %v3177_v35 = vpop.f32.mrf.mxu1 }
 0x4b7   : > { %v3267_v44 = vadd.f32 %v3177_v35, %v8723_v51  ;;  %v8728_v35 = vld [vmem:[#allocation8_spill] sm:$0xff] }
 0x4b8   : > { %v4337_v14 = vadd.f32 %v4245_v4, %v3803_v55 }
 0x4b9   : > { %v4782_v46 = vpop.f32.mrf.mxu0 }
 0x4ba   : > { %v4871_v9 = vadd.f32 %v4779_v33, %v4337_v14 }
 0x4bc   : > { %4935 = vst [vmem:[%s7946_s29 + $0x190] sm:$0xff] %v4871_v9  ;;  %v4998_v20 = vadd.f32 %v4997_v48, %v4871_v9  ;;  %v5069_v13 = vmul.f32 %v4871_v9, %v4871_v9 }
 0x4bd   : > { %v3714_v6 = vpop.f32.mrf.mxu2 }
 0x4be   : > { %v5132_v39 = vadd.f32 %v5131_v36, %v5069_v13  ;;  %v3804_v7 = vadd.f32 %v3714_v6, %v3267_v44  ;;  %v4248_v56 = vpop.f32.mrf.mxu3  ;;  %v3180_v27 = vpop.f32.mrf.mxu1 }
 0x4bf   : > { %v3268_v1 = vadd.f32 %v3180_v27, %v8724_v45  ;;  %v8729_v27 = vld [vmem:[#allocation9_spill] sm:$0xff] }
 0x4c0   : > { %v4338_v49 = vadd.f32 %v4248_v56, %v3804_v7 }
 0x4c1   : > { %v4785_v62 = vpop.f32.mrf.mxu0 }
 0x4c2   : > { %v4872_v3 = vadd.f32 %v4782_v46, %v4338_v49 }
 0x4c4   : > { %4936 = vst [vmem:[%s7946_s29 + $0x198] sm:$0xff] %v4872_v3  ;;  %v4999_v22 = vadd.f32 %v4998_v20, %v4872_v3  ;;  %v5070_v12 = vmul.f32 %v4872_v3, %v4872_v3 }
 0x4c5   : > { %v3717_v57 = vpop.f32.mrf.mxu2 }
 0x4c6   : > { %v5133_v50 = vadd.f32 %v5132_v39, %v5070_v12  ;;  %v3805_v15 = vadd.f32 %v3717_v57, %v3268_v1  ;;  %v4251_v58 = vpop.f32.mrf.mxu3  ;;  %v3183_v31 = vpop.f32.mrf.mxu1 }
 0x4c7   : > { %v3269_v29 = vadd.f32 %v3183_v31, %v8725_v28  ;;  %v8730_v31 = vld [vmem:[#allocation10_spill] sm:$0xff] }
 0x4c8   : > { %v4339_v32 = vadd.f32 %v4251_v58, %v3805_v15 }
 0x4c9   : > { %v4788_v38 = vpop.f32.mrf.mxu0 }
 0x4ca   : > { %v4873_v42 = vadd.f32 %v4785_v62, %v4339_v32 }
 0x4cc   : > { %4937 = vst [vmem:[%s7946_s29 + $0x1a0] sm:$0xff] %v4873_v42  ;;  %v5000_v2 = vadd.f32 %v4999_v22, %v4873_v42  ;;  %v5071_v34 = vmul.f32 %v4873_v42, %v4873_v42 }
 0x4cd   : > { %v3720_v19 = vpop.f32.mrf.mxu2 }
 0x4ce   : > { %v5134_v59 = vadd.f32 %v5133_v50, %v5071_v34  ;;  %v3806_v61 = vadd.f32 %v3720_v19, %v3269_v29  ;;  %v4254_v47 = vpop.f32.mrf.mxu3  ;;  %v3186_v40 = vpop.f32.mrf.mxu1 }
 0x4cf   : > { %v3270_v0 = vadd.f32 %v3186_v40, %v8726_v8  ;;  %v8731_v40 = vld [vmem:[#allocation12_spill] sm:$0xff] }
 0x4d0   : > { %v4340_v21 = vadd.f32 %v4254_v47, %v3806_v61 }
 0x4d1   : > { %v4791_v25 = vpop.f32.mrf.mxu0 }
 0x4d2   : > { %v4874_v24 = vadd.f32 %v4788_v38, %v4340_v21 }
 0x4d4   : > { %4938 = vst [vmem:[%s7946_s29 + $0x1a8] sm:$0xff] %v4874_v24  ;;  %v5001_v10 = vadd.f32 %v5000_v2, %v4874_v24  ;;  %v5072_v5 = vmul.f32 %v4874_v24, %v4874_v24 }
 0x4d5   : > { %v3723_v43 = vpop.f32.mrf.mxu2 }
 0x4d6   : > { %v5135_v26 = vadd.f32 %v5134_v59, %v5072_v5  ;;  %v3807_v17 = vadd.f32 %v3723_v43, %v3270_v0  ;;  %v4257_v16 = vpop.f32.mrf.mxu3  ;;  %v3189_v23 = vpop.f32.mrf.mxu1 }
 0x4d7   : > { %v3271_v63 = vadd.f32 %v3189_v23, %v8727_v53  ;;  %v8732_v23 = vld [vmem:[#allocation14_spill] sm:$0xff] }
 0x4d8   : > { %v4341_v52 = vadd.f32 %v4257_v16, %v3807_v17 }
 0x4d9   : > { %v4794_v60 = vpop.f32.mrf.mxu0 }
 0x4da   : > { %v4875_v11 = vadd.f32 %v4791_v25, %v4341_v52 }
 0x4dc   : > { %4939 = vst [vmem:[%s7946_s29 + $0x1b0] sm:$0xff] %v4875_v11  ;;  %v5002_v33 = vadd.f32 %v5001_v10, %v4875_v11  ;;  %v5073_v37 = vmul.f32 %v4875_v11, %v4875_v11 }
 0x4dd   : > { %v3726_v41 = vpop.f32.mrf.mxu2 }
 0x4de   : > { %v5136_v18 = vadd.f32 %v5135_v26, %v5073_v37  ;;  %v3808_v48 = vadd.f32 %v3726_v41, %v3271_v63  ;;  %v4260_v54 = vpop.f32.mrf.mxu3  ;;  %v3192_v30 = vpop.f32.mrf.mxu1 }
 0x4df   : > { %v3272_v14 = vadd.f32 %v3192_v30, %v8728_v35  ;;  %v8733_v30 = vld [vmem:[#allocation16_spill] sm:$0xff] }
 0x4e0   : > { %v4342_v36 = vadd.f32 %v4260_v54, %v3808_v48 }
 0x4e1   : > { %v4797_v55 = vpop.f32.mrf.mxu0 }
 0x4e2   : > { %v4876_v4 = vadd.f32 %v4794_v60, %v4342_v36 }
 0x4e4   : > { %4940 = vst [vmem:[%s7946_s29 + $0x1b8] sm:$0xff] %v4876_v4  ;;  %v5003_v46 = vadd.f32 %v5002_v33, %v4876_v4  ;;  %v5074_v9 = vmul.f32 %v4876_v4, %v4876_v4 }
 0x4e5   : > { %v3729_v51 = vpop.f32.mrf.mxu2 }
 0x4e6   : > { %v5137_v44 = vadd.f32 %v5136_v18, %v5074_v9  ;;  %v3809_v20 = vadd.f32 %v3729_v51, %v3272_v14  ;;  %v4263_v13 = vpop.f32.mrf.mxu3  ;;  %v3195_v6 = vpop.f32.mrf.mxu1 }
 0x4e7   : > { %v3273_v49 = vadd.f32 %v3195_v6, %v8729_v27 }
 0x4e8   : > { %v4343_v39 = vadd.f32 %v4263_v13, %v3809_v20  ;;  %v8734_v13 = vld [vmem:[#allocation18_spill] sm:$0xff] }
 0x4e9   : > { %v4800_v7 = vpop.f32.mrf.mxu0 }
 0x4ea   : > { %v4877_v56 = vadd.f32 %v4797_v55, %v4343_v39 }
 0x4ec   : > { %4941 = vst [vmem:[%s7946_s29 + $0x1c0] sm:$0xff] %v4877_v56  ;;  %v5004_v62 = vadd.f32 %v5003_v46, %v4877_v56  ;;  %v5075_v3 = vmul.f32 %v4877_v56, %v4877_v56 }
 0x4ed   : > { %v3732_v45 = vpop.f32.mrf.mxu2 }
 0x4ee   : > { %v5138_v1 = vadd.f32 %v5137_v44, %v5075_v3  ;;  %v3810_v22 = vadd.f32 %v3732_v45, %v3273_v49  ;;  %v4266_v12 = vpop.f32.mrf.mxu3  ;;  %v3198_v57 = vpop.f32.mrf.mxu1 }
 0x4ef   : > { %v3274_v32 = vadd.f32 %v3198_v57, %v8730_v31 }
 0x4f0   : > { %v4344_v50 = vadd.f32 %v4266_v12, %v3810_v22  ;;  %v8735_v12 = vld [vmem:[#allocation20_spill] sm:$0xff] }
 0x4f1   : > { %v4803_v15 = vpop.f32.mrf.mxu0 }
 0x4f2   : > { %v4878_v58 = vadd.f32 %v4800_v7, %v4344_v50 }
 0x4f4   : > { %4942 = vst [vmem:[%s7946_s29 + $0x1c8] sm:$0xff] %v4878_v58  ;;  %v5005_v38 = vadd.f32 %v5004_v62, %v4878_v58  ;;  %v5076_v42 = vmul.f32 %v4878_v58, %v4878_v58 }
 0x4f5   : > { %v3735_v28 = vpop.f32.mrf.mxu2 }
 0x4f6   : > { %v5139_v29 = vadd.f32 %v5138_v1, %v5076_v42  ;;  %v3811_v2 = vadd.f32 %v3735_v28, %v3274_v32  ;;  %v4269_v34 = vpop.f32.mrf.mxu3  ;;  %v3201_v19 = vpop.f32.mrf.mxu1 }
 0x4f7   : > { %v3275_v21 = vadd.f32 %v3201_v19, %v8731_v40 }
 0x4f8   : > { %v4345_v59 = vadd.f32 %v4269_v34, %v3811_v2 }
 0x4f9   : > { %v4806_v61 = vpop.f32.mrf.mxu0 }
 0x4fa   : > { %v4879_v47 = vadd.f32 %v4803_v15, %v4345_v59 }
 0x4fc   : > { %4943 = vst [vmem:[%s7946_s29 + $0x1d0] sm:$0xff] %v4879_v47  ;;  %v5006_v25 = vadd.f32 %v5005_v38, %v4879_v47  ;;  %v5077_v24 = vmul.f32 %v4879_v47, %v4879_v47 }
 0x4fd   : > { %v3738_v8 = vpop.f32.mrf.mxu2 }
 0x4fe   : > { %v5140_v0 = vadd.f32 %v5139_v29, %v5077_v24  ;;  %v3812_v10 = vadd.f32 %v3738_v8, %v3275_v21  ;;  %v4272_v5 = vpop.f32.mrf.mxu3  ;;  %v3204_v43 = vpop.f32.mrf.mxu1 }
 0x4ff   : > { %v3276_v52 = vadd.f32 %v3204_v43, %v8732_v23 }
 0x500   : > { %v4346_v26 = vadd.f32 %v4272_v5, %v3812_v10 }
 0x501   : > { %v4809_v17 = vpop.f32.mrf.mxu0 }
 0x502   : > { %v4880_v16 = vadd.f32 %v4806_v61, %v4346_v26 }
 0x504   : > { %4944 = vst [vmem:[%s7946_s29 + $0x1d8] sm:$0xff] %v4880_v16  ;;  %v5007_v60 = vadd.f32 %v5006_v25, %v4880_v16  ;;  %v5078_v11 = vmul.f32 %v4880_v16, %v4880_v16 }
 0x505   : > { %v3741_v53 = vpop.f32.mrf.mxu2 }
 0x506   : > { %v5141_v63 = vadd.f32 %v5140_v0, %v5078_v11  ;;  %v3813_v33 = vadd.f32 %v3741_v53, %v3276_v52  ;;  %v4275_v37 = vpop.f32.mrf.mxu3  ;;  %v3207_v41 = vpop.f32.mrf.mxu1 }
 0x507   : > { %v3277_v36 = vadd.f32 %v3207_v41, %v8733_v30 }
 0x508   : > { %v4347_v18 = vadd.f32 %v4275_v37, %v3813_v33 }
 0x509   : > { %v4812_v54 = vpop.f32.mrf.mxu0 }
 0x50a   : > { %v4881_v48 = vadd.f32 %v4809_v17, %v4347_v18 }
 0x50c   : > { %4945 = vst [vmem:[%s7946_s29 + $0x1e0] sm:$0xff] %v4881_v48  ;;  %v5008_v55 = vadd.f32 %v5007_v60, %v4881_v48  ;;  %v5079_v4 = vmul.f32 %v4881_v48, %v4881_v48 }
 0x50d   : > { %v3744_v35 = vpop.f32.mrf.mxu2 }
 0x50e   : > { %v5142_v14 = vadd.f32 %v5141_v63, %v5079_v4  ;;  %v3814_v46 = vadd.f32 %v3744_v35, %v3277_v36  ;;  %v4278_v9 = vpop.f32.mrf.mxu3  ;;  %v3210_v51 = vpop.f32.mrf.mxu1 }
 0x50f   : > { %v3278_v6 = vadd.f32 %v3210_v51, %v8734_v13 }
 0x510   : > { %v4348_v44 = vadd.f32 %v4278_v9, %v3814_v46 }
 0x511   : > { %v4815_v27 = vpop.f32.mrf.mxu0 }
 0x512   : > { %v4882_v20 = vadd.f32 %v4812_v54, %v4348_v44 }
 0x514   : > { %4946 = vst [vmem:[%s7946_s29 + $0x1e8] sm:$0xff] %v4882_v20  ;;  %v5009_v39 = vadd.f32 %v5008_v55, %v4882_v20  ;;  %v5080_v7 = vmul.f32 %v4882_v20, %v4882_v20 }
 0x515   : > { %v3747_v56 = vpop.f32.mrf.mxu2 }
 0x516   : > { %v5143_v49 = vadd.f32 %v5142_v14, %v5080_v7  ;;  %v3815_v62 = vadd.f32 %v3747_v56, %v3278_v6  ;;  %v4281_v3 = vpop.f32.mrf.mxu3  ;;  %v3213_v1 = vpop.f32.mrf.mxu1 }
 0x517   : > { %v3279_v57 = vadd.f32 %v3213_v1, %v8735_v12 }
 0x518   : > { %v4349_v45 = vadd.f32 %v4281_v3, %v3815_v62 }
 0x519   : > { %v4818_v42 = vpop.f32.mrf.mxu0 }
 0x51a   : > { %v4883_v22 = vadd.f32 %v4815_v27, %v4349_v45 }
 0x51c   : > { %4947 = vst [vmem:[%s7946_s29 + $0x1f0] sm:$0xff] %v4883_v22  ;;  %v5010_v50 = vadd.f32 %v5009_v39, %v4883_v22  ;;  %v5081_v15 = vmul.f32 %v4883_v22, %v4883_v22 }
 0x51d   : > { %v3750_v58 = vpop.f32.mrf.mxu2 }
 0x51e   : > { %v5144_v31 = vadd.f32 %v5143_v49, %v5081_v15  ;;  %v3816_v32 = vadd.f32 %v3750_v58, %v3279_v57  ;;  %v4284_v38 = vpop.f32.mrf.mxu3 }
 0x520   : > { %v4350_v28 = vadd.f32 %v4284_v38, %v3816_v32 }
 0x522   : > { %v4884_v29 = vadd.f32 %v4818_v42, %v4350_v28 }
 0x524   : > { %4948 = vst [vmem:[%s7946_s29 + $0x1f8] sm:$0xff] %v4884_v29  ;;  %v5011_v2 = vadd.f32 %v5010_v50, %v4884_v29  ;;  %v5082_v34 = vmul.f32 %v4884_v29, %v4884_v29 }
 0x525   : > { %6425 = shalt.err (!%p6422_p6)
}
 0x526   : > { %s6526_s16 = smov 128   ;;  %s6527_s29 = smov 8   ;;  %v5012_v19 = vrot.slane %v5011_v2, 4  ;;  %v5145_v59 = vadd.f32 %v5144_v31, %v5082_v34 }
 0x527   : > { %6320 = dma.vmem_to_hbm [thread:$0]  (%p6599_p3), %s5175_s11, 8192, %s5177_s20, %s5154_s24, %s6526_s16, %s6526_s16, %s6527_s29  }
 0x528   : > { %s5189_s10 = sadd.s32 %s6508_s15, %s6311_s21  ;;  %v5013_v61 = vadd.f32 %v5012_v19, %v5011_v2  ;;  %v5146_v47 = vrot.slane %v5145_v59, 4  ;;  %s5320_s5 = sshll.u32 %s7928_s27, 1 }
 0x529   : > { %s6312_s6 = sshll.u32 %s5189_s10, 1  ;;  %s190_s11 = scalar_lea.vmem [#allocation4], %s5320_s5 }
 0x52a   : > { %v5014_v40 = vrot.slane %v5013_v61, 2  ;;  %v5147_v21 = vadd.f32 %v5146_v47, %v5145_v59  ;;  %s5191_s7 = scalar_lea.hbm %s8633_s3, %s6312_s6  ;;  %s5193_s20 = sshll.u32 %s190_s11, 4  ;;  %s5194_s20 = int_to_ptr.vmem [resolvable:$true] %s5193_s20 }
 0x52b   : > { %s5195_s24 = sshll.u32 %s5191_s7, 4  ;;  %s5159_s15 = scalar_lea.sflag [#allocation5], %s7928_s27  ;;  %s5196_s24 = int_to_ptr.hbm [resolvable:$true] %s5195_s24 }
 0x52c   : > { %v5015_v25 = vadd.f32 %v5014_v40, %v5013_v61  ;;  %v5148_v24 = vrot.slane %v5147_v21, 2  ;;  %s6440_s21 = sshra.s32 %s5196_s24, 4  ;;  %s6446_s29 = scalar_lea.hbm %s8633_s3, 8  ;;  %s6441_s21 = int_to_ptr.hbm [resolvable:$true] %s6440_s21 }
 0x52d   : > { %s6442_s8 = scalar_lea.hbm %s6441_s21, 2  ;;  %p6447_p11 = scmp.lt.s32.totalorder %s6441_s21, %s8633_s3 }
 0x52e   : > { %v5016_v8 = vrot.slane %v5015_v25, 1  ;;  %v5149_v0 = vadd.f32 %v5148_v24, %v5147_v21  ;;  %p6443_p7 = scmp.ne.s32.totalorder %s6441_s21, %s6442_s8  ;;  %p6448_p12 = scmp.lt.s32.totalorder %s6446_s29, %s6442_s8 }
 0x530   : > { %v5017_v10 = vadd.f32 %v5016_v8, %v5015_v25  ;;  %v5150_v5 = vrot.slane %v5149_v0, 1  ;;  %p6444_p9 = pnand %p6443_p7, %p6599_p3  ;;  %p6449_p13 = por %p6448_p12, %p6447_p11 }
 0x532   : > { %5018 = vst [vmem:[%s190_s11] sm:$0x1] %v5017_v10  ;;  %v5151_v43 = vadd.f32 %v5150_v5, %v5149_v0  ;;  %p6445_p10 = pneg %p6444_p9 }
 0x534   : > { %5152 = vst [vmem:[%s190_s11 + $0x1] sm:$0x1] %v5151_v43  ;;  %p6450_p0 = pnand %p6449_p13, %p6445_p10 }
 0x536   : > { %6453 = shalt.err (!%p6450_p0)
}
 0x537   : > { %6321 = dma.vmem_to_hbm [thread:$0]  (%p6599_p3), %s5194_s20, 32, %s5196_s24, %s5159_s15  }
 0x538 PF: > { %p6331_p1 = scmp.ge.s32.totalorder %s6524_s19, 2  ;;  %s5207_s27 = sand.u32 1, %s6496_s12  }
 0x539   : > { %s5208_s6 = scalar_lea.sflag [#allocation3], %s5207_s27 }
 0x53a   : > { %p6325_p2 = pnand %p6331_p1, %p6608_p8 }
 0x53c   : > { %p6326_p4 = pneg %p6325_p2 }
 0x53e   : > { %6487 = dma.done.wait (%p6326_p4), %s5208_s6, 8192  }
 0x53f   : > { %6489 = vsyncadd (%p6326_p4), %s5208_s6, 4294959104  ;;  %s5218_s28 = scalar_lea.sflag [#allocation5], %s5207_s27 }
 0x540   : > { %6491 = dma.done.wait (%p6326_p4), %s5218_s28, 32  }
 0x541   : > { %6493 = vsyncadd (%p6326_p4), %s5218_s28, 4294967264  ;;  %s20_s19 = sadd.s32 1, %s6524_s19   ;;  %s8736_s12 = smov %s6500_s13 }
 0x542   : > { %p17_p5 = scmp.ge.s32.totalorder %s20_s19, 6   ;;  %s8737_s13 = smov %s6504_s14 }
 0x543   : > { %s8738_s14 = smov %s6617_s30  ;;  %s8739_s15 = smov %s6516_s17 }
 0x544   : > { %s8740_s16 = smov %s6520_s18  ;;  %s8741_s17 = smov %s8744_s22 }
 0x545   : > { %s8742_s18 = smov %s8748_s23  ;;  %19 = sbr.rel (!%p17_p5) target bundleno = 7 (0x7), region = 91 }
 0x54a   :  { %5224 = vsyncpa [#allocation3], 1 }
 0x54b   :  { %5226 = vsyncpa [#allocation3 + $0x1], 1 }
 0x54c   :  { %5227 = vsyncpa [#allocation5], 1 }
 0x54d   :  { %5229 = vsyncpa [#allocation5 + $0x1], 1 }

</bundles_post_ra>
